<compile_context>
chip_gen: v5e
topology: v5e:2x2
jax: 0.10.0
libtpu: 0.0.40
codegen_flags: <defaults>
</compile_context>

<pallas_src>
import jax
import jax.numpy as jnp
from jax.experimental import pallas as pl
from jax.experimental.pallas import tpu as pltpu

EPS = 1e-5          # nn.BatchNorm2d default eps
NEG_SLOPE = 0.1     # nn.LeakyReLU(0.1) used by the WideResNet BasicBlock


def _leaky(x):
    return jnp.where(x > 0, x, NEG_SLOPE * x)


# --------------------------------------------------------------------------
# Fused BasicBlock kernel (one pallas_call per block)
# --------------------------------------------------------------------------

def _make_block_kernel(H, W, Cin, Cout, stride, equal, abr):
    """Builds a kernel specialized on the static block configuration."""
    Ho, Wo = H // stride, W // stride

    def kernel(*args):
        (x_ref, s1_ref, b1_ref, w1_ref, s2_ref, b2_ref, w2_ref) = args[:7]
        rest = args[7:]
        k = 0
        wsc_ref = None
        sel_ref = None
        if not equal:
            wsc_ref = rest[k]; k += 1
        if stride > 1:
            sel_ref = rest[k]; k += 1
        o_ref, pad1_ref, pad2_ref = rest[k], rest[k + 1], rest[k + 2]

        x = x_ref[0]                                     # (H, W, Cin) f32

        # ---- BN1 + LeakyReLU (folded affine), pure VPU work ----
        act = _leaky(x * s1_ref[...] + b1_ref[...])
        # torch equalInOut / activate_before_residual branches:
        conv1_in = act if (equal or abr) else x

        # ---- conv1: pad into VMEM scratch, im2col, one MXU matmul ----
        pad1_ref[...] = jnp.zeros_like(pad1_ref)
        pad1_ref[pl.ds(1, H), pl.ds(1, W), :] = conv1_in
        xp = pad1_ref[...]                               # (H+2, W+2, Cin)
        taps = [xp[dy:dy + H, dx:dx + W, :].reshape(H * W, Cin)
                for dy in range(3) for dx in range(3)]
        patches = jnp.concatenate(taps, axis=1)          # (H*W, 9*Cin)
        y1 = jnp.dot(patches, w1_ref[...],
                     preferred_element_type=jnp.float32)  # (H*W, Cout)
        if stride > 1:
            # stride-s conv (pad=1, k=3) == stride-1 conv sampled at (s*i, s*j).
            # Decimate inside VMEM with a one-hot selection matmul instead of a
            # post-hoc XLA strided slice (no HBM round trip).
            y1 = jnp.dot(sel_ref[...], y1,
                         preferred_element_type=jnp.float32)  # (Ho*Wo, Cout)

        # ---- BN2 + LeakyReLU fused on the f32 accumulator ----
        h = _leaky(y1 * s2_ref[...] + b2_ref[...])       # (Ho*Wo, Cout)
        # TODO(synk): dropout (dropRate > 0) not implemented; dropRate==0 -> identity.

        # ---- conv2 (stride 1, pad 1) on the VMEM-resident tile ----
        pad2_ref[...] = jnp.zeros_like(pad2_ref)
        pad2_ref[pl.ds(1, Ho), pl.ds(1, Wo), :] = h.reshape(Ho, Wo, Cout)
        hp = pad2_ref[...]                               # (Ho+2, Wo+2, Cout)
        taps2 = [hp[dy:dy + Ho, dx:dx + Wo, :].reshape(Ho * Wo, Cout)
                 for dy in range(3) for dx in range(3)]
        patches2 = jnp.concatenate(taps2, axis=1)        # (Ho*Wo, 9*Cout)
        y2 = jnp.dot(patches2, w2_ref[...],
                     preferred_element_type=jnp.float32)  # (Ho*Wo, Cout)

        # ---- residual / 1x1 shortcut, also in-kernel ----
        if equal:
            res = x.reshape(H * W, Cin)                  # identity (stride == 1)
        else:
            sc = (act if abr else x).reshape(H * W, Cin)
            if stride > 1:
                sc = jnp.dot(sel_ref[...], sc,
                             preferred_element_type=jnp.float32)
            res = jnp.dot(sc, wsc_ref[...],
                          preferred_element_type=jnp.float32)

        o_ref[0] = (y2 + res).astype(o_ref.dtype)

    return kernel


def basic_block_forward(x, p, activate_before_residual):
    """One WideResNet BasicBlock == one fused pallas_call."""
    N, H, W, Cin = x.shape
    Cout = p["w1"].shape[-1]
    stride, equal = p["stride"], p["equal"]
    if equal and stride != 1:
        raise ValueError("identity shortcut requires stride == 1 (as in torch)")
    Ho, Wo = H // stride, W // stride

    inputs = [x,
              p["bn1"][0], p["bn1"][1], p["w1"].reshape(9 * Cin, Cout),
              p["bn2"][0], p["bn2"][1], p["w2"].reshape(9 * Cout, Cout)]
    in_specs = [
        pl.BlockSpec((1, H, W, Cin), lambda n: (n, 0, 0, 0)),
        pl.BlockSpec((1, Cin), lambda n: (0, 0)),
        pl.BlockSpec((1, Cin), lambda n: (0, 0)),
        pl.BlockSpec((9 * Cin, Cout), lambda n: (0, 0)),
        pl.BlockSpec((1, Cout), lambda n: (0, 0)),
        pl.BlockSpec((1, Cout), lambda n: (0, 0)),
        pl.BlockSpec((9 * Cout, Cout), lambda n: (0, 0)),
    ]
    if not equal:
        inputs.append(p["w_sc"])
        in_specs.append(pl.BlockSpec((Cin, Cout), lambda n: (0, 0)))
    if stride > 1:
        # One-hot row-selection matrix implementing the (s*i, s*j) subsampling.
        k_idx = jnp.arange(Ho * Wo)
        src = (stride * (k_idx // Wo)) * W + stride * (k_idx % Wo)
        sel = jax.nn.one_hot(src, H * W, dtype=jnp.float32)   # (Ho*Wo, H*W)
        inputs.append(sel)
        in_specs.append(pl.BlockSpec((Ho * Wo, H * W), lambda n: (0, 0)))

    kernel = _make_block_kernel(H, W, Cin, Cout, stride, equal,
                                activate_before_residual)
    y = pl.pallas_call(
        kernel,
        out_shape=jax.ShapeDtypeStruct((N, Ho * Wo, Cout), x.dtype),
        grid=(N,),
        in_specs=in_specs,
        out_specs=pl.BlockSpec((1, Ho * Wo, Cout), lambda n: (n, 0, 0)),
        scratch_shapes=[pltpu.VMEM((H + 2, W + 2, Cin), jnp.float32),
                        pltpu.VMEM((Ho + 2, Wo + 2, Cout), jnp.float32)],
        compiler_params=pltpu.CompilerParams(
            dimension_semantics=("parallel",)),
    )(*inputs)
    # Free XLA reshape back to NHWC (kernel writes a 2-D (H*W, C) slab per image).
    return y.reshape(N, Ho, Wo, Cout)


def network_block_forward(x, params_list, activate_before_residual):
    for p in params_list:
        x = basic_block_forward(x, p, activate_before_residual)
    return x


# --------------------------------------------------------------------------
# Parameter init (deterministic, synthetic), matching the PyTorch module
# --------------------------------------------------------------------------

def _init_bn(key, c):
    k1, k2, k3, k4 = jax.random.split(key, 4)
    gamma = 1.0 + 0.1 * jax.random.normal(k1, (c,), jnp.float32)
    beta = 0.1 * jax.random.normal(k2, (c,), jnp.float32)
    running_mean = 0.1 * jax.random.normal(k3, (c,), jnp.float32)
    running_var = 1.0 + 0.1 * jax.random.uniform(k4, (c,), jnp.float32)
    scale = gamma / jnp.sqrt(running_var + EPS)
    bias = beta - running_mean * scale
    return scale.reshape(1, c), bias.reshape(1, c)


def init_basic_block(key, in_planes, out_planes, stride):
    ks = jax.random.split(key, 5)
    p = {
        "bn1": _init_bn(ks[0], in_planes),
        "bn2": _init_bn(ks[1], out_planes),
        "w1": jax.random.normal(ks[2], (3, 3, in_planes, out_planes), jnp.float32)
              * (2.0 / (9 * in_planes)) ** 0.5,
        "w2": jax.random.normal(ks[3], (3, 3, out_planes, out_planes), jnp.float32)
              * (2.0 / (9 * out_planes)) ** 0.5,
        "stride": stride,
        "equal": in_planes == out_planes,   # torch: equalInOut
    }
    p["w_sc"] = (None if p["equal"] else
                 jax.random.normal(ks[4], (in_planes, out_planes), jnp.float32)
                 * (2.0 / in_planes) ** 0.5)
    return p


def init_network_block(key, nb_layers, in_planes, out_planes, stride):
    keys = jax.random.split(key, int(nb_layers))
    return [init_basic_block(keys[i],
                             in_planes if i == 0 else out_planes,
                             out_planes,
                             stride if i == 0 else 1)
            for i in range(int(nb_layers))]


# --------------------------------------------------------------------------
# Plain-JAX reference (for numerical verification)
# --------------------------------------------------------------------------

def _ref_bn_lrelu(x, scale, bias):
    y = x * scale.reshape(1, 1, 1, -1) + bias.reshape(1, 1, 1, -1)
    return jnp.where(y > 0, y, NEG_SLOPE * y)


def _ref_conv3x3(x, w, stride):
    return jax.lax.conv_general_dilated(
        x, w, (stride, stride), ((1, 1), (1, 1)),
        dimension_numbers=("NHWC", "HWIO", "NHWC"))


def _ref_conv1x1(x, w, stride):
    return jax.lax.conv_general_dilated(
        x, w.reshape(1, 1, *w.shape), (stride, stride), ((0, 0), (0, 0)),
        dimension_numbers=("NHWC", "HWIO", "NHWC"))


def _ref_basic_block(x, p, abr):
    equal, stride = p["equal"], p["stride"]
    if (not equal) and abr:
        x = _ref_bn_lrelu(x, *p["bn1"])
        out = x
    else:
        out = _ref_bn_lrelu(x, *p["bn1"])
    h = _ref_conv3x3(out if equal else x, p["w1"], stride)
    h = _ref_bn_lrelu(h, *p["bn2"])
    res = x if equal else _ref_conv1x1(x, p["w_sc"], stride)
    return _ref_conv3x3(h, p["w2"], 1) + res


def _ref_network_block(x, params_list, abr):
    for p in params_list:
        x = _ref_basic_block(x, p, abr)
    return x


# --------------------------------------------------------------------------

if __name__ == "__main__":
    key = jax.random.PRNGKey(0)
    kx, kp = jax.random.split(key)

    # NetworkBlock(nb_layers=2, in_planes=4, out_planes=8, block=BasicBlock,
    #              stride=2, dropRate=0.0, activate_before_residual=True)
    N, C_IN, HW, C_OUT = 2, 4, 16, 8
    NB_LAYERS, STRIDE, ABR = 2, 2, True

    x_nchw = jax.random.normal(kx, (N, C_IN, HW, HW), jnp.float32)   # PyTorch-style input
    x = jnp.transpose(x_nchw, (0, 2, 3, 1))                          # -> NHWC for kernels

    params = init_network_block(kp, NB_LAYERS, C_IN, C_OUT, STRIDE)

    fwd = jax.jit(lambda xx: network_block_forward(xx, params, ABR))
    y = jax.block_until_ready(fwd(x))
    assert y.shape == (N, HW // STRIDE, HW // STRIDE, C_OUT), y.shape

    y_ref = _ref_network_block(x, params, ABR)
    max_err = float(jnp.max(jnp.abs(y - y_ref)))
    assert max_err < 5e-4, f"mismatch vs reference, max abs err = {max_err}"

    print("KERNEL_OK")
</pallas_src>

<mosaic_0001>
module attributes {stable_mosaic.version = 11 : i64} {
  func.func @kernel(%arg0: i32, %arg1: memref<1x16x16x4xf32, #tpu.memory_space<vmem>>, %arg2: memref<1x4xf32, #tpu.memory_space<vmem>>, %arg3: memref<1x4xf32, #tpu.memory_space<vmem>>, %arg4: memref<36x8xf32, #tpu.memory_space<vmem>>, %arg5: memref<1x8xf32, #tpu.memory_space<vmem>>, %arg6: memref<1x8xf32, #tpu.memory_space<vmem>>, %arg7: memref<72x8xf32, #tpu.memory_space<vmem>>, %arg8: memref<4x8xf32, #tpu.memory_space<vmem>>, %arg9: memref<64x256xf32, #tpu.memory_space<vmem>>, %arg10: memref<1x64x8xf32, #tpu.memory_space<vmem>>, %arg11: memref<18x18x4xf32, #tpu.memory_space<vmem>>, %arg12: memref<10x10x8xf32, #tpu.memory_space<vmem>>) attributes {dimension_semantics = [#tpu.dimension_semantics<parallel>], iteration_bounds = array<i64: 2>, scalar_prefetch = 0 : i64, scratch_operands = 2 : i64, tpu.core_type = #tpu.core_type<tc>, window_params = [{transform_indices = @transform_0, window_bounds = array<i64: 1, 16, 16, 4>}, {pipeline_mode = #tpu.pipeline_mode<synchronous>, transform_indices = @transform_1, window_bounds = array<i64: 1, 4>}, {pipeline_mode = #tpu.pipeline_mode<synchronous>, transform_indices = @transform_2, window_bounds = array<i64: 1, 4>}, {pipeline_mode = #tpu.pipeline_mode<synchronous>, transform_indices = @transform_3, window_bounds = array<i64: 36, 8>}, {pipeline_mode = #tpu.pipeline_mode<synchronous>, transform_indices = @transform_4, window_bounds = array<i64: 1, 8>}, {pipeline_mode = #tpu.pipeline_mode<synchronous>, transform_indices = @transform_5, window_bounds = array<i64: 1, 8>}, {pipeline_mode = #tpu.pipeline_mode<synchronous>, transform_indices = @transform_6, window_bounds = array<i64: 72, 8>}, {pipeline_mode = #tpu.pipeline_mode<synchronous>, transform_indices = @transform_7, window_bounds = array<i64: 4, 8>}, {pipeline_mode = #tpu.pipeline_mode<synchronous>, transform_indices = @transform_8, window_bounds = array<i64: 64, 256>}, {transform_indices = @transform_9, window_bounds = array<i64: 1, 64, 8>}]} {
    %c0 = arith.constant 0 : index
    %c0_0 = arith.constant 0 : index
    %c0_1 = arith.constant 0 : index
    %c0_2 = arith.constant 0 : index
    %0 = vector.load %arg1[%c0, %c0_0, %c0_1, %c0_2] : memref<1x16x16x4xf32, #tpu.memory_space<vmem>>, vector<1x16x16x4xf32>
    %1 = vector.shape_cast %0 : vector<1x16x16x4xf32> to vector<16x16x4xf32>
    %c0_3 = arith.constant 0 : index
    %c0_4 = arith.constant 0 : index
    %2 = vector.load %arg2[%c0_3, %c0_4] : memref<1x4xf32, #tpu.memory_space<vmem>>, vector<1x4xf32>
    %3 = vector.shape_cast %2 : vector<1x4xf32> to vector<1x1x4xf32>
    %4 = vector.broadcast %3 : vector<1x1x4xf32> to vector<16x16x4xf32>
    %5 = arith.mulf %1, %4 : vector<16x16x4xf32>
    %c0_5 = arith.constant 0 : index
    %c0_6 = arith.constant 0 : index
    %6 = vector.load %arg3[%c0_5, %c0_6] : memref<1x4xf32, #tpu.memory_space<vmem>>, vector<1x4xf32>
    %7 = vector.shape_cast %6 : vector<1x4xf32> to vector<1x1x4xf32>
    %8 = vector.broadcast %7 : vector<1x1x4xf32> to vector<16x16x4xf32>
    %9 = arith.addf %5, %8 : vector<16x16x4xf32>
    %cst = arith.constant 0.000000e+00 : f32
    %10 = vector.broadcast %cst : f32 to vector<16x16x4xf32>
    %11 = arith.cmpf ogt, %9, %10 : vector<16x16x4xf32>
    %cst_7 = arith.constant 1.000000e-01 : f32
    %12 = vector.broadcast %cst_7 : f32 to vector<16x16x4xf32>
    %13 = arith.mulf %12, %9 : vector<16x16x4xf32>
    %14 = arith.select %11, %9, %13 : vector<16x16x4xi1>, vector<16x16x4xf32>
    %cst_8 = arith.constant 0.000000e+00 : f32
    %15 = vector.broadcast %cst_8 : f32 to vector<18x18x4xf32>
    %c0_9 = arith.constant 0 : index
    %c0_10 = arith.constant 0 : index
    %c0_11 = arith.constant 0 : index
    %16 = vector.load %arg11[%c0_9, %c0_10, %c0_11] : memref<18x18x4xf32, #tpu.memory_space<vmem>>, vector<18x18x4xf32>
    tpu.vector_store %arg11[%c0_9, %c0_10, %c0_11], %15 {strides = array<i32>} : memref<18x18x4xf32, #tpu.memory_space<vmem>>, vector<18x18x4xf32>,
    %c1 = arith.constant 1 : index
    %c1_12 = arith.constant 1 : index
    %c0_13 = arith.constant 0 : index
    %17 = vector.load %arg11[%c1, %c1_12, %c0_13] : memref<18x18x4xf32, #tpu.memory_space<vmem>>, vector<16x16x4xf32>
    tpu.vector_store %arg11[%c1, %c1_12, %c0_13], %14 {strides = array<i32>} : memref<18x18x4xf32, #tpu.memory_space<vmem>>, vector<16x16x4xf32>,
    %c0_14 = arith.constant 0 : index
    %c0_15 = arith.constant 0 : index
    %c0_16 = arith.constant 0 : index
    %18 = vector.load %arg11[%c0_14, %c0_15, %c0_16] : memref<18x18x4xf32, #tpu.memory_space<vmem>>, vector<18x18x4xf32>
    %19 = vector.extract_strided_slice %18 {offsets = [0, 0, 0], sizes = [16, 16, 4], strides = [1, 1, 1]} : vector<18x18x4xf32> to vector<16x16x4xf32>
    %20 = vector.shape_cast %19 : vector<16x16x4xf32> to vector<256x4xf32>
    %21 = vector.extract_strided_slice %18 {offsets = [0, 1, 0], sizes = [16, 16, 4], strides = [1, 1, 1]} : vector<18x18x4xf32> to vector<16x16x4xf32>
    %22 = vector.shape_cast %21 : vector<16x16x4xf32> to vector<256x4xf32>
    %23 = vector.extract_strided_slice %18 {offsets = [0, 2, 0], sizes = [16, 16, 4], strides = [1, 1, 1]} : vector<18x18x4xf32> to vector<16x16x4xf32>
    %24 = vector.shape_cast %23 : vector<16x16x4xf32> to vector<256x4xf32>
    %25 = vector.extract_strided_slice %18 {offsets = [1, 0, 0], sizes = [16, 16, 4], strides = [1, 1, 1]} : vector<18x18x4xf32> to vector<16x16x4xf32>
    %26 = vector.shape_cast %25 : vector<16x16x4xf32> to vector<256x4xf32>
    %27 = vector.extract_strided_slice %18 {offsets = [1, 1, 0], sizes = [16, 16, 4], strides = [1, 1, 1]} : vector<18x18x4xf32> to vector<16x16x4xf32>
    %28 = vector.shape_cast %27 : vector<16x16x4xf32> to vector<256x4xf32>
    %29 = vector.extract_strided_slice %18 {offsets = [1, 2, 0], sizes = [16, 16, 4], strides = [1, 1, 1]} : vector<18x18x4xf32> to vector<16x16x4xf32>
    %30 = vector.shape_cast %29 : vector<16x16x4xf32> to vector<256x4xf32>
    %31 = vector.extract_strided_slice %18 {offsets = [2, 0, 0], sizes = [16, 16, 4], strides = [1, 1, 1]} : vector<18x18x4xf32> to vector<16x16x4xf32>
    %32 = vector.shape_cast %31 : vector<16x16x4xf32> to vector<256x4xf32>
    %33 = vector.extract_strided_slice %18 {offsets = [2, 1, 0], sizes = [16, 16, 4], strides = [1, 1, 1]} : vector<18x18x4xf32> to vector<16x16x4xf32>
    %34 = vector.shape_cast %33 : vector<16x16x4xf32> to vector<256x4xf32>
    %35 = vector.extract_strided_slice %18 {offsets = [2, 2, 0], sizes = [16, 16, 4], strides = [1, 1, 1]} : vector<18x18x4xf32> to vector<16x16x4xf32>
    %36 = vector.shape_cast %35 : vector<16x16x4xf32> to vector<256x4xf32>
    %37 = tpu.concatenate %20, %22, %24, %26, %28, %30, %32, %34, %36 in 1 : vector<256x4xf32>, vector<256x4xf32>, vector<256x4xf32>, vector<256x4xf32>, vector<256x4xf32>, vector<256x4xf32>, vector<256x4xf32>, vector<256x4xf32>, vector<256x4xf32> -> vector<256x36xf32>
    %c0_17 = arith.constant 0 : index
    %c0_18 = arith.constant 0 : index
    %38 = vector.load %arg4[%c0_17, %c0_18] : memref<36x8xf32, #tpu.memory_space<vmem>>, vector<36x8xf32>
    %cst_19 = arith.constant dense<0.000000e+00> : vector<256x8xf32>
    %39 = tpu.matmul %37, %38, %cst_19 {dimension_numbers = #tpu.dot_dimension_numbers<[1], [0], [0], [1], [0, 0, 1, 1], [], []>} : vector<256x36xf32>, vector<36x8xf32>, vector<256x8xf32> -> vector<256x8xf32>
    %c0_20 = arith.constant 0 : index
    %c0_21 = arith.constant 0 : index
    %40 = vector.load %arg9[%c0_20, %c0_21] : memref<64x256xf32, #tpu.memory_space<vmem>>, vector<64x256xf32>
    %cst_22 = arith.constant dense<0.000000e+00> : vector<64x8xf32>
    %41 = tpu.matmul %40, %39, %cst_22 {dimension_numbers = #tpu.dot_dimension_numbers<[1], [0], [0], [1], [0, 0, 1, 1], [], []>} : vector<64x256xf32>, vector<256x8xf32>, vector<64x8xf32> -> vector<64x8xf32>
    %c0_23 = arith.constant 0 : index
    %c0_24 = arith.constant 0 : index
    %42 = vector.load %arg5[%c0_23, %c0_24] : memref<1x8xf32, #tpu.memory_space<vmem>>, vector<1x8xf32>
    %43 = vector.broadcast %42 : vector<1x8xf32> to vector<64x8xf32>
    %44 = arith.mulf %41, %43 : vector<64x8xf32>
    %c0_25 = arith.constant 0 : index
    %c0_26 = arith.constant 0 : index
    %45 = vector.load %arg6[%c0_25, %c0_26] : memref<1x8xf32, #tpu.memory_space<vmem>>, vector<1x8xf32>
    %46 = vector.broadcast %45 : vector<1x8xf32> to vector<64x8xf32>
    %47 = arith.addf %44, %46 : vector<64x8xf32>
    %cst_27 = arith.constant 0.000000e+00 : f32
    %48 = vector.broadcast %cst_27 : f32 to vector<64x8xf32>
    %49 = arith.cmpf ogt, %47, %48 : vector<64x8xf32>
    %cst_28 = arith.constant 1.000000e-01 : f32
    %50 = vector.broadcast %cst_28 : f32 to vector<64x8xf32>
    %51 = arith.mulf %50, %47 : vector<64x8xf32>
    %52 = arith.select %49, %47, %51 : vector<64x8xi1>, vector<64x8xf32>
    %cst_29 = arith.constant 0.000000e+00 : f32
    %53 = vector.broadcast %cst_29 : f32 to vector<10x10x8xf32>
    %c0_30 = arith.constant 0 : index
    %c0_31 = arith.constant 0 : index
    %c0_32 = arith.constant 0 : index
    %54 = vector.load %arg12[%c0_30, %c0_31, %c0_32] : memref<10x10x8xf32, #tpu.memory_space<vmem>>, vector<10x10x8xf32>
    tpu.vector_store %arg12[%c0_30, %c0_31, %c0_32], %53 {strides = array<i32>} : memref<10x10x8xf32, #tpu.memory_space<vmem>>, vector<10x10x8xf32>,
    %55 = vector.shape_cast %52 : vector<64x8xf32> to vector<8x8x8xf32>
    %c1_33 = arith.constant 1 : index
    %c1_34 = arith.constant 1 : index
    %c0_35 = arith.constant 0 : index
    %56 = vector.load %arg12[%c1_33, %c1_34, %c0_35] : memref<10x10x8xf32, #tpu.memory_space<vmem>>, vector<8x8x8xf32>
    tpu.vector_store %arg12[%c1_33, %c1_34, %c0_35], %55 {strides = array<i32>} : memref<10x10x8xf32, #tpu.memory_space<vmem>>, vector<8x8x8xf32>,
    %c0_36 = arith.constant 0 : index
    %c0_37 = arith.constant 0 : index
    %c0_38 = arith.constant 0 : index
    %57 = vector.load %arg12[%c0_36, %c0_37, %c0_38] : memref<10x10x8xf32, #tpu.memory_space<vmem>>, vector<10x10x8xf32>
    %58 = vector.extract_strided_slice %57 {offsets = [0, 0, 0], sizes = [8, 8, 8], strides = [1, 1, 1]} : vector<10x10x8xf32> to vector<8x8x8xf32>
    %59 = vector.shape_cast %58 : vector<8x8x8xf32> to vector<64x8xf32>
    %60 = vector.extract_strided_slice %57 {offsets = [0, 1, 0], sizes = [8, 8, 8], strides = [1, 1, 1]} : vector<10x10x8xf32> to vector<8x8x8xf32>
    %61 = vector.shape_cast %60 : vector<8x8x8xf32> to vector<64x8xf32>
    %62 = vector.extract_strided_slice %57 {offsets = [0, 2, 0], sizes = [8, 8, 8], strides = [1, 1, 1]} : vector<10x10x8xf32> to vector<8x8x8xf32>
    %63 = vector.shape_cast %62 : vector<8x8x8xf32> to vector<64x8xf32>
    %64 = vector.extract_strided_slice %57 {offsets = [1, 0, 0], sizes = [8, 8, 8], strides = [1, 1, 1]} : vector<10x10x8xf32> to vector<8x8x8xf32>
    %65 = vector.shape_cast %64 : vector<8x8x8xf32> to vector<64x8xf32>
    %66 = vector.extract_strided_slice %57 {offsets = [1, 1, 0], sizes = [8, 8, 8], strides = [1, 1, 1]} : vector<10x10x8xf32> to vector<8x8x8xf32>
    %67 = vector.shape_cast %66 : vector<8x8x8xf32> to vector<64x8xf32>
    %68 = vector.extract_strided_slice %57 {offsets = [1, 2, 0], sizes = [8, 8, 8], strides = [1, 1, 1]} : vector<10x10x8xf32> to vector<8x8x8xf32>
    %69 = vector.shape_cast %68 : vector<8x8x8xf32> to vector<64x8xf32>
    %70 = vector.extract_strided_slice %57 {offsets = [2, 0, 0], sizes = [8, 8, 8], strides = [1, 1, 1]} : vector<10x10x8xf32> to vector<8x8x8xf32>
    %71 = vector.shape_cast %70 : vector<8x8x8xf32> to vector<64x8xf32>
    %72 = vector.extract_strided_slice %57 {offsets = [2, 1, 0], sizes = [8, 8, 8], strides = [1, 1, 1]} : vector<10x10x8xf32> to vector<8x8x8xf32>
    %73 = vector.shape_cast %72 : vector<8x8x8xf32> to vector<64x8xf32>
    %74 = vector.extract_strided_slice %57 {offsets = [2, 2, 0], sizes = [8, 8, 8], strides = [1, 1, 1]} : vector<10x10x8xf32> to vector<8x8x8xf32>
    %75 = vector.shape_cast %74 : vector<8x8x8xf32> to vector<64x8xf32>
    %76 = tpu.concatenate %59, %61, %63, %65, %67, %69, %71, %73, %75 in 1 : vector<64x8xf32>, vector<64x8xf32>, vector<64x8xf32>, vector<64x8xf32>, vector<64x8xf32>, vector<64x8xf32>, vector<64x8xf32>, vector<64x8xf32>, vector<64x8xf32> -> vector<64x72xf32>
    %c0_39 = arith.constant 0 : index
    %c0_40 = arith.constant 0 : index
    %77 = vector.load %arg7[%c0_39, %c0_40] : memref<72x8xf32, #tpu.memory_space<vmem>>, vector<72x8xf32>
    %cst_41 = arith.constant dense<0.000000e+00> : vector<64x8xf32>
    %78 = tpu.matmul %76, %77, %cst_41 {dimension_numbers = #tpu.dot_dimension_numbers<[1], [0], [0], [1], [0, 0, 1, 1], [], []>} : vector<64x72xf32>, vector<72x8xf32>, vector<64x8xf32> -> vector<64x8xf32>
    %79 = vector.shape_cast %14 : vector<16x16x4xf32> to vector<256x4xf32>
    %c0_42 = arith.constant 0 : index
    %c0_43 = arith.constant 0 : index
    %80 = vector.load %arg9[%c0_42, %c0_43] : memref<64x256xf32, #tpu.memory_space<vmem>>, vector<64x256xf32>
    %cst_44 = arith.constant dense<0.000000e+00> : vector<64x4xf32>
    %81 = tpu.matmul %80, %79, %cst_44 {dimension_numbers = #tpu.dot_dimension_numbers<[1], [0], [0], [1], [0, 0, 1, 1], [], []>} : vector<64x256xf32>, vector<256x4xf32>, vector<64x4xf32> -> vector<64x4xf32>
    %c0_45 = arith.constant 0 : index
    %c0_46 = arith.constant 0 : index
    %82 = vector.load %arg8[%c0_45, %c0_46] : memref<4x8xf32, #tpu.memory_space<vmem>>, vector<4x8xf32>
    %cst_47 = arith.constant dense<0.000000e+00> : vector<64x8xf32>
    %83 = tpu.matmul %81, %82, %cst_47 {dimension_numbers = #tpu.dot_dimension_numbers<[1], [0], [0], [1], [0, 0, 1, 1], [], []>} : vector<64x4xf32>, vector<4x8xf32>, vector<64x8xf32> -> vector<64x8xf32>
    %84 = arith.addf %78, %83 : vector<64x8xf32>
    %c0_48 = arith.constant 0 : index
    %c0_49 = arith.constant 0 : index
    %c0_50 = arith.constant 0 : index
    %85 = vector.load %arg10[%c0_48, %c0_49, %c0_50] : memref<1x64x8xf32, #tpu.memory_space<vmem>>, vector<1x64x8xf32>
    %86 = vector.shape_cast %85 : vector<1x64x8xf32> to vector<64x8xf32>
    %87 = vector.shape_cast %84 : vector<64x8xf32> to vector<1x64x8xf32>
    tpu.vector_store %arg10[%c0_48, %c0_49, %c0_50], %87 {strides = array<i32>} : memref<1x64x8xf32, #tpu.memory_space<vmem>>, vector<1x64x8xf32>,
    return
  }
  func.func @transform_0(%arg0: i32) -> (i32, i32, i32, i32) {
    %c0_i32 = arith.constant 0 : i32
    %c0_i32_0 = arith.constant 0 : i32
    %c0_i32_1 = arith.constant 0 : i32
    %c0_i32_2 = arith.constant 0 : i32
    return %arg0, %c0_i32, %c0_i32_0, %c0_i32_1 : i32, i32, i32, i32
  }
  func.func @transform_1(%arg0: i32) -> (i32, i32) {
    %c0_i32 = arith.constant 0 : i32
    %c0_i32_0 = arith.constant 0 : i32
    %c0_i32_1 = arith.constant 0 : i32
    return %c0_i32, %c0_i32_0 : i32, i32
  }
  func.func @transform_2(%arg0: i32) -> (i32, i32) {
    %c0_i32 = arith.constant 0 : i32
    %c0_i32_0 = arith.constant 0 : i32
    %c0_i32_1 = arith.constant 0 : i32
    return %c0_i32, %c0_i32_0 : i32, i32
  }
  func.func @transform_3(%arg0: i32) -> (i32, i32) {
    %c0_i32 = arith.constant 0 : i32
    %c0_i32_0 = arith.constant 0 : i32
    %c0_i32_1 = arith.constant 0 : i32
    return %c0_i32, %c0_i32_0 : i32, i32
  }
  func.func @transform_4(%arg0: i32) -> (i32, i32) {
    %c0_i32 = arith.constant 0 : i32
    %c0_i32_0 = arith.constant 0 : i32
    %c0_i32_1 = arith.constant 0 : i32
    return %c0_i32, %c0_i32_0 : i32, i32
  }
  func.func @transform_5(%arg0: i32) -> (i32, i32) {
    %c0_i32 = arith.constant 0 : i32
    %c0_i32_0 = arith.constant 0 : i32
    %c0_i32_1 = arith.constant 0 : i32
    return %c0_i32, %c0_i32_0 : i32, i32
  }
  func.func @transform_6(%arg0: i32) -> (i32, i32) {
    %c0_i32 = arith.constant 0 : i32
    %c0_i32_0 = arith.constant 0 : i32
    %c0_i32_1 = arith.constant 0 : i32
    return %c0_i32, %c0_i32_0 : i32, i32
  }
  func.func @transform_7(%arg0: i32) -> (i32, i32) {
    %c0_i32 = arith.constant 0 : i32
    %c0_i32_0 = arith.constant 0 : i32
    %c0_i32_1 = arith.constant 0 : i32
    return %c0_i32, %c0_i32_0 : i32, i32
  }
  func.func @transform_8(%arg0: i32) -> (i32, i32) {
    %c0_i32 = arith.constant 0 : i32
    %c0_i32_0 = arith.constant 0 : i32
    %c0_i32_1 = arith.constant 0 : i32
    return %c0_i32, %c0_i32_0 : i32, i32
  }
  func.func @transform_9(%arg0: i32) -> (i32, i32, i32) {
    %c0_i32 = arith.constant 0 : i32
    %c0_i32_0 = arith.constant 0 : i32
    %c0_i32_1 = arith.constant 0 : i32
    return %arg0, %c0_i32, %c0_i32_0 : i32, i32, i32
  }
}

module attributes {stable_mosaic.version = 11 : i64} {
  func.func @kernel(%arg0: i32, %arg1: memref<1x8x8x8xf32, #tpu.memory_space<vmem>>, %arg2: memref<1x8xf32, #tpu.memory_space<vmem>>, %arg3: memref<1x8xf32, #tpu.memory_space<vmem>>, %arg4: memref<72x8xf32, #tpu.memory_space<vmem>>, %arg5: memref<1x8xf32, #tpu.memory_space<vmem>>, %arg6: memref<1x8xf32, #tpu.memory_space<vmem>>, %arg7: memref<72x8xf32, #tpu.memory_space<vmem>>, %arg8: memref<1x64x8xf32, #tpu.memory_space<vmem>>, %arg9: memref<10x10x8xf32, #tpu.memory_space<vmem>>, %arg10: memref<10x10x8xf32, #tpu.memory_space<vmem>>) attributes {dimension_semantics = [#tpu.dimension_semantics<parallel>], iteration_bounds = array<i64: 2>, scalar_prefetch = 0 : i64, scratch_operands = 2 : i64, tpu.core_type = #tpu.core_type<tc>, window_params = [{transform_indices = @transform_0, window_bounds = array<i64: 1, 8, 8, 8>}, {pipeline_mode = #tpu.pipeline_mode<synchronous>, transform_indices = @transform_1, window_bounds = array<i64: 1, 8>}, {pipeline_mode = #tpu.pipeline_mode<synchronous>, transform_indices = @transform_2, window_bounds = array<i64: 1, 8>}, {pipeline_mode = #tpu.pipeline_mode<synchronous>, transform_indices = @transform_3, window_bounds = array<i64: 72, 8>}, {pipeline_mode = #tpu.pipeline_mode<synchronous>, transform_indices = @transform_4, window_bounds = array<i64: 1, 8>}, {pipeline_mode = #tpu.pipeline_mode<synchronous>, transform_indices = @transform_5, window_bounds = array<i64: 1, 8>}, {pipeline_mode = #tpu.pipeline_mode<synchronous>, transform_indices = @transform_6, window_bounds = array<i64: 72, 8>}, {transform_indices = @transform_7, window_bounds = array<i64: 1, 64, 8>}]} {
    %c0 = arith.constant 0 : index
    %c0_0 = arith.constant 0 : index
    %c0_1 = arith.constant 0 : index
    %c0_2 = arith.constant 0 : index
    %0 = vector.load %arg1[%c0, %c0_0, %c0_1, %c0_2] : memref<1x8x8x8xf32, #tpu.memory_space<vmem>>, vector<1x8x8x8xf32>
    %1 = vector.shape_cast %0 : vector<1x8x8x8xf32> to vector<8x8x8xf32>
    %c0_3 = arith.constant 0 : index
    %c0_4 = arith.constant 0 : index
    %2 = vector.load %arg2[%c0_3, %c0_4] : memref<1x8xf32, #tpu.memory_space<vmem>>, vector<1x8xf32>
    %3 = vector.shape_cast %2 : vector<1x8xf32> to vector<1x1x8xf32>
    %4 = vector.broadcast %3 : vector<1x1x8xf32> to vector<8x8x8xf32>
    %5 = arith.mulf %1, %4 : vector<8x8x8xf32>
    %c0_5 = arith.constant 0 : index
    %c0_6 = arith.constant 0 : index
    %6 = vector.load %arg3[%c0_5, %c0_6] : memref<1x8xf32, #tpu.memory_space<vmem>>, vector<1x8xf32>
    %7 = vector.shape_cast %6 : vector<1x8xf32> to vector<1x1x8xf32>
    %8 = vector.broadcast %7 : vector<1x1x8xf32> to vector<8x8x8xf32>
    %9 = arith.addf %5, %8 : vector<8x8x8xf32>
    %cst = arith.constant 0.000000e+00 : f32
    %10 = vector.broadcast %cst : f32 to vector<8x8x8xf32>
    %11 = arith.cmpf ogt, %9, %10 : vector<8x8x8xf32>
    %cst_7 = arith.constant 1.000000e-01 : f32
    %12 = vector.broadcast %cst_7 : f32 to vector<8x8x8xf32>
    %13 = arith.mulf %12, %9 : vector<8x8x8xf32>
    %14 = arith.select %11, %9, %13 : vector<8x8x8xi1>, vector<8x8x8xf32>
    %cst_8 = arith.constant 0.000000e+00 : f32
    %15 = vector.broadcast %cst_8 : f32 to vector<10x10x8xf32>
    %c0_9 = arith.constant 0 : index
    %c0_10 = arith.constant 0 : index
    %c0_11 = arith.constant 0 : index
    %16 = vector.load %arg9[%c0_9, %c0_10, %c0_11] : memref<10x10x8xf32, #tpu.memory_space<vmem>>, vector<10x10x8xf32>
    tpu.vector_store %arg9[%c0_9, %c0_10, %c0_11], %15 {strides = array<i32>} : memref<10x10x8xf32, #tpu.memory_space<vmem>>, vector<10x10x8xf32>,
    %c1 = arith.constant 1 : index
    %c1_12 = arith.constant 1 : index
    %c0_13 = arith.constant 0 : index
    %17 = vector.load %arg9[%c1, %c1_12, %c0_13] : memref<10x10x8xf32, #tpu.memory_space<vmem>>, vector<8x8x8xf32>
    tpu.vector_store %arg9[%c1, %c1_12, %c0_13], %14 {strides = array<i32>} : memref<10x10x8xf32, #tpu.memory_space<vmem>>, vector<8x8x8xf32>,
    %c0_14 = arith.constant 0 : index
    %c0_15 = arith.constant 0 : index
    %c0_16 = arith.constant 0 : index
    %18 = vector.load %arg9[%c0_14, %c0_15, %c0_16] : memref<10x10x8xf32, #tpu.memory_space<vmem>>, vector<10x10x8xf32>
    %19 = vector.extract_strided_slice %18 {offsets = [0, 0, 0], sizes = [8, 8, 8], strides = [1, 1, 1]} : vector<10x10x8xf32> to vector<8x8x8xf32>
    %20 = vector.shape_cast %19 : vector<8x8x8xf32> to vector<64x8xf32>
    %21 = vector.extract_strided_slice %18 {offsets = [0, 1, 0], sizes = [8, 8, 8], strides = [1, 1, 1]} : vector<10x10x8xf32> to vector<8x8x8xf32>
    %22 = vector.shape_cast %21 : vector<8x8x8xf32> to vector<64x8xf32>
    %23 = vector.extract_strided_slice %18 {offsets = [0, 2, 0], sizes = [8, 8, 8], strides = [1, 1, 1]} : vector<10x10x8xf32> to vector<8x8x8xf32>
    %24 = vector.shape_cast %23 : vector<8x8x8xf32> to vector<64x8xf32>
    %25 = vector.extract_strided_slice %18 {offsets = [1, 0, 0], sizes = [8, 8, 8], strides = [1, 1, 1]} : vector<10x10x8xf32> to vector<8x8x8xf32>
    %26 = vector.shape_cast %25 : vector<8x8x8xf32> to vector<64x8xf32>
    %27 = vector.extract_strided_slice %18 {offsets = [1, 1, 0], sizes = [8, 8, 8], strides = [1, 1, 1]} : vector<10x10x8xf32> to vector<8x8x8xf32>
    %28 = vector.shape_cast %27 : vector<8x8x8xf32> to vector<64x8xf32>
    %29 = vector.extract_strided_slice %18 {offsets = [1, 2, 0], sizes = [8, 8, 8], strides = [1, 1, 1]} : vector<10x10x8xf32> to vector<8x8x8xf32>
    %30 = vector.shape_cast %29 : vector<8x8x8xf32> to vector<64x8xf32>
    %31 = vector.extract_strided_slice %18 {offsets = [2, 0, 0], sizes = [8, 8, 8], strides = [1, 1, 1]} : vector<10x10x8xf32> to vector<8x8x8xf32>
    %32 = vector.shape_cast %31 : vector<8x8x8xf32> to vector<64x8xf32>
    %33 = vector.extract_strided_slice %18 {offsets = [2, 1, 0], sizes = [8, 8, 8], strides = [1, 1, 1]} : vector<10x10x8xf32> to vector<8x8x8xf32>
    %34 = vector.shape_cast %33 : vector<8x8x8xf32> to vector<64x8xf32>
    %35 = vector.extract_strided_slice %18 {offsets = [2, 2, 0], sizes = [8, 8, 8], strides = [1, 1, 1]} : vector<10x10x8xf32> to vector<8x8x8xf32>
    %36 = vector.shape_cast %35 : vector<8x8x8xf32> to vector<64x8xf32>
    %37 = tpu.concatenate %20, %22, %24, %26, %28, %30, %32, %34, %36 in 1 : vector<64x8xf32>, vector<64x8xf32>, vector<64x8xf32>, vector<64x8xf32>, vector<64x8xf32>, vector<64x8xf32>, vector<64x8xf32>, vector<64x8xf32>, vector<64x8xf32> -> vector<64x72xf32>
    %c0_17 = arith.constant 0 : index
    %c0_18 = arith.constant 0 : index
    %38 = vector.load %arg4[%c0_17, %c0_18] : memref<72x8xf32, #tpu.memory_space<vmem>>, vector<72x8xf32>
    %cst_19 = arith.constant dense<0.000000e+00> : vector<64x8xf32>
    %39 = tpu.matmul %37, %38, %cst_19 {dimension_numbers = #tpu.dot_dimension_numbers<[1], [0], [0], [1], [0, 0, 1, 1], [], []>} : vector<64x72xf32>, vector<72x8xf32>, vector<64x8xf32> -> vector<64x8xf32>
    %c0_20 = arith.constant 0 : index
    %c0_21 = arith.constant 0 : index
    %40 = vector.load %arg5[%c0_20, %c0_21] : memref<1x8xf32, #tpu.memory_space<vmem>>, vector<1x8xf32>
    %41 = vector.broadcast %40 : vector<1x8xf32> to vector<64x8xf32>
    %42 = arith.mulf %39, %41 : vector<64x8xf32>
    %c0_22 = arith.constant 0 : index
    %c0_23 = arith.constant 0 : index
    %43 = vector.load %arg6[%c0_22, %c0_23] : memref<1x8xf32, #tpu.memory_space<vmem>>, vector<1x8xf32>
    %44 = vector.broadcast %43 : vector<1x8xf32> to vector<64x8xf32>
    %45 = arith.addf %42, %44 : vector<64x8xf32>
    %cst_24 = arith.constant 0.000000e+00 : f32
    %46 = vector.broadcast %cst_24 : f32 to vector<64x8xf32>
    %47 = arith.cmpf ogt, %45, %46 : vector<64x8xf32>
    %cst_25 = arith.constant 1.000000e-01 : f32
    %48 = vector.broadcast %cst_25 : f32 to vector<64x8xf32>
    %49 = arith.mulf %48, %45 : vector<64x8xf32>
    %50 = arith.select %47, %45, %49 : vector<64x8xi1>, vector<64x8xf32>
    %cst_26 = arith.constant 0.000000e+00 : f32
    %51 = vector.broadcast %cst_26 : f32 to vector<10x10x8xf32>
    %c0_27 = arith.constant 0 : index
    %c0_28 = arith.constant 0 : index
    %c0_29 = arith.constant 0 : index
    %52 = vector.load %arg10[%c0_27, %c0_28, %c0_29] : memref<10x10x8xf32, #tpu.memory_space<vmem>>, vector<10x10x8xf32>
    tpu.vector_store %arg10[%c0_27, %c0_28, %c0_29], %51 {strides = array<i32>} : memref<10x10x8xf32, #tpu.memory_space<vmem>>, vector<10x10x8xf32>,
    %53 = vector.shape_cast %50 : vector<64x8xf32> to vector<8x8x8xf32>
    %c1_30 = arith.constant 1 : index
    %c1_31 = arith.constant 1 : index
    %c0_32 = arith.constant 0 : index
    %54 = vector.load %arg10[%c1_30, %c1_31, %c0_32] : memref<10x10x8xf32, #tpu.memory_space<vmem>>, vector<8x8x8xf32>
    tpu.vector_store %arg10[%c1_30, %c1_31, %c0_32], %53 {strides = array<i32>} : memref<10x10x8xf32, #tpu.memory_space<vmem>>, vector<8x8x8xf32>,
    %c0_33 = arith.constant 0 : index
    %c0_34 = arith.constant 0 : index
    %c0_35 = arith.constant 0 : index
    %55 = vector.load %arg10[%c0_33, %c0_34, %c0_35] : memref<10x10x8xf32, #tpu.memory_space<vmem>>, vector<10x10x8xf32>
    %56 = vector.extract_strided_slice %55 {offsets = [0, 0, 0], sizes = [8, 8, 8], strides = [1, 1, 1]} : vector<10x10x8xf32> to vector<8x8x8xf32>
    %57 = vector.shape_cast %56 : vector<8x8x8xf32> to vector<64x8xf32>
    %58 = vector.extract_strided_slice %55 {offsets = [0, 1, 0], sizes = [8, 8, 8], strides = [1, 1, 1]} : vector<10x10x8xf32> to vector<8x8x8xf32>
    %59 = vector.shape_cast %58 : vector<8x8x8xf32> to vector<64x8xf32>
    %60 = vector.extract_strided_slice %55 {offsets = [0, 2, 0], sizes = [8, 8, 8], strides = [1, 1, 1]} : vector<10x10x8xf32> to vector<8x8x8xf32>
    %61 = vector.shape_cast %60 : vector<8x8x8xf32> to vector<64x8xf32>
    %62 = vector.extract_strided_slice %55 {offsets = [1, 0, 0], sizes = [8, 8, 8], strides = [1, 1, 1]} : vector<10x10x8xf32> to vector<8x8x8xf32>
    %63 = vector.shape_cast %62 : vector<8x8x8xf32> to vector<64x8xf32>
    %64 = vector.extract_strided_slice %55 {offsets = [1, 1, 0], sizes = [8, 8, 8], strides = [1, 1, 1]} : vector<10x10x8xf32> to vector<8x8x8xf32>
    %65 = vector.shape_cast %64 : vector<8x8x8xf32> to vector<64x8xf32>
    %66 = vector.extract_strided_slice %55 {offsets = [1, 2, 0], sizes = [8, 8, 8], strides = [1, 1, 1]} : vector<10x10x8xf32> to vector<8x8x8xf32>
    %67 = vector.shape_cast %66 : vector<8x8x8xf32> to vector<64x8xf32>
    %68 = vector.extract_strided_slice %55 {offsets = [2, 0, 0], sizes = [8, 8, 8], strides = [1, 1, 1]} : vector<10x10x8xf32> to vector<8x8x8xf32>
    %69 = vector.shape_cast %68 : vector<8x8x8xf32> to vector<64x8xf32>
    %70 = vector.extract_strided_slice %55 {offsets = [2, 1, 0], sizes = [8, 8, 8], strides = [1, 1, 1]} : vector<10x10x8xf32> to vector<8x8x8xf32>
    %71 = vector.shape_cast %70 : vector<8x8x8xf32> to vector<64x8xf32>
    %72 = vector.extract_strided_slice %55 {offsets = [2, 2, 0], sizes = [8, 8, 8], strides = [1, 1, 1]} : vector<10x10x8xf32> to vector<8x8x8xf32>
    %73 = vector.shape_cast %72 : vector<8x8x8xf32> to vector<64x8xf32>
    %74 = tpu.concatenate %57, %59, %61, %63, %65, %67, %69, %71, %73 in 1 : vector<64x8xf32>, vector<64x8xf32>, vector<64x8xf32>, vector<64x8xf32>, vector<64x8xf32>, vector<64x8xf32>, vector<64x8xf32>, vector<64x8xf32>, vector<64x8xf32> -> vector<64x72xf32>
    %c0_36 = arith.constant 0 : index
    %c0_37 = arith.constant 0 : index
    %75 = vector.load %arg7[%c0_36, %c0_37] : memref<72x8xf32, #tpu.memory_space<vmem>>, vector<72x8xf32>
    %cst_38 = arith.constant dense<0.000000e+00> : vector<64x8xf32>
    %76 = tpu.matmul %74, %75, %cst_38 {dimension_numbers = #tpu.dot_dimension_numbers<[1], [0], [0], [1], [0, 0, 1, 1], [], []>} : vector<64x72xf32>, vector<72x8xf32>, vector<64x8xf32> -> vector<64x8xf32>
    %77 = vector.shape_cast %1 : vector<8x8x8xf32> to vector<64x8xf32>
    %78 = arith.addf %76, %77 : vector<64x8xf32>
    %c0_39 = arith.constant 0 : index
    %c0_40 = arith.constant 0 : index
    %c0_41 = arith.constant 0 : index
    %79 = vector.load %arg8[%c0_39, %c0_40, %c0_41] : memref<1x64x8xf32, #tpu.memory_space<vmem>>, vector<1x64x8xf32>
    %80 = vector.shape_cast %79 : vector<1x64x8xf32> to vector<64x8xf32>
    %81 = vector.shape_cast %78 : vector<64x8xf32> to vector<1x64x8xf32>
    tpu.vector_store %arg8[%c0_39, %c0_40, %c0_41], %81 {strides = array<i32>} : memref<1x64x8xf32, #tpu.memory_space<vmem>>, vector<1x64x8xf32>,
    return
  }
  func.func @transform_0(%arg0: i32) -> (i32, i32, i32, i32) {
    %c0_i32 = arith.constant 0 : i32
    %c0_i32_0 = arith.constant 0 : i32
    %c0_i32_1 = arith.constant 0 : i32
    %c0_i32_2 = arith.constant 0 : i32
    return %arg0, %c0_i32, %c0_i32_0, %c0_i32_1 : i32, i32, i32, i32
  }
  func.func @transform_1(%arg0: i32) -> (i32, i32) {
    %c0_i32 = arith.constant 0 : i32
    %c0_i32_0 = arith.constant 0 : i32
    %c0_i32_1 = arith.constant 0 : i32
    return %c0_i32, %c0_i32_0 : i32, i32
  }
  func.func @transform_2(%arg0: i32) -> (i32, i32) {
    %c0_i32 = arith.constant 0 : i32
    %c0_i32_0 = arith.constant 0 : i32
    %c0_i32_1 = arith.constant 0 : i32
    return %c0_i32, %c0_i32_0 : i32, i32
  }
  func.func @transform_3(%arg0: i32) -> (i32, i32) {
    %c0_i32 = arith.constant 0 : i32
    %c0_i32_0 = arith.constant 0 : i32
    %c0_i32_1 = arith.constant 0 : i32
    return %c0_i32, %c0_i32_0 : i32, i32
  }
  func.func @transform_4(%arg0: i32) -> (i32, i32) {
    %c0_i32 = arith.constant 0 : i32
    %c0_i32_0 = arith.constant 0 : i32
    %c0_i32_1 = arith.constant 0 : i32
    return %c0_i32, %c0_i32_0 : i32, i32
  }
  func.func @transform_5(%arg0: i32) -> (i32, i32) {
    %c0_i32 = arith.constant 0 : i32
    %c0_i32_0 = arith.constant 0 : i32
    %c0_i32_1 = arith.constant 0 : i32
    return %c0_i32, %c0_i32_0 : i32, i32
  }
  func.func @transform_6(%arg0: i32) -> (i32, i32) {
    %c0_i32 = arith.constant 0 : i32
    %c0_i32_0 = arith.constant 0 : i32
    %c0_i32_1 = arith.constant 0 : i32
    return %c0_i32, %c0_i32_0 : i32, i32
  }
  func.func @transform_7(%arg0: i32) -> (i32, i32, i32) {
    %c0_i32 = arith.constant 0 : i32
    %c0_i32_0 = arith.constant 0 : i32
    %c0_i32_1 = arith.constant 0 : i32
    return %arg0, %c0_i32, %c0_i32_0 : i32, i32, i32
  }
}

</mosaic_0001>

<bundles_post_ra>
// kernel: _lambda_.3
= control target key start
LH: loop header
LB: loop body
LE: loop exit
PB: predicated region body
PF: predicated region fallthrough
CT: control target
= control target key end

     0   :  { %12 = vsyncpa [#allocation5], 0  ;;  %s2441_s0 = inlined_call_operand.vmem [shape: f32[2,8,8,8], index: 0, kind: input, shape index: {}]   ;;  %s2442_s1 = inlined_call_operand.vmem [shape: f32[1,8], index: 1, kind: input, shape index: {}]   ;;  %s2443_s2 = inlined_call_operand.vmem [shape: f32[1,8], index: 2, kind: input, shape index: {}]   ;;  %s2444_s3 = inlined_call_operand.vmem [shape: f32[72,8], index: 3, kind: input, shape index: {}]   ;;  %s2445_s4 = inlined_call_operand.vmem [shape: f32[1,8], index: 4, kind: input, shape index: {}]   ;;  %s2446_s5 = inlined_call_operand.vmem [shape: f32[1,8], index: 5, kind: input, shape index: {}]   ;;  %s2447_s6 = inlined_call_operand.vmem [shape: f32[72,8], index: 6, kind: input, shape index: {}]   ;;  %s2448_s7 = inlined_call_operand.hbm [shape: f32[2,64,8], index: 7, kind: output, shape index: {}]  }
   0x1   :  { %14 = vsyncpa [#allocation5 + $0x1], 0  ;;  %s1620_s24 = smov 0   ;;  %s1622_s25 = smov 0  }
   0x2   :  { %s1624_s26 = smov 0   ;;  %s1626_s27 = smov 0  }
   0x3 LB: > { %s1641_s28 = sadd.s32 4294967295, %s1568_s27   ;;  %s1397_s29 = sadd.s32 4294967294, %s1568_s27   ;;  %s1568_s27 = sphi %s1626_s27, %s2460_s27   ;;  %s1564_s26 = sphi %s1624_s26, %s2459_s26   ;;  %s1560_s25 = sphi %s1622_s25, %s2458_s25   ;;  %s1556_s24 = sphi %s1620_s24, %s2457_s24  }
   0x4   : > { %s1645_s30 = sadd.s32 1, %s1568_s27   ;;  %s179_s8 = sadd.s32 1, %s1564_s26 }
   0x5   : > { %s176_s9 = ssub.s32 %s1568_s27, %s1645_s30  ;;  %p189_p0 = scmp.ne.s32.totalorder %s1564_s26, %s1560_s25 }
   0x6   : > { %p177_p1 = scmp.eq.s32.totalorder %s176_s9, 0  ;;  %p190_p2 = scmp.eq.s32.totalorder %s1641_s28, 1 }
   0x7   : > { %p195_p3 = scmp.ne.s32.totalorder %s1560_s25, %s1556_s24  ;;  %p196_p4 = scmp.eq.s32.totalorder %s1397_s29, 1 }
   0x8   : > { %s1656_s10 = scalar_select %p177_p1, %s1564_s26, %s179_s8  }
   0x9   : > { %p1658_p5 = por %p190_p2, %p189_p0  ;;  %p1662_p6 = por %p196_p4, %p195_p3 }
   0xa   : > { %p1400_p7 = scmp.ge.s32.totalorder %s1568_s27, 1  ;;  %p240_p8 = scmp.lt.s32.totalorder %s1568_s27, 3 }
   0xc   : > { %p241_p9 = pnand %p1400_p7, %p240_p8 }
   0xd   : > { %p272_p10 = scmp.lt.s32.totalorder (!%p241_p9), %s1641_s28, 1  ;;  %s2451_s13 = smov (!%p241_p9), 8  }
   0xe   : > { %244 = sbr.rel (%p241_p9) target bundleno = 807 (0x327), region = 48  ;;  %s1572_s19 = smov (!%p241_p9), 16  }
   0xf   : > { %s1573_s29 = smov (!%p241_p9), 24   ;;  %s1574_s8 = smov (!%p241_p9), 48  }
  0x10   : > { %s1575_s9 = smov (!%p241_p9), 56   ;;  %s2449_s16 = smov (!%p241_p9), 64  }
  0x11   : > { %s2455_s17 = smov (!%p241_p9), 64   ;;  %s2456_s20 = smov (!%p241_p9), 8  }
  0x13   : > { %vm333_vm0 = vcmask 64512   ;;  %vm335_vm1 = vcmask 58368   ;;  %v1570_v0 = vmov 0.0   ;;  %vm400_vm2 = vcmask 1046528   ;;  %s273_s14 = scalar_select %p272_p10, %s1641_s28, 1 }
  0x14   : > { %334 = vst.msk [vmem:[#allocation2] sm:$0xff] %vm333_vm0, %v1570_v0  ;;  %vm425_vm3 = vcmask 1045504   ;;  %v1730_v9 = vld [vmem:[%s2442_s1] ss:$0 sm:$0xff]  ;;  %vm666_vm12 = vcmask 130048   ;;  %vm675_vm13 = vcmask 195584  }
  0x15   : > { %336 = vst.msk [vmem:[#allocation2 + $0x8] sm:$0x3] %vm335_vm1, %v1570_v0  ;;  %s1425_s15 = sshll.u32 %s273_s14, 6  ;;  %v1746_v13 = vld [vmem:[%s2443_s2] ss:$0 sm:$0xff]  ;;  %s1576_s14 = smov 40  }
  0x16   : > { %337 = vst.msk [vmem:[#allocation2 + $0x10] sm:$0xff] %vm333_vm0, %v1570_v0  ;;  %s1720_s18 = scalar_lea.vmem %s2441_s0, %s1425_s15  ;;  %s1577_s15 = smov 32   ;;  %vm684_vm14 = vcmask 261120   ;;  %vm693_vm15 = vcmask 326656  }
  0x17   : > { %338 = vst.msk [vmem:[#allocation2 + $0x18] sm:$0x3] %vm335_vm1, %v1570_v0  ;;  %v277_v10 = vld [vmem:[%s1720_s18] sm:$0xff]  ;;  %v278_v11 = vld [vmem:[%s1720_s18 + $0x8] sm:$0xff]  ;;  %v279_v17 = vld [vmem:[%s1720_s18 + $0x10] sm:$0xff] }
  0x18   : > { %339 = vst.msk [vmem:[#allocation2 + $0x20] sm:$0xff] %vm333_vm0, %v1570_v0  ;;  %v289_v12 = vmul.f32 %v1730_v9, %v277_v10  ;;  %v290_v14 = vmul.f32 %v1730_v9, %v278_v11  ;;  %v291_v18 = vmul.f32 %v1730_v9, %v279_v17  ;;  %v280_v26 = vld [vmem:[%s1720_s18 + $0x18] sm:$0xff]  ;;  %v281_v35 = vld [vmem:[%s1720_s18 + $0x20] sm:$0xff]  ;;  %v282_v52 = vld [vmem:[%s1720_s18 + $0x28] sm:$0xff] }
  0x19   : > { %340 = vst.msk [vmem:[#allocation2 + $0x28] sm:$0x3] %vm335_vm1, %v1570_v0  ;;  %v292_v27 = vmul.f32 %v1730_v9, %v280_v26  ;;  %v293_v41 = vmul.f32 %v1730_v9, %v281_v35  ;;  %v294_v55 = vmul.f32 %v1730_v9, %v282_v52  ;;  %v737_v35 = vld [vmem:[%s2444_s3 + $0x40] sm:$0xff]  ;;  %v730_v52 = vld [vmem:[%s2444_s3 + $0x8] sm:$0xff] }
  0x1a   : > { %341 = vst.msk [vmem:[#allocation2 + $0x30] sm:$0xff] %vm333_vm0, %v1570_v0  ;;  %v301_v15 = vadd.f32 %v1746_v13, %v289_v12  ;;  %v302_v16 = vadd.f32 %v1746_v13, %v290_v14  ;;  %v303_v20 = vadd.f32 %v1746_v13, %v291_v18  ;;  %770 = vmatpush.msra.mxu0 %v737_v35 }
  0x1b   : > { %v1682_v1 = vld [vmem:[#allocation2] sm:$0xff]  ;;  %342 = vst.msk [vmem:[#allocation2 + $0x38] sm:$0x3] %vm335_vm1, %v1570_v0  ;;  %v304_v31 = vadd.f32 %v1746_v13, %v292_v27  ;;  %v305_v42 = vadd.f32 %v1746_v13, %v293_v41  ;;  %v306_v56 = vadd.f32 %v1746_v13, %v294_v55  ;;  %1427 = vmatpush.msra.mxu2 %v737_v35 }
  0x1c   : > { %v365_v2 = vld [vmem:[#allocation2 + $0x8] sm:$0x3]  ;;  %v401_v3 = vrot.slane %v1682_v1, 1  ;;  %343 = vst.msk [vmem:[#allocation2 + $0x40] sm:$0xff] %vm333_vm0, %v1570_v0  ;;  %v426_v6 = vrot.slane %v1682_v1, 2  ;;  %vm309_vm4 = vcmp.gt.f32.partialorder %v301_v15, 0.0 }
  0x1d   : > { %v402_v4 = vrot.slane %v365_v2, 1  ;;  %344 = vst.msk [vmem:[#allocation2 + $0x48] sm:$0x3] %vm335_vm1, %v1570_v0  ;;  %v427_v7 = vrot.slane %v365_v2, 2  ;;  %v317_v19 = vmul.f32 0.1, %v301_v15 }
  0x1e   : > { %345 = vst.msk [vmem:[#allocation2 + $0x50] sm:$0xff] %vm333_vm0, %v1570_v0  ;;  %v318_v21 = vmul.f32 0.1, %v302_v16  ;;  %vm310_vm5 = vcmp.gt.f32.partialorder %v302_v16, 0.0  ;;  %v319_v22 = vmul.f32 0.1, %v303_v20 }
  0x1f   : > { %v403_v5 = vsel %vm400_vm2, %v401_v3, %v402_v4  ;;  %346 = vst.msk [vmem:[#allocation2 + $0x58] sm:$0x3] %vm335_vm1, %v1570_v0  ;;  %v428_v8 = vsel %vm425_vm3, %v426_v6, %v427_v7  ;;  %vm311_vm6 = vcmp.gt.f32.partialorder %v303_v20, 0.0  ;;  %v325_v23 = vsel %vm309_vm4, %v301_v15, %v317_v19  ;;  %v729_v55 = vld [vmem:[%s2444_s3] sm:$0xff] }
  0x20   : > { %466 = vrot.lane.b32.xlu0 %v403_v5, %s2451_s13  ;;  %347 = vst.msk [vmem:[#allocation2 + $0x60] sm:$0xff] %vm333_vm0, %v1570_v0  ;;  %v326_v24 = vsel %vm310_vm5, %v302_v16, %v318_v21  ;;  %v327_v25 = vsel %vm311_vm6, %v303_v20, %v319_v22  ;;  %v320_v36 = vmul.f32 0.1, %v304_v31  ;;  %vm312_vm7 = vcmp.gt.f32.partialorder %v304_v31, 0.0  ;;  %v283_v21 = vld [vmem:[%s1720_s18 + $0x30] sm:$0xff] }
  0x21   : > { %348 = vst.msk [vmem:[#allocation2 + $0x68] sm:$0x3] %vm335_vm1, %v1570_v0  ;;  %vm313_vm8 = vcmp.gt.f32.partialorder %v305_v42, 0.0  ;;  %v321_v44 = vmul.f32 0.1, %v305_v42  ;;  %vm314_vm9 = vcmp.gt.f32.partialorder %v306_v56, 0.0  ;;  %v295_v22 = vmul.f32 %v1730_v9, %v283_v21 }
  0x22   : > { %349 = vst.msk [vmem:[#allocation2 + $0x70] sm:$0xff] %vm333_vm0, %v1570_v0  ;;  %v328_v40 = vsel %vm312_vm7, %v304_v31, %v320_v36  ;;  %v322_v59 = vmul.f32 0.1, %v306_v56  ;;  %v736_v36 = vld [vmem:[%s2444_s3 + $0x38] sm:$0xff]  ;;  %vm711_vm4 = vcmask 457728   ;;  %vm720_vm5 = vcmask 523264  }
  0x23   : > { %350 = vst.msk [vmem:[#allocation2 + $0x78] sm:$0x3] %vm335_vm1, %v1570_v0  ;;  %v329_v47 = vsel %vm313_vm8, %v305_v42, %v321_v44  ;;  %771 = vmatpush.msra.mxu0 %v736_v36  ;;  %1428 = vmatpush.msra.mxu2 %v736_v36  ;;  %v734_v42 = vld [vmem:[%s2444_s3 + $0x28] sm:$0xff]  ;;  %vm738_vm6 = vcmask 588800  }
  0x24   : > { %351 = vst.msk [vmem:[#allocation2 + $0x80] sm:$0xff] %vm333_vm0, %v1570_v0  ;;  %v330_v60 = vsel %vm314_vm9, %v306_v56, %v322_v59 }
  0x25   : > { %352 = vst.msk [vmem:[#allocation2 + $0x88] sm:$0x3] %vm335_vm1, %v1570_v0 }
  0x26   : > { %353 = vst.msk [vmem:[#allocation2 + $0x90] sm:$0xff] %vm333_vm0, %v1570_v0 }
  0x27   : > { %354 = vst.msk [vmem:[#allocation2 + $0x98] sm:$0x3] %vm335_vm1, %v1570_v0 }
  0x28   : > { %852 = vst.msk [vmem:[#allocation3] sm:$0xff] %vm333_vm0, %v1570_v0  ;;  %490 = vrot.lane.b32.xlu0 %v428_v8, %s1572_s19 }
  0x29   : > { %853 = vst.msk [vmem:[#allocation3 + $0x8] sm:$0x3] %vm335_vm1, %v1570_v0 }
  0x2a   : > { %854 = vst.msk [vmem:[#allocation3 + $0x10] sm:$0xff] %vm333_vm0, %v1570_v0 }
  0x2b   : > { %855 = vst.msk [vmem:[#allocation3 + $0x18] sm:$0x3] %vm335_vm1, %v1570_v0 }
  0x2c   : > { %856 = vst.msk [vmem:[#allocation3 + $0x20] sm:$0xff] %vm333_vm0, %v1570_v0 }
  0x2d   : > { %857 = vst.msk [vmem:[#allocation3 + $0x28] sm:$0x3] %vm335_vm1, %v1570_v0 }
  0x2e   : > { %858 = vst.msk [vmem:[#allocation3 + $0x30] sm:$0xff] %vm333_vm0, %v1570_v0 }
  0x2f   : > { %859 = vst.msk [vmem:[#allocation3 + $0x38] sm:$0x3] %vm335_vm1, %v1570_v0 }
  0x30   : > { %860 = vst.msk [vmem:[#allocation3 + $0x40] sm:$0xff] %vm333_vm0, %v1570_v0 }
  0x31   : > { %861 = vst.msk [vmem:[#allocation3 + $0x48] sm:$0x3] %vm335_vm1, %v1570_v0 }
  0x32   : > { %862 = vst.msk [vmem:[#allocation3 + $0x50] sm:$0xff] %vm333_vm0, %v1570_v0 }
  0x33   : > { %863 = vst.msk [vmem:[#allocation3 + $0x58] sm:$0x3] %vm335_vm1, %v1570_v0 }
  0x34   : > { %864 = vst.msk [vmem:[#allocation3 + $0x60] sm:$0xff] %vm333_vm0, %v1570_v0 }
  0x35   : > { %865 = vst.msk [vmem:[#allocation3 + $0x68] sm:$0x3] %vm335_vm1, %v1570_v0 }
  0x36   : > { %866 = vst.msk [vmem:[#allocation3 + $0x70] sm:$0xff] %vm333_vm0, %v1570_v0 }
  0x37   : > { %867 = vst.msk [vmem:[#allocation3 + $0x78] sm:$0x3] %vm335_vm1, %v1570_v0 }
  0x38   : > { %868 = vst.msk [vmem:[#allocation3 + $0x80] sm:$0xff] %vm333_vm0, %v1570_v0 }
  0x39   : > { %869 = vst.msk [vmem:[#allocation3 + $0x88] sm:$0x3] %vm335_vm1, %v1570_v0 }
  0x3a   : > { %870 = vst.msk [vmem:[#allocation3 + $0x90] sm:$0xff] %vm333_vm0, %v1570_v0 }
  0x3b   : > { %871 = vst.msk [vmem:[#allocation3 + $0x98] sm:$0x3] %vm335_vm1, %v1570_v0  ;;  %vm702_vm1 = vcmask 392192  }
  0x3c   : > { %356 = vst.msk [vmem:[#allocation2 + $0x11] sm:$0xff] %vm333_vm0, %v325_v23 }
  0x3d   : > { %357 = vst.msk [vmem:[#allocation2 + $0x21] sm:$0xff] %vm333_vm0, %v326_v24  ;;  %v307_v24 = vadd.f32 %v1746_v13, %v295_v22 }
  0x3e   : > { %358 = vst.msk [vmem:[#allocation2 + $0x31] sm:$0xff] %vm333_vm0, %v327_v25 }
  0x3f   : > { %359 = vst.msk [vmem:[#allocation2 + $0x41] sm:$0xff] %vm333_vm0, %v328_v40  ;;  %v323_v27 = vmul.f32 0.1, %v307_v24  ;;  %vm315_vm10 = vcmp.gt.f32.partialorder %v307_v24, 0.0 }
  0x40   : > { %360 = vst.msk [vmem:[#allocation2 + $0x51] sm:$0xff] %vm333_vm0, %v329_v47 }
  0x41   : > { %361 = vst.msk [vmem:[#allocation2 + $0x61] sm:$0xff] %vm333_vm0, %v330_v60 }
  0x43   : > { %v1787_v28 = vld [vmem:[#allocation2 + $0x10] sm:$0xff]  ;;  %v367_v34 = vld [vmem:[#allocation2 + $0x18] sm:$0x3] }
  0x44   : > { %514 = vrot.lane.b32.xlu1 %v1787_v28, %s1573_s29  ;;  %v1791_v29 = vld [vmem:[#allocation2 + $0x20] sm:$0xff]  ;;  %v369_v30 = vld [vmem:[#allocation2 + $0x28] sm:$0x3]  ;;  %v429_v38 = vrot.slane %v1787_v28, 2  ;;  %v430_v39 = vrot.slane %v367_v34, 2  ;;  %v404_v45 = vrot.slane %v1787_v28, 1 }
  0x45   : > { %v407_v32 = vrot.slane %v1791_v29, 1  ;;  %v408_v33 = vrot.slane %v369_v30, 1  ;;  %586 = vrot.lane.b32.xlu2 %v1791_v29, %s1574_s8  ;;  %v405_v46 = vrot.slane %v367_v34, 1  ;;  %v432_v49 = vrot.slane %v1791_v29, 2  ;;  %v1817_v53 = vld [vmem:[#allocation2 + $0x30] sm:$0xff] }
  0x46   : > { %v431_v43 = vsel %vm425_vm3, %v429_v38, %v430_v39  ;;  %v433_v50 = vrot.slane %v369_v30, 2  ;;  %v371_v54 = vld [vmem:[#allocation2 + $0x38] sm:$0x3]  ;;  %v435_v57 = vrot.slane %v1817_v53, 2  ;;  %v410_v62 = vrot.slane %v1817_v53, 1  ;;  %v1832_v2 = vld [vmem:[#allocation2 + $0x40] sm:$0xff] }
  0x47   : > { %v409_v37 = vsel %vm400_vm2, %v407_v32, %v408_v33  ;;  %v406_v48 = vsel %vm400_vm2, %v404_v45, %v405_v46  ;;  %v436_v58 = vrot.slane %v371_v54, 2  ;;  %v411_v63 = vrot.slane %v371_v54, 1  ;;  %v373_v3 = vld [vmem:[#allocation2 + $0x48] sm:$0x3]  ;;  %v1840_v10 = vld [vmem:[#allocation2 + $0x50] sm:$0xff]  ;;  %v284_v39 = vld [vmem:[%s1720_s18 + $0x38] sm:$0xff] }
  0x48   : > { %610 = vrot.lane.b32.xlu0 %v409_v37, %s1575_s9  ;;  %v434_v51 = vsel %vm425_vm3, %v432_v49, %v433_v50  ;;  %v413_v4 = vrot.slane %v1832_v2, 1  ;;  %v414_v5 = vrot.slane %v373_v3, 1  ;;  %v438_v7 = vrot.slane %v1832_v2, 2  ;;  %v375_v12 = vld [vmem:[#allocation2 + $0x58] sm:$0x3]  ;;  %v1859_v19 = vld [vmem:[#allocation2 + $0x60] sm:$0xff] }
  0x49   : > { %v437_v61 = vsel %vm425_vm3, %v435_v57, %v436_v58  ;;  %v412_v0 = vsel %vm400_vm2, %v410_v62, %v411_v63  ;;  %v439_v8 = vrot.slane %v373_v3, 2  ;;  %v416_v14 = vrot.slane %v1840_v10, 1  ;;  %v377_v23 = vld [vmem:[#allocation2 + $0x68] sm:$0x3]  ;;  %v735_v38 = vld [vmem:[%s2444_s3 + $0x30] sm:$0xff] }
  0x4a   : > { %v415_v6 = vsel %vm400_vm2, %v413_v4, %v414_v5  ;;  %v417_v15 = vrot.slane %v375_v12, 1  ;;  %v441_v17 = vrot.slane %v1840_v10, 2  ;;  %v442_v18 = vrot.slane %v375_v12, 2  ;;  %772 = vmatpush.msra.mxu0 %v735_v38  ;;  %1429 = vmatpush.msra.mxu2 %v735_v38  ;;  %v731_v49 = vld [vmem:[%s2444_s3 + $0x10] sm:$0xff]  ;;  %v383_v38 = vld [vmem:[#allocation2 + $0x98] sm:$0x3] }
  0x4b   : > { %v1846_v11 = vsel %vm425_vm3, %v438_v7, %v439_v8  ;;  %v419_v25 = vrot.slane %v1859_v19, 1  ;;  %v420_v26 = vrot.slane %v377_v23, 1  ;;  %v331_v30 = vsel %vm315_vm10, %v307_v24, %v323_v27 }
  0x4c   : > { %516 = vrot.lane.b32.xlu1 %v1791_v29, %s1573_s29  ;;  %v1855_v16 = vsel %vm400_vm2, %v416_v14, %v417_v15  ;;  %v1866_v20 = vsel %vm425_vm3, %v441_v17, %v442_v18  ;;  %362 = vst.msk [vmem:[#allocation2 + $0x71] sm:$0xff] %vm333_vm0, %v331_v30  ;;  %v444_v32 = vrot.slane %v1859_v19, 2  ;;  %v445_v33 = vrot.slane %v377_v23, 2  ;;  %773 = vmatpush.msra.mxu0 %v734_v42 }
  0x4d   : > { %562 = vrot.lane.b32.xlu2 %v431_v43, %s1576_s14  ;;  %v1879_v31 = vsel %vm400_vm2, %v419_v25, %v420_v26  ;;  %v296_v40 = vmul.f32 %v1730_v9, %v284_v39  ;;  %1430 = vmatpush.msra.mxu2 %v734_v42 }
  0x4e   : > { %v1889_v34 = vsel %vm425_vm3, %v444_v32, %v445_v33 }
  0x4f   : > { %v308_v41 = vadd.f32 %v1746_v13, %v296_v40  ;;  %v733_v13 = vld [vmem:[%s2444_s3 + $0x20] sm:$0xff] }
  0x50   : > { %492 = vrot.lane.b32.xlu0 %v431_v43, %s1572_s19  ;;  %774 = vmatpush.msra.mxu0 %v733_v13 }
  0x51   : > { %v324_v43 = vmul.f32 0.1, %v308_v41  ;;  %vm316_vm11 = vcmp.gt.f32.partialorder %v308_v41, 0.0  ;;  %1431 = vmatpush.msra.mxu2 %v733_v13 }
  0x53   : > { %v1921_v45 = vld [vmem:[#allocation2 + $0x70] sm:$0xff]  ;;  %v379_v9 = vld [vmem:[#allocation2 + $0x78] sm:$0x3]  ;;  %v332_v47 = vsel %vm316_vm11, %v308_v41, %v324_v43 }
  0x54   : > { %538 = vrot.lane.b32.xlu1 %v406_v48, %s1577_s15  ;;  %363 = vst.msk [vmem:[#allocation2 + $0x81] sm:$0xff] %vm333_vm0, %v332_v47  ;;  %v422_v50 = vrot.slane %v1921_v45, 1  ;;  %v447_v60 = vrot.slane %v1921_v45, 2 }
  0x55   : > { %468 = vrot.lane.b32.xlu2 %v406_v48, %s2451_s13  ;;  %v732_v48 = vld [vmem:[%s2444_s3 + $0x18] sm:$0xff] }
  0x56   : > { %775 = vmatpush.msra.mxu0 %v732_v48  ;;  %1432 = vmatpush.msra.mxu2 %v732_v48 }
  0x58   : > { %564 = vrot.lane.b32.xlu0 %v434_v51, %s1576_s14  ;;  %776 = vmatpush.msra.mxu0 %v731_v49 }
  0x59   : > { %1433 = vmatpush.msra.mxu2 %v731_v49 }
  0x5a   : > { %777 = vmatpush.msra.mxu0 %v730_v52 }
  0x5b   : > { %1434 = vmatpush.msra.mxu2 %v730_v52  ;;  %v380_v3 = vld [vmem:[#allocation2 + $0x80] sm:$0xff]  ;;  %v381_v4 = vld [vmem:[#allocation2 + $0x88] sm:$0x3] }
  0x5c   : > { %634 = vrot.lane.b32.xlu1 %v434_v51, %s2449_s16  ;;  %778 = vmatpush.msra.mxu0 %v729_v55  ;;  %v453_v7 = vrot.slane %v381_v4, 1  ;;  %v455_v22 = vrot.slane %v380_v3, 2  ;;  %v456_v23 = vrot.slane %v381_v4, 2 }
  0x5d   : > { %540 = vrot.lane.b32.xlu2 %v409_v37, %s1577_s15  ;;  %1435 = vmatpush.msra.mxu2 %v729_v55 }
  0x5e   : > { %v457_v32 = vsel %vm425_vm3, %v455_v22, %v456_v23 }
  0x60   : > { %636 = vrot.lane.b32.xlu0 %v437_v61, %s2449_s16 }
  0x64   : > { %588 = vrot.lane.b32.xlu1 %v1817_v53, %s1574_s8 }
  0x65   : > { %612 = vrot.lane.b32.xlu2 %v412_v0, %s1575_s9 }
  0x68   : > { %494 = vrot.lane.b32.xlu0 %v434_v51, %s1572_s19  ;;  %v423_v51 = vrot.slane %v379_v9, 1 }
  0x6a   : > { %v1942_v54 = vsel %vm400_vm2, %v422_v50, %v423_v51  ;;  %v461_v50 = vrot.slane %v383_v38, 1 }
  0x6c   : > { %470 = vrot.lane.b32.xlu1 %v409_v37, %s2451_s13 }
  0x6d   : > { %474 = vrot.lane.b32.xlu2 %v415_v6, %s2451_s13 }
  0x70   : > { %522 = vrot.lane.b32.xlu0 %v1840_v10, %s1573_s29 }
  0x74   : > { %498 = vrot.lane.b32.xlu1 %v1846_v11, %s1572_s19 }
  0x75   : > { %518 = vrot.lane.b32.xlu2 %v1817_v53, %s1573_s29 }
  0x78   : > { %566 = vrot.lane.b32.xlu0 %v437_v61, %s1576_s14 }
  0x7c   : > { %542 = vrot.lane.b32.xlu1 %v412_v0, %s1577_s15 }
  0x7d   : > { %546 = vrot.lane.b32.xlu2 %v1855_v16, %s1577_s15 }
  0x80   : > { %594 = vrot.lane.b32.xlu0 %v1859_v19, %s1574_s8 }
  0x84   : > { %570 = vrot.lane.b32.xlu1 %v1866_v20, %s1576_s14 }
  0x85   : > { %590 = vrot.lane.b32.xlu2 %v1832_v2, %s1574_s8 }
  0x88   : > { %638 = vrot.lane.b32.xlu0 %v1846_v11, %s2449_s16 }
  0x8c   : > { %614 = vrot.lane.b32.xlu1 %v415_v6, %s1575_s9 }
  0x8d   : > { %618 = vrot.lane.b32.xlu2 %v1879_v31, %s1575_s9 }
  0x90   : > { %476 = vrot.lane.b32.xlu0 %v1855_v16, %s2451_s13 }
  0x92   : > { %v467_v44 = vpop.permute.xlu0 %466 }
  0x93   : > { %v658_v8 = vsel %vm333_vm0, %v1682_v1, %v467_v44  ;;  %v464_v44 = vrot.slane %v383_v38, 2 }
  0x94   : > { %642 = vrot.lane.b32.xlu1 %v1889_v34, %s2449_s16 }
  0x95   : > { %472 = vrot.lane.b32.xlu2 %v412_v0, %s2451_s13 }
  0x98   : > { %520 = vrot.lane.b32.xlu0 %v1832_v2, %s1573_s29 }
  0x9a   : > { %v491_v57 = vpop.permute.xlu0 %490 }
  0x9b   : > { %v667_v12 = vsel %vm666_vm12, %v658_v8, %v491_v57 }
  0x9c   : > { %496 = vrot.lane.b32.xlu1 %v437_v61, %s1572_s19  ;;  %v448_v61 = vrot.slane %v379_v9, 2 }
  0x9d   : > { %500 = vrot.lane.b32.xlu2 %v1866_v20, %s1572_s19 }
  0x9e   : > { %v449_v63 = vsel %vm425_vm3, %v447_v60, %v448_v61 }
  0x9f   : > { %v1905_v37 = vpop.permute.xlu2 %586 }
  0xa0   : > { %548 = vrot.lane.b32.xlu0 %v1879_v31, %s1577_s15 }
  0xa4   : > { %524 = vrot.lane.b32.xlu1 %v1859_v19, %s1573_s29 }
  0xa5   : > { %544 = vrot.lane.b32.xlu2 %v415_v6, %s1577_s15  ;;  %v452_v6 = vrot.slane %v380_v3, 1 }
  0xa7   : > { %v563_v46 = vpop.permute.xlu2 %562  ;;  %v454_v14 = vsel %vm400_vm2, %v452_v6, %v453_v7 }
  0xa8   : > { %592 = vrot.lane.b32.xlu0 %v1840_v10, %s1574_s8 }
  0xac   : > { %568 = vrot.lane.b32.xlu1 %v1846_v11, %s1576_s14 }
  0xad   : > { %572 = vrot.lane.b32.xlu2 %v1889_v34, %s1576_s14 }
  0xaf   : > { %v469_v56 = vpop.permute.xlu2 %468 }
  0xb0   : > { %620 = vrot.lane.b32.xlu0 %v1942_v54, %s1575_s9  ;;  %v659_v24 = vsel %vm333_vm0, %v1787_v28, %v469_v56 }
  0xb4   : > { %596 = vrot.lane.b32.xlu1 %v1921_v45, %s1574_s8 }
  0xb5   : > { %616 = vrot.lane.b32.xlu2 %v1855_v16, %s1575_s9 }
  0xb6   : > { %v515_v58 = vpop.permute.xlu1 %514 }
  0xb7   : > { %v541_v59 = vpop.permute.xlu2 %540  ;;  %v676_v15 = vsel %vm675_vm13, %v667_v12, %v515_v58 }
  0xb8   : > { %478 = vrot.lane.b32.xlu0 %v1879_v31, %s2451_s13 }
  0xba   : > { %v611_v62 = vpop.permute.xlu0 %610 }
  0xbc   : > { %640 = vrot.lane.b32.xlu1 %v1866_v20, %s2455_s17 }
  0xbd   : > { %644 = vrot.lane.b32.xlu2 %v449_v63, %s2455_s17 }
  0xbe   : > { %v517_v0 = vpop.permute.xlu1 %516 }
  0xbf   : > { %v613_v5 = vpop.permute.xlu2 %612 }
  0xc0   : > { %550 = vrot.lane.b32.xlu0 %v1942_v54, %s1577_s15 }
  0xc2   : > { %v493_v11 = vpop.permute.xlu0 %492 }
  0xc3   : > { %v668_v27 = vsel %vm666_vm12, %v659_v24, %v493_v11 }
  0xc4   : > { %502 = vrot.lane.b32.xlu1 %v1889_v34, %s1572_s19  ;;  %v677_v33 = vsel %vm675_vm13, %v668_v27, %v517_v0 }
  0xc5   : > { %526 = vrot.lane.b32.xlu2 %v1921_v45, %s1573_s29  ;;  %v686_v28 = vsel %vm684_vm14, %v677_v33, %v541_v59 }
  0xc6   : > { %v539_v16 = vpop.permute.xlu1 %538 }
  0xc7   : > { %v685_v17 = vsel %vm684_vm14, %v676_v15, %v539_v16  ;;  %v1974_v1 = vpop.permute.xlu2 %474 }
  0xc8   : > { %v694_v18 = vsel %vm693_vm15, %v685_v17, %v563_v46  ;;  %622 = vrot.lane.b32.xlu0 %v454_v14, %s1575_s9 }
  0xc9   : > { %v703_v21 = vsel %vm702_vm1, %v694_v18, %v1905_v37  ;;  %v382_v37 = vld [vmem:[#allocation2 + $0x90] sm:$0xff] }
  0xca   : > { %v565_v20 = vpop.permute.xlu0 %564  ;;  %v712_v26 = vsel %vm711_vm4, %v703_v21, %v611_v62  ;;  %v463_v43 = vrot.slane %v382_v37, 2  ;;  %v460_v49 = vrot.slane %v382_v37, 1 }
  0xcb   : > { %v695_v35 = vsel %vm693_vm15, %v686_v28, %v565_v20 }
  0xcc   : > { %574 = vrot.lane.b32.xlu1 %v449_v63, %s1576_s14  ;;  %v465_v13 = vsel %vm425_vm3, %v463_v43, %v464_v44  ;;  %v462_v52 = vsel %vm400_vm2, %v460_v49, %v461_v50 }
  0xcd   : > { %598 = vrot.lane.b32.xlu2 %v380_v3, %s1574_s8 }
  0xce   : > { %v635_v25 = vpop.permute.xlu1 %634 }
  0xcf   : > { %v721_v30 = vsel %vm720_vm5, %v712_v26, %v635_v25  ;;  %v519_v31 = vpop.permute.xlu2 %518 }
  0xd0   : > { %1404 = vmatmul.msk.f32.vlgmr.msra.gmra.mxu0 %vm738_vm6, %v721_v30  ;;  %504 = vrot.lane.b32.xlu0 %v449_v63, %s1572_s19  ;;  %v662_v63 = vsel %vm333_vm0, %v1832_v2, %v1974_v1 }
  0xd2   : > { %v637_v34 = vpop.permute.xlu0 %636 }
  0xd4   : > { %646 = vrot.lane.b32.xlu1 %v457_v32, %s2455_s17 }
  0xd5   : > { %480 = vrot.lane.b32.xlu2 %v1942_v54, %s2451_s13 }
  0xd6   : > { %v589_v36 = vpop.permute.xlu1 %588 }
  0xd7   : > { %v704_v39 = vsel %vm702_vm1, %v695_v35, %v589_v36  ;;  %v547_v40 = vpop.permute.xlu2 %546 }
  0xd8   : > { %v713_v41 = vsel %vm711_vm4, %v704_v39, %v613_v5  ;;  %576 = vrot.lane.b32.xlu0 %v457_v32, %s1576_s14 }
  0xd9   : > { %v722_v42 = vsel %vm720_vm5, %v713_v41, %v637_v34 }
  0xda   : > { %1405 = vmatmul.msk.f32.gmra.mxu0 %vm738_vm6, %v722_v42  ;;  %v495_v9 = vpop.permute.xlu0 %494 }
  0xdc   : > { %528 = vrot.lane.b32.xlu1 %v380_v3, %s1573_s29 }
  0xdd   : > { %552 = vrot.lane.b32.xlu2 %v454_v14, %s1577_s15 }
  0xde   : > { %v471_v46 = vpop.permute.xlu1 %470 }
  0xdf   : > { %v591_v47 = vpop.permute.xlu2 %590  ;;  %v660_v57 = vsel %vm333_vm0, %v1791_v29, %v471_v46  ;;  %v882_v46 = vld [vmem:[#allocation3 + $0x8] sm:$0x3] }
  0xe0   : > { %648 = vrot.lane.b32.xlu0 %v465_v13, %s2455_s17  ;;  %v669_v59 = vsel %vm666_vm12, %v660_v57, %v495_v9  ;;  %v2046_v13 = vld [vmem:[#allocation3] sm:$0xff] }
  0xe1   : > { %v678_v62 = vsel %vm675_vm13, %v669_v59, %v519_v31  ;;  %v941_v57 = vrot.slane %v2046_v13, 2 }
  0xe2   : > { %v523_v48 = vpop.permute.xlu0 %522 }
  0xe4   : > { %600 = vrot.lane.b32.xlu1 %v382_v37, %s1574_s8 }
  0xe5   : > { %624 = vrot.lane.b32.xlu2 %v462_v52, %s1575_s9 }
  0xe6   : > { %v499_v51 = vpop.permute.xlu1 %498 }
  0xe7   : > { %v619_v55 = vpop.permute.xlu2 %618  ;;  %v671_v3 = vsel %vm666_vm12, %v662_v63, %v499_v51 }
  0xe8   : > { %v680_v29 = vsel %vm675_vm13, %v671_v3, %v523_v48  ;;  %v918_v48 = vrot.slane %v882_v46, 1 }
  0xe9   : > { %v689_v11 = vsel %vm684_vm14, %v680_v29, %v547_v40 }
  0xea   : > { %v567_v54 = vpop.permute.xlu0 %566 }
  0xee   : > { %v543_v56 = vpop.permute.xlu1 %542 }
  0xef   : > { %v473_v60 = vpop.permute.xlu2 %472  ;;  %v687_v0 = vsel %vm684_vm14, %v678_v62, %v543_v56 }
  0xf0   : > { %v696_v5 = vsel %vm693_vm15, %v687_v0, %v567_v54  ;;  %v661_v33 = vsel %vm333_vm0, %v1817_v53, %v473_v60  ;;  %v899_v54 = vld [vmem:[#allocation3 + $0x90] sm:$0xff] }
  0xf1   : > { %v705_v6 = vsel %vm702_vm1, %v696_v5, %v591_v47  ;;  %v917_v47 = vrot.slane %v2046_v13, 1  ;;  %1115 = vrot.lane.b32.xlu2 %v899_v54, %s1574_s8  ;;  %v975_v62 = vrot.slane %v899_v54, 1  ;;  %v978_v63 = vrot.slane %v899_v54, 2 }
  0xf2   : > { %v595_v58 = vpop.permute.xlu0 %594 }
  0xf6   : > { %v571_v61 = vpop.permute.xlu1 %570 }
  0xf7   : > { %v501_v8 = vpop.permute.xlu2 %500  ;;  %v698_v14 = vsel %vm693_vm15, %v689_v11, %v571_v61  ;;  %v900_v61 = vld [vmem:[#allocation3 + $0x98] sm:$0x3] }
  0xf8   : > { %v707_v16 = vsel %vm702_vm1, %v698_v14, %v595_v58  ;;  %v942_v58 = vrot.slane %v882_v46, 2  ;;  %v976_v0 = vrot.slane %v900_v61, 1 }
  0xf9   : > { %v716_v17 = vsel %vm711_vm4, %v707_v16, %v619_v55  ;;  %v919_v55 = vsel %vm400_vm2, %v917_v47, %v918_v48 }
  0xfa   : > { %v639_v4 = vpop.permute.xlu0 %638  ;;  %981 = vrot.lane.b32.xlu1 %v919_v55, %s2451_s13  ;;  %v943_v60 = vsel %vm425_vm3, %v941_v57, %v942_v58  ;;  %v977_v29 = vsel %vm400_vm2, %v975_v62, %v976_v0 }
  0xfb   : > { %1005 = vrot.lane.b32.xlu0 %v943_v60, %s1572_s19  ;;  %1139 = vrot.lane.b32.xlu2 %v977_v29, %s1575_s9 }
  0xfe   : > { %v615_v7 = vpop.permute.xlu1 %614 }
  0xff   : > { %v714_v12 = vsel %vm711_vm4, %v705_v6, %v615_v7  ;;  %v545_v20 = vpop.permute.xlu2 %544 }
 0x100   : > { %v723_v2 = vsel %vm720_vm5, %v714_v12, %v639_v4  ;;  %v979_v4 = vrot.slane %v900_v61, 2 }
 0x101   : > { %1406 = vmatmul.msk.f32.gmra.mxu0 %vm738_vm6, %v723_v2 }
 0x102   : > { %v477_v15 = vpop.permute.xlu0 %476  ;;  %v980_v6 = vsel %vm425_vm3, %v978_v63, %v979_v4 }
 0x103   : > { %v663_v27 = vsel %vm333_vm0, %v1840_v10, %v477_v15  ;;  %1163 = vrot.lane.b32.xlu1 %v980_v6, %s2455_s17 }
 0x104   : > { %v672_v32 = vsel %vm666_vm12, %v663_v27, %v501_v8 }
 0x106   : > { %v643_v1 = vpop.permute.xlu1 %642 }
 0x107   : > { %v725_v18 = vsel %vm720_vm5, %v716_v17, %v643_v1  ;;  %v573_v24 = vpop.permute.xlu2 %572 }
 0x108   : > { %1408 = vmatmul.msk.f32.vlgmr.msra.gmra.mxu2 %vm738_vm6, %v725_v18 }
 0x10a   : > { %v521_v21 = vpop.permute.xlu0 %520 }
 0x10e   : > { %v497_v22 = vpop.permute.xlu1 %496 }
 0x10f   : > { %v617_v30 = vpop.permute.xlu2 %616  ;;  %v670_v28 = vsel %vm666_vm12, %v661_v33, %v497_v22 }
 0x110   : > { %v679_v37 = vsel %vm675_vm13, %v670_v28, %v521_v21  ;;  %v2077_v21 = vld [vmem:[%s2445_s4] ss:$0 sm:$0xff] }
 0x111   : > { %v688_v40 = vsel %vm684_vm14, %v679_v37, %v545_v20 }
 0x112   : > { %v549_v23 = vpop.permute.xlu0 %548 }
 0x116   : > { %v525_v25 = vpop.permute.xlu1 %524 }
 0x117   : > { %v681_v34 = vsel %vm675_vm13, %v672_v32, %v525_v25  ;;  %v645_v10 = vpop.permute.xlu2 %644 }
 0x118   : > { %v690_v36 = vsel %vm684_vm14, %v681_v34, %v549_v23  ;;  %v2082_v23 = vld [vmem:[%s2446_s5] ss:$0 sm:$0xff] }
 0x119   : > { %v699_v38 = vsel %vm693_vm15, %v690_v36, %v573_v24 }
 0x11a   : > { %v593_v26 = vpop.permute.xlu0 %592 }
 0x11e   : > { %v569_v31 = vpop.permute.xlu1 %568 }
 0x11f   : > { %v697_v42 = vsel %vm693_vm15, %v688_v40, %v569_v31  ;;  %v527_v52 = vpop.permute.xlu2 %526 }
 0x120   : > { %v706_v9 = vsel %vm702_vm1, %v697_v42, %v593_v26 }
 0x121   : > { %v715_v49 = vsel %vm711_vm4, %v706_v9, %v617_v30 }
 0x122   : > { %v621_v35 = vpop.permute.xlu0 %620 }
 0x126   : > { %v597_v39 = vpop.permute.xlu1 %596 }
 0x127   : > { %v708_v41 = vsel %vm702_vm1, %v699_v38, %v597_v39  ;;  %v599_v7 = vpop.permute.xlu2 %598 }
 0x128   : > { %v717_v53 = vsel %vm711_vm4, %v708_v41, %v621_v35 }
 0x129   : > { %v726_v43 = vsel %vm720_vm5, %v717_v53, %v645_v10 }
 0x12a   : > { %1409 = vmatmul.msk.f32.gmra.mxu2 %vm738_vm6, %v726_v43  ;;  %v479_v44 = vpop.permute.xlu0 %478 }
 0x12b   : > { %v664_v59 = vsel %vm333_vm0, %v1859_v19, %v479_v44 }
 0x12e   : > { %v641_v50 = vpop.permute.xlu1 %640 }
 0x12f   : > { %v724_v51 = vsel %vm720_vm5, %v715_v49, %v641_v50  ;;  %v481_v15 = vpop.permute.xlu2 %480 }
 0x130   : > { %1407 = vmatmul.msk.f32.gmra.mxu0 %vm738_vm6, %v724_v51  ;;  %v665_v20 = vsel %vm333_vm0, %v1921_v45, %v481_v15 }
 0x132   : > { %v551_v56 = vpop.permute.xlu0 %550 }
 0x136   : > { %v503_v3 = vpop.permute.xlu1 %502 }
 0x137   : > { %v673_v5 = vsel %vm666_vm12, %v664_v59, %v503_v3  ;;  %v553_v22 = vpop.permute.xlu2 %552 }
 0x138   : > { %v682_v19 = vsel %vm675_vm13, %v673_v5, %v527_v52 }
 0x139   : > { %v691_v11 = vsel %vm684_vm14, %v682_v19, %v551_v56 }
 0x13a   : > { %v623_v8 = vpop.permute.xlu0 %622 }
 0x13e   : > { %v575_v12 = vpop.permute.xlu1 %574 }
 0x13f   : > { %v700_v14 = vsel %vm693_vm15, %v691_v11, %v575_v12  ;;  %v625_v35 = vpop.permute.xlu2 %624 }
 0x140   : > { %v709_v2 = vsel %vm702_vm1, %v700_v14, %v599_v7 }
 0x141   : > { %v718_v17 = vsel %vm711_vm4, %v709_v2, %v623_v8 }
 0x142   : > { %v505_v16 = vpop.permute.xlu0 %504 }
 0x143   : > { %v674_v24 = vsel %vm666_vm12, %v665_v20, %v505_v16 }
 0x146   : > { %v647_v1 = vpop.permute.xlu1 %646 }
 0x147   : > { %v727_v18 = vsel %vm720_vm5, %v718_v17, %v647_v1 }
 0x148   : > { %1410 = vmatmul.msk.f32.gmra.mxu2 %vm738_vm6, %v727_v18 }
 0x14a   : > { %v577_v25 = vpop.permute.xlu0 %576 }
 0x14d   : > { %v780_v26 = vpop.f32.mrf.mxu0 }
 0x14e   : > { %v808_v27 = vmul.f32 %v2077_v21, %v780_v26  ;;  %v529_v30 = vpop.permute.xlu1 %528 }
 0x14f   : > { %v683_v45 = vsel %vm675_vm13, %v674_v24, %v529_v30 }
 0x150   : > { %v820_v31 = vadd.f32 %v2082_v23, %v808_v27  ;;  %v692_v32 = vsel %vm684_vm14, %v683_v45, %v553_v22 }
 0x151   : > { %v701_v28 = vsel %vm693_vm15, %v692_v32, %v577_v25 }
 0x152   : > { %vm828_vm7 = vcmp.gt.f32.partialorder %v820_v31, 0.0  ;;  %v836_v33 = vmul.f32 0.1, %v820_v31  ;;  %v649_v37 = vpop.permute.xlu0 %648 }
 0x154   : > { %v844_v34 = vsel %vm828_vm7, %v820_v31, %v836_v33 }
 0x155   : > { %873 = vst.msk [vmem:[#allocation3 + $0x11] sm:$0xff] %vm333_vm0, %v844_v34 }
 0x156   : > { %v601_v36 = vpop.permute.xlu1 %600 }
 0x157   : > { %v783_v38 = vpop.f32.mrf.mxu0  ;;  %v710_v39 = vsel %vm702_vm1, %v701_v28, %v601_v36 }
 0x158   : > { %v809_v10 = vmul.f32 %v2077_v21, %v783_v38  ;;  %v719_v40 = vsel %vm711_vm4, %v710_v39, %v625_v35  ;;  %v1245_v38 = vld [vmem:[%s2447_s6 + $0x40] sm:$0xff]  ;;  %v1244_v39 = vld [vmem:[%s2447_s6 + $0x38] sm:$0xff] }
 0x159   : > { %v728_v41 = vsel %vm720_vm5, %v719_v40, %v649_v37  ;;  %v2173_v37 = vpop.permute.xlu2 %1115  ;;  %1277 = vmatpush.msra.mxu1 %v1245_v38  ;;  %1436 = vmatpush.msra.mxu3 %v1245_v38 }
 0x15a   : > { %v821_v42 = vadd.f32 %v2082_v23, %v809_v10  ;;  %1411 = vmatmul.msk.f32.gmra.mxu2 %vm738_vm6, %v728_v41 }
 0x15b   : > { %1278 = vmatpush.msra.mxu1 %v1244_v39  ;;  %1437 = vmatpush.msra.mxu3 %v1244_v39 }
 0x15c   : > { %vm829_vm8 = vcmp.gt.f32.partialorder %v821_v42, 0.0  ;;  %v837_v53 = vmul.f32 0.1, %v821_v42  ;;  %v2097_v43 = vld [vmem:[#allocation3 + $0x10] sm:$0xff]  ;;  %v884_v44 = vld [vmem:[#allocation3 + $0x18] sm:$0x3] }
 0x15d   : > { %1029 = vrot.lane.b32.xlu0 %v2097_v43, %s1573_s29  ;;  %v944_v9 = vrot.slane %v2097_v43, 2  ;;  %v945_v46 = vrot.slane %v884_v44, 2  ;;  %v920_v47 = vrot.slane %v2097_v43, 1  ;;  %v921_v48 = vrot.slane %v884_v44, 1  ;;  %v1243_v44 = vld [vmem:[%s2447_s6 + $0x30] sm:$0xff] }
 0x15e   : > { %v845_v49 = vsel %vm829_vm8, %v821_v42, %v837_v53  ;;  %1279 = vmatpush.msra.mxu1 %v1243_v44  ;;  %1438 = vmatpush.msra.mxu3 %v1243_v44 }
 0x15f   : > { %874 = vst.msk [vmem:[#allocation3 + $0x21] sm:$0xff] %vm333_vm0, %v845_v49  ;;  %v946_v50 = vsel %vm425_vm3, %v944_v9, %v945_v46  ;;  %v922_v51 = vsel %vm400_vm2, %v920_v47, %v921_v48  ;;  %v1242_v48 = vld [vmem:[%s2447_s6 + $0x28] sm:$0xff] }
 0x160   : > { %1077 = vrot.lane.b32.xlu1 %v946_v50, %s1576_s14  ;;  %1053 = vrot.lane.b32.xlu2 %v922_v51, %s1577_s15 }
 0x161   : > { %v2199_v49 = vpop.permute.xlu2 %1139  ;;  %1280 = vmatpush.msra.mxu1 %v1242_v48  ;;  %1439 = vmatpush.msra.mxu3 %v1242_v48 }
 0x166   : > { %v2108_v52 = vld [vmem:[#allocation3 + $0x20] sm:$0xff]  ;;  %v886_v54 = vld [vmem:[#allocation3 + $0x28] sm:$0x3] }
 0x167   : > { %1101 = vrot.lane.b32.xlu0 %v2108_v52, %s1574_s8  ;;  %v923_v55 = vrot.slane %v2108_v52, 1  ;;  %v924_v56 = vrot.slane %v886_v54, 1  ;;  %v947_v58 = vrot.slane %v2108_v52, 2  ;;  %v948_v59 = vrot.slane %v886_v54, 2 }
 0x168   : > { %1007 = vrot.lane.b32.xlu1 %v946_v50, %s1572_s19  ;;  %983 = vrot.lane.b32.xlu2 %v922_v51, %s2451_s13  ;;  %v1241_v50 = vld [vmem:[%s2447_s6 + $0x20] sm:$0xff]  ;;  %v1240_v51 = vld [vmem:[%s2447_s6 + $0x18] sm:$0xff] }
 0x169   : > { %v925_v57 = vsel %vm400_vm2, %v923_v55, %v924_v56  ;;  %v949_v60 = vsel %vm425_vm3, %v947_v58, %v948_v59  ;;  %1281 = vmatpush.msra.mxu1 %v1241_v50  ;;  %v1239_v55 = vld [vmem:[%s2447_s6 + $0x10] sm:$0xff]  ;;  %1440 = vmatpush.msra.mxu3 %v1241_v50  ;;  %v1237_v58 = vld [vmem:[%s2447_s6] sm:$0xff] }
 0x16b   : > { %1282 = vmatpush.msra.mxu1 %v1240_v51  ;;  %1441 = vmatpush.msra.mxu3 %v1240_v51 }
 0x16c   : > { %v982_v53 = vpop.permute.xlu1 %981 }
 0x16d   : > { %1283 = vmatpush.msra.mxu1 %v1239_v55  ;;  %1442 = vmatpush.msra.mxu3 %v1239_v55 }
 0x170   : > { %1031 = vrot.lane.b32.xlu1 %v2108_v52, %s1573_s29  ;;  %1125 = vrot.lane.b32.xlu2 %v925_v57, %s1575_s9 }
 0x175   : > { %v2214_v56 = vpop.permute.xlu1 %1163 }
 0x178   : > { %1149 = vrot.lane.b32.xlu1 %v949_v60, %s2455_s17  ;;  %1079 = vrot.lane.b32.xlu2 %v949_v60, %s1576_s14 }
 0x17e   : > { %v786_v61 = vpop.f32.mrf.mxu0 }
 0x17f   : > { %v810_v62 = vmul.f32 %v2077_v21, %v786_v61 }
 0x180   : > { %1009 = vrot.lane.b32.xlu2 %v949_v60, %s1572_s19 }
 0x181   : > { %v822_v63 = vadd.f32 %v2082_v23, %v810_v62 }
 0x183   : > { %vm830_vm9 = vcmp.gt.f32.partialorder %v822_v63, 0.0  ;;  %v838_v0 = vmul.f32 0.1, %v822_v63 }
 0x185   : > { %v846_v3 = vsel %vm830_vm9, %v822_v63, %v838_v0  ;;  %v1006_v0 = vpop.permute.xlu0 %1005 }
 0x186   : > { %875 = vst.msk [vmem:[#allocation3 + $0x31] sm:$0xff] %vm333_vm0, %v846_v3 }
 0x18b   : > { %v792_v4 = vpop.f32.mrf.mxu2 }
 0x18c   : > { %v812_v5 = vmul.f32 %v2077_v21, %v792_v4 }
 0x18d   : > { %v2152_v18 = vld [vmem:[#allocation3 + $0x30] sm:$0xff]  ;;  %v888_v24 = vld [vmem:[#allocation3 + $0x38] sm:$0x3] }
 0x18e   : > { %v824_v29 = vadd.f32 %v2082_v23, %v812_v5  ;;  %v950_v27 = vrot.slane %v2152_v18, 2  ;;  %v951_v30 = vrot.slane %v888_v24, 2  ;;  %v926_v45 = vrot.slane %v2152_v18, 1 }
 0x18f   : > { %v927_v31 = vrot.slane %v888_v24, 1 }
 0x190   : > { %vm832_vm10 = vcmp.gt.f32.partialorder %v824_v29, 0.0  ;;  %v840_v6 = vmul.f32 0.1, %v824_v29  ;;  %v2166_v35 = vsel %vm425_vm3, %v950_v27, %v951_v30 }
 0x191   : > { %v928_v36 = vsel %vm400_vm2, %v926_v45, %v927_v31 }
 0x192   : > { %v848_v19 = vsel %vm832_vm10, %v824_v29, %v840_v6 }
 0x193   : > { %877 = vst.msk [vmem:[#allocation3 + $0x51] sm:$0xff] %vm333_vm0, %v848_v19 }
 0x19a   : > { %v2130_v7 = vld [vmem:[#allocation3 + $0x50] sm:$0xff]  ;;  %v892_v8 = vld [vmem:[#allocation3 + $0x58] sm:$0x3] }
 0x19b   : > { %1037 = vrot.lane.b32.xlu0 %v2130_v7, %s1573_s29  ;;  %v956_v11 = vrot.slane %v2130_v7, 2  ;;  %v957_v12 = vrot.slane %v892_v8, 2  ;;  %v932_v14 = vrot.slane %v2130_v7, 1  ;;  %v933_v2 = vrot.slane %v892_v8, 1 }
 0x19c   : > { %v1173_v8 = vsel %vm333_vm0, %v2046_v13, %v982_v53 }
 0x19d   : > { %v2137_v15 = vsel %vm425_vm3, %v956_v11, %v957_v12  ;;  %v2140_v16 = vsel %vm400_vm2, %v932_v14, %v933_v2 }
 0x19e   : > { %1085 = vrot.lane.b32.xlu2 %v2137_v15, %s1576_s14  ;;  %1061 = vrot.lane.b32.xlu1 %v2140_v16, %s1577_s15 }
 0x1a3   : > { %1055 = vrot.lane.b32.xlu0 %v925_v57, %s1577_s15 }
 0x1a6   : > { %991 = vrot.lane.b32.xlu2 %v2140_v16, %s2451_s13  ;;  %1015 = vrot.lane.b32.xlu1 %v2137_v15, %s1572_s19 }
 0x1ab   : > { %985 = vrot.lane.b32.xlu0 %v925_v57, %s2451_s13  ;;  %v1238_v57 = vld [vmem:[%s2447_s6 + $0x8] sm:$0xff] }
 0x1ac   : > { %1284 = vmatpush.msra.mxu1 %v1238_v57  ;;  %1443 = vmatpush.msra.mxu3 %v1238_v57 }
 0x1ad   : > { %v789_v17 = vpop.f32.mrf.mxu0  ;;  %v795_v1 = vpop.f32.mrf.mxu2 }
 0x1ae   : > { %v811_v20 = vmul.f32 %v2077_v21, %v789_v17  ;;  %v813_v22 = vmul.f32 %v2077_v21, %v795_v1  ;;  %1033 = vrot.lane.b32.xlu2 %v2152_v18, %s1573_s29  ;;  %1103 = vrot.lane.b32.xlu1 %v2152_v18, %s1574_s8 }
 0x1af   : > { %1285 = vmatpush.msra.mxu1 %v1237_v58  ;;  %1444 = vmatpush.msra.mxu3 %v1237_v58 }
 0x1b0   : > { %v823_v25 = vadd.f32 %v2082_v23, %v811_v20  ;;  %v825_v26 = vadd.f32 %v2082_v23, %v813_v22  ;;  %v1181_v20 = vsel %vm666_vm12, %v1173_v8, %v1006_v0 }
 0x1b2   : > { %vm831_vm11 = vcmp.gt.f32.partialorder %v823_v25, 0.0  ;;  %v839_v32 = vmul.f32 0.1, %v823_v25  ;;  %vm833_vm7 = vcmp.gt.f32.partialorder %v825_v26, 0.0  ;;  %v841_v33 = vmul.f32 0.1, %v825_v26 }
 0x1b4   : > { %v847_v34 = vsel %vm831_vm11, %v823_v25, %v839_v32  ;;  %v849_v28 = vsel %vm833_vm7, %v825_v26, %v841_v33 }
 0x1b5   : > { %876 = vst.msk [vmem:[#allocation3 + $0x41] sm:$0xff] %vm333_vm0, %v847_v34 }
 0x1b6   : > { %878 = vst.msk [vmem:[#allocation3 + $0x61] sm:$0xff] %vm333_vm0, %v849_v28  ;;  %1151 = vrot.lane.b32.xlu2 %v2166_v35, %s2455_s17  ;;  %1057 = vrot.lane.b32.xlu1 %v928_v36, %s1577_s15 }
 0x1ba   : > { %v1054_v61 = vpop.permute.xlu2 %1053 }
 0x1bc   : > { %v2232_v29 = vld [vmem:[#allocation3 + $0x40] sm:$0xff]  ;;  %v890_v6 = vld [vmem:[#allocation3 + $0x48] sm:$0x3] }
 0x1bd   : > { %v2181_v10 = vld [vmem:[#allocation3 + $0x60] sm:$0xff]  ;;  %v894_v40 = vld [vmem:[#allocation3 + $0x68] sm:$0x3]  ;;  %v953_v17 = vrot.slane %v2232_v29, 2  ;;  %v954_v1 = vrot.slane %v890_v6, 2  ;;  %v929_v13 = vrot.slane %v2232_v29, 1 }
 0x1be   : > { %1109 = vrot.lane.b32.xlu0 %v2181_v10, %s1574_s8  ;;  %987 = vrot.lane.b32.xlu1 %v928_v36, %s2451_s13  ;;  %v935_v41 = vrot.slane %v2181_v10, 1  ;;  %v936_v42 = vrot.slane %v894_v40, 1  ;;  %v959_v46 = vrot.slane %v2181_v10, 2  ;;  %v960_v47 = vrot.slane %v894_v40, 2 }
 0x1bf   : > { %v955_v26 = vsel %vm425_vm3, %v953_v17, %v954_v1 }
 0x1c0   : > { %v2191_v9 = vsel %vm400_vm2, %v935_v41, %v936_v42  ;;  %v961_v54 = vsel %vm425_vm3, %v959_v46, %v960_v47 }
 0x1c1   : > { %1133 = vrot.lane.b32.xlu2 %v2191_v9, %s1575_s9 }
 0x1c2   : > { %v984_v5 = vpop.permute.xlu2 %983 }
 0x1c3   : > { %v1174_v19 = vsel %vm333_vm0, %v2097_v43, %v984_v5  ;;  %v930_v43 = vrot.slane %v890_v6, 1 }
 0x1c5   : > { %v931_v31 = vsel %vm400_vm2, %v929_v13, %v930_v43 }
 0x1c6   : > { %1039 = vrot.lane.b32.xlu0 %v2181_v10, %s1573_s29  ;;  %1157 = vrot.lane.b32.xlu1 %v961_v54, %s2455_s17 }
 0x1c9   : > { %1063 = vrot.lane.b32.xlu2 %v2191_v9, %s1577_s15 }
 0x1ca   : > { %v1126_v40 = vpop.permute.xlu2 %1125 }
 0x1cb   : > { %v798_v59 = vpop.f32.mrf.mxu2 }
 0x1cc   : > { %v814_v60 = vmul.f32 %v2077_v21, %v798_v59 }
 0x1ce   : > { %v826_v62 = vadd.f32 %v2082_v23, %v814_v60  ;;  %1127 = vrot.lane.b32.xlu0 %v928_v36, %s1575_s9  ;;  %1087 = vrot.lane.b32.xlu1 %v961_v54, %s1576_s14 }
 0x1cf   : > { %v1030_v2 = vpop.permute.xlu0 %1029 }
 0x1d0   : > { %vm834_vm8 = vcmp.gt.f32.partialorder %v826_v62, 0.0  ;;  %v842_v63 = vmul.f32 0.1, %v826_v62  ;;  %v1189_v25 = vsel %vm675_vm13, %v1181_v20, %v1030_v2 }
 0x1d1   : > { %1017 = vrot.lane.b32.xlu2 %v961_v54, %s1572_s19  ;;  %v1197_v33 = vsel %vm684_vm14, %v1189_v25, %v1054_v61 }
 0x1d2   : > { %v850_v3 = vsel %vm834_vm8, %v826_v62, %v842_v63  ;;  %v1078_v4 = vpop.permute.xlu1 %1077  ;;  %v1080_v47 = vpop.permute.xlu2 %1079 }
 0x1d3   : > { %879 = vst.msk [vmem:[#allocation3 + $0x71] sm:$0xff] %vm333_vm0, %v850_v3  ;;  %v1205_v36 = vsel %vm693_vm15, %v1197_v33, %v1078_v4 }
 0x1d6   : > { %1081 = vrot.lane.b32.xlu0 %v2166_v35, %s1576_s14 }
 0x1d9   : > { %1105 = vrot.lane.b32.xlu2 %v2232_v29, %s1574_s8 }
 0x1da   : > { %v1008_v11 = vpop.permute.xlu1 %1007  ;;  %v2240_v12 = vld [vmem:[#allocation3 + $0x70] sm:$0xff]  ;;  %v896_v30 = vld [vmem:[#allocation3 + $0x78] sm:$0x3]  ;;  %v2283_v55 = vpop.permute.xlu2 %1009 }
 0x1db   : > { %v1182_v14 = vsel %vm666_vm12, %v1174_v19, %v1008_v11  ;;  %1041 = vrot.lane.b32.xlu1 %v2240_v12, %s1573_s29  ;;  %v962_v28 = vrot.slane %v2240_v12, 2  ;;  %v938_v44 = vrot.slane %v2240_v12, 1 }
 0x1dd   : > { %v801_v22 = vpop.f32.mrf.mxu2 }
 0x1de   : > { %1011 = vrot.lane.b32.xlu0 %v2166_v35, %s1572_s19  ;;  %v815_v24 = vmul.f32 %v2077_v21, %v801_v22  ;;  %v1102_v21 = vpop.permute.xlu0 %1101  ;;  %v963_v35 = vrot.slane %v896_v30, 2 }
 0x1df   : > { %v1213_v38 = vsel %vm702_vm1, %v1205_v36, %v1102_v21 }
 0x1e0   : > { %v827_v27 = vadd.f32 %v2082_v23, %v815_v24  ;;  %v964_v39 = vsel %vm425_vm3, %v962_v28, %v963_v35  ;;  %v1221_v42 = vsel %vm711_vm4, %v1213_v38, %v1126_v40 }
 0x1e1   : > { %1013 = vrot.lane.b32.xlu2 %v955_v26, %s1572_s19 }
 0x1e2   : > { %v1032_v45 = vpop.permute.xlu1 %1031  ;;  %vm835_vm9 = vcmp.gt.f32.partialorder %v827_v27, 0.0  ;;  %v843_v32 = vmul.f32 0.1, %v827_v27 }
 0x1e3   : > { %v2258_v34 = vsel %vm675_vm13, %v1182_v14, %v1032_v45  ;;  %989 = vrot.lane.b32.xlu1 %v931_v31, %s2456_s20 }
 0x1e4   : > { %v851_v23 = vsel %vm835_vm9, %v827_v27, %v843_v32 }
 0x1e5   : > { %880 = vst.msk [vmem:[#allocation3 + $0x81] sm:$0xff] %vm333_vm0, %v851_v23 }
 0x1e6   : > { %993 = vrot.lane.b32.xlu0 %v2191_v9, %s2456_s20  ;;  %v939_v9 = vrot.slane %v896_v30, 1 }
 0x1e8   : > { %v940_v46 = vsel %vm400_vm2, %v938_v44, %v939_v9 }
 0x1e9   : > { %1159 = vrot.lane.b32.xlu2 %v964_v39, %s2455_s17 }
 0x1ea   : > { %v1150_v41 = vpop.permute.xlu1 %1149 }
 0x1eb   : > { %1129 = vrot.lane.b32.xlu1 %v931_v31, %s1575_s9  ;;  %v1229_v53 = vsel %vm720_vm5, %v1221_v42, %v1150_v41 }
 0x1ec   : > { %1412 = vmatmul.msk.f32.vlgmr.msra.gmra.mxu1 %vm738_vm6, %v1229_v53  ;;  %v897_v48 = vld [vmem:[#allocation3 + $0x80] sm:$0xff]  ;;  %v898_v50 = vld [vmem:[#allocation3 + $0x88] sm:$0x3] }
 0x1ed   : > { %v967_v51 = vrot.slane %v897_v48, 1  ;;  %v968_v54 = vrot.slane %v898_v50, 1  ;;  %v970_v60 = vrot.slane %v897_v48, 2  ;;  %v971_v61 = vrot.slane %v898_v50, 2 }
 0x1ee   : > { %1111 = vrot.lane.b32.xlu0 %v2240_v12, %s1574_s8 }
 0x1ef   : > { %v969_v57 = vsel %vm400_vm2, %v967_v51, %v968_v54  ;;  %v972_v0 = vsel %vm425_vm3, %v970_v60, %v971_v61 }
 0x1f1   : > { %1089 = vrot.lane.b32.xlu2 %v964_v39, %s1576_s14 }
 0x1f3   : > { %995 = vrot.lane.b32.xlu1 %v940_v46, %s2456_s20 }
 0x1f6   : > { %1153 = vrot.lane.b32.xlu0 %v955_v26, %s2455_s17 }
 0x1f8   : > { %v1086_v58 = vpop.permute.xlu2 %1085 }
 0x1f9   : > { %1043 = vrot.lane.b32.xlu2 %v897_v48, %s1573_s29 }
 0x1fb   : > { %1113 = vrot.lane.b32.xlu1 %v897_v48, %s1574_s8 }
 0x1fe   : > { %1135 = vrot.lane.b32.xlu0 %v940_v46, %s1575_s9 }
 0x200   : > { %v992_v62 = vpop.permute.xlu2 %991 }
 0x201   : > { %1035 = vrot.lane.b32.xlu2 %v2232_v29, %s1573_s29  ;;  %v1178_v3 = vsel %vm333_vm0, %v2130_v7, %v992_v62 }
 0x203   : > { %1137 = vrot.lane.b32.xlu1 %v969_v57, %s1575_s9 }
 0x206   : > { %1065 = vrot.lane.b32.xlu0 %v940_v46, %s1577_s15 }
 0x208   : > { %v1034_v6 = vpop.permute.xlu2 %1033 }
 0x209   : > { %1107 = vrot.lane.b32.xlu2 %v2130_v7, %s1574_s8 }
 0x20b   : > { %1067 = vrot.lane.b32.xlu1 %v969_v57, %s1577_s15 }
 0x20d   : > { %v1038_v63 = vpop.permute.xlu0 %1037 }
 0x20e   : > { %1019 = vrot.lane.b32.xlu0 %v964_v39, %s1572_s19  ;;  %s269_s19 = sand.u32 1, %s1560_s25  }
 0x20f   : > { %s1401_s29 = sshll.u32 %s269_s19, 6 }
 0x210   : > { %v1062_v59 = vpop.permute.xlu1 %1061  ;;  %v1152_v11 = vpop.permute.xlu2 %1151  ;;  %s2344_s8 = scalar_lea.vmem [#allocation4], %s1401_s29 }
 0x211   : > { %s1332_s16 = sshll.u32 %s2344_s8, 4  ;;  %s1333_s16 = int_to_ptr.vmem [resolvable:$true] %s1332_s16 }
 0x213   : > { %1083 = vrot.lane.b32.xlu1 %v955_v26, %s1576_s14 }
 0x215   : > { %v1056_v19 = vpop.permute.xlu0 %1055 }
 0x216   : > { %1161 = vrot.lane.b32.xlu0 %v972_v0, %s2455_s17 }
 0x218   : > { %v1016_v4 = vpop.permute.xlu1 %1015 }
 0x219   : > { %v1186_v5 = vsel %vm666_vm12, %v1178_v3, %v1016_v4 }
 0x21b   : > { %1155 = vrot.lane.b32.xlu1 %v2137_v15, %s2455_s17  ;;  %v1134_v17 = vpop.permute.xlu2 %1133  ;;  %v1198_v15 = vsel %vm684_vm14, %v2258_v34, %v1056_v19 }
 0x21c   : > { %v1206_v43 = vsel %vm693_vm15, %v1198_v15, %v1080_v47 }
 0x21d   : > { %v986_v14 = vpop.permute.xlu0 %985 }
 0x21e   : > { %1091 = vrot.lane.b32.xlu0 %v972_v0, %s1576_s14  ;;  %v1175_v42 = vsel %vm333_vm0, %v2108_v52, %v986_v14 }
 0x21f   : > { %v1183_v44 = vsel %vm666_vm12, %v1175_v42, %v2283_v55  ;;  %v1498_v55 = vld [vmem:[%s1720_s18] sm:$0xff] }
 0x220   : > { %v1104_v8 = vpop.permute.xlu1 %1103  ;;  %v1191_v46 = vsel %vm675_vm13, %v1183_v44, %v1034_v6 }
 0x221   : > { %v1214_v24 = vsel %vm702_vm1, %v1206_v43, %v1104_v8 }
 0x223   : > { %v1064_v20 = vpop.permute.xlu2 %1063 }
 0x226   : > { %1059 = vrot.lane.b32.xlu0 %v931_v31, %s1577_s15 }
 0x228   : > { %v1058_v2 = vpop.permute.xlu1 %1057 }
 0x229   : > { %v1199_v47 = vsel %vm684_vm14, %v1191_v46, %v1058_v2  ;;  %v1501_v46 = vld [vmem:[%s1720_s18 + $0x10] sm:$0xff] }
 0x22b   : > { %v1018_v27 = vpop.permute.xlu2 %1017 }
 0x22e   : > { %1131 = vrot.lane.b32.xlu0 %v2140_v16, %s1575_s9  ;;  %s1426_s9 = sshll.u32 %s1641_s28, 6  ;;  %s1320_s28 = scalar_lea.sflag [#allocation5], %s269_s19 }
 0x22f   : > { %s1331_s17 = scalar_lea.hbm %s2448_s7, %s1426_s9  ;;  %s1526_s9 = scalar_lea.hbm %s2448_s7, 128 }
 0x230   : > { %v1110_v7 = vpop.permute.xlu0 %1109  ;;  %v988_v1 = vpop.permute.xlu1 %987  ;;  %s1334_s13 = sshll.u32 %s1331_s17, 4  ;;  %s1335_s13 = int_to_ptr.hbm [resolvable:$true] %s1334_s13 }
 0x231   : > { %v1176_v33 = vsel %vm333_vm0, %v2152_v18, %v988_v1  ;;  %s1520_s21 = sshra.s32 %s1335_s13, 4  ;;  %s1521_s21 = int_to_ptr.hbm [resolvable:$true] %s1520_s21 }
 0x232   : > { %s1522_s22 = scalar_lea.hbm %s1521_s21, 64  ;;  %p1527_p0 = scmp.lt.s32.totalorder %s1521_s21, %s2448_s7 }
 0x233   : > { %v1106_v31 = vpop.permute.xlu2 %1105  ;;  %p1523_p11 = scmp.ne.s32.totalorder %s1521_s21, %s1522_s22  ;;  %p1528_p1 = scmp.lt.s32.totalorder %s1526_s9, %s1522_s22 }
 0x235   : > { %p1524_p12 = pnand %p1523_p11, %p1658_p5  ;;  %p1529_p2 = por %p1528_p1, %p1527_p0 }
 0x237   : > { %p1525_p13 = pneg %p1524_p12 }
 0x238   : > { %v1040_v22 = vpop.permute.xlu0 %1039  ;;  %v1158_v13 = vpop.permute.xlu1 %1157 }
 0x239   : > { %v1194_v60 = vsel %vm675_vm13, %v1186_v5, %v1040_v22  ;;  %p1530_p3 = pnand %p1529_p2, %p1525_p13 }
 0x23a   : > { %v1202_v61 = vsel %vm684_vm14, %v1194_v60, %v1064_v20 }
 0x23b   : > { %v1014_v35 = vpop.permute.xlu2 %1013 }
 0x240   : > { %v1128_v25 = vpop.permute.xlu0 %1127  ;;  %v1088_v16 = vpop.permute.xlu1 %1087 }
 0x241   : > { %v1222_v26 = vsel %vm711_vm4, %v1214_v24, %v1128_v25  ;;  %v1210_v62 = vsel %vm693_vm15, %v1202_v61, %v1088_v16  ;;  %v1505_v61 = vld [vmem:[%s1720_s18 + $0x18] sm:$0xff] }
 0x242   : > { %v1230_v30 = vsel %vm720_vm5, %v1222_v26, %v1152_v11 }
 0x243   : > { %1413 = vmatmul.msk.f32.gmra.mxu1 %vm738_vm6, %v1230_v30  ;;  %v1160_v4 = vpop.permute.xlu2 %1159 }
 0x248   : > { %v1082_v45 = vpop.permute.xlu0 %1081 }
 0x249   : > { %v1207_v48 = vsel %vm693_vm15, %v1199_v47, %v1082_v45 }
 0x24a   : > { %v1215_v52 = vsel %vm702_vm1, %v1207_v48, %v1106_v31 }
 0x24b   : > { %v1090_v1 = vpop.permute.xlu2 %1089 }
 0x24d   : > { %v1042_v32 = vpop.permute.xlu1 %1041 }
 0x250   : > { %v1012_v34 = vpop.permute.xlu0 %1011 }
 0x251   : > { %v2316_v21 = vsel %vm666_vm12, %v1176_v33, %v1012_v34 }
 0x253   : > { %v1044_v26 = vpop.permute.xlu2 %1043 }
 0x255   : > { %v990_v28 = vpop.permute.xlu1 %989 }
 0x256   : > { %v1177_v23 = vsel %vm333_vm0, %v2232_v29, %v990_v28 }
 0x257   : > { %v1185_v36 = vsel %vm666_vm12, %v1177_v23, %v1014_v35 }
 0x258   : > { %v1193_v38 = vsel %vm675_vm13, %v1185_v36, %v1038_v63  ;;  %v994_v39 = vpop.permute.xlu0 %993 }
 0x259   : > { %v1201_v40 = vsel %vm684_vm14, %v1193_v38, %v1062_v59  ;;  %v1179_v5 = vsel %vm333_vm0, %v2181_v10, %v994_v39 }
 0x25a   : > { %v1209_v18 = vsel %vm693_vm15, %v1201_v40, %v1086_v58  ;;  %v1187_v14 = vsel %vm666_vm12, %v1179_v5, %v1018_v27 }
 0x25b   : > { %v1217_v41 = vsel %vm702_vm1, %v1209_v18, %v1110_v7  ;;  %v1195_v2 = vsel %vm675_vm13, %v1187_v14, %v1042_v32  ;;  %v1036_v34 = vpop.permute.xlu2 %1035 }
 0x25c   : > { %v1225_v53 = vsel %vm711_vm4, %v1217_v41, %v1134_v17  ;;  %v1192_v23 = vsel %vm675_vm13, %v2316_v21, %v1036_v34  ;;  %v1499_v41 = vld [vmem:[%s1720_s18 + $0x8] sm:$0xff] }
 0x25d   : > { %v1233_v29 = vsel %vm720_vm5, %v1225_v53, %v1158_v13  ;;  %v1130_v50 = vpop.permute.xlu1 %1129 }
 0x25e   : > { %1416 = vmatmul.msk.f32.vlgmr.msra.gmra.mxu3 %vm738_vm6, %v1233_v29  ;;  %v1223_v51 = vsel %vm711_vm4, %v1215_v52, %v1130_v50  ;;  %v1500_v29 = vld [vmem:[%s1720_s18 + $0x20] sm:$0xff]  ;;  %v1502_v50 = vld [vmem:[%s1720_s18 + $0x28] sm:$0xff] }
 0x260   : > { %v1112_v9 = vpop.permute.xlu0 %1111 }
 0x261   : > { %v1218_v0 = vsel %vm702_vm1, %v1210_v62, %v1112_v9 }
 0x265   : > { %v996_v63 = vpop.permute.xlu1 %995 }
 0x266   : > { %v1180_v10 = vsel %vm333_vm0, %v2240_v12, %v996_v63 }
 0x268   : > { %v1154_v54 = vpop.permute.xlu0 %1153 }
 0x269   : > { %v1287_v57 = vpop.f32.mrf.mxu1  ;;  %v1231_v58 = vsel %vm720_vm5, %v1223_v51, %v1154_v54  ;;  %v1503_v54 = vld [vmem:[%s1720_s18 + $0x30] sm:$0xff] }
 0x26a   : > { %v1288_v59 = vadd.f32 %v1498_v55, %v1287_v57  ;;  %1414 = vmatmul.msk.f32.gmra.mxu1 %vm738_vm6, %v1231_v58  ;;  %v1504_v55 = vld [vmem:[%s1720_s18 + $0x38] sm:$0xff] }
 0x26c   : > { %1311 = vst.msk [vmem:[%s2344_s8] sm:$0xff] %vm333_vm0, %v1288_v59 }
 0x26d   : > { %v1114_v11 = vpop.permute.xlu1 %1113 }
 0x270   : > { %v1136_v3 = vpop.permute.xlu0 %1135 }
 0x271   : > { %v1226_v6 = vsel %vm711_vm4, %v1218_v0, %v1136_v3 }
 0x272   : > { %v1234_v19 = vsel %vm720_vm5, %v1226_v6, %v1160_v4 }
 0x273   : > { %1417 = vmatmul.msk.f32.gmra.mxu3 %vm738_vm6, %v1234_v19 }
 0x275   : > { %v1138_v22 = vpop.permute.xlu1 %1137 }
 0x278   : > { %v1066_v8 = vpop.permute.xlu0 %1065 }
 0x279   : > { %v1203_v17 = vsel %vm684_vm14, %v1195_v2, %v1066_v8 }
 0x27a   : > { %v1211_v20 = vsel %vm693_vm15, %v1203_v17, %v1090_v1 }
 0x27b   : > { %v1219_v13 = vsel %vm702_vm1, %v1211_v20, %v1114_v11 }
 0x27c   : > { %v1227_v43 = vsel %vm711_vm4, %v1219_v13, %v1138_v22 }
 0x27d   : > { %v1068_v27 = vpop.permute.xlu1 %1067 }
 0x280   : > { %v1020_v7 = vpop.permute.xlu0 %1019 }
 0x281   : > { %v1188_v25 = vsel %vm666_vm12, %v1180_v10, %v1020_v7 }
 0x282   : > { %v1196_v30 = vsel %vm675_vm13, %v1188_v25, %v1044_v26 }
 0x283   : > { %v1204_v45 = vsel %vm684_vm14, %v1196_v30, %v1068_v27 }
 0x285   : > { %v1084_v28 = vpop.permute.xlu1 %1083 }
 0x288   : > { %v1162_v15 = vpop.permute.xlu0 %1161 }
 0x289   : > { %v1235_v24 = vsel %vm720_vm5, %v1227_v43, %v1162_v15 }
 0x28a   : > { %1418 = vmatmul.msk.f32.gmra.mxu3 %vm738_vm6, %v1235_v24 }
 0x28d   : > { %v1156_v39 = vpop.permute.xlu1 %1155 }
 0x290   : > { %v1092_v16 = vpop.permute.xlu0 %1091 }
 0x291   : > { %v1212_v31 = vsel %vm693_vm15, %v1204_v45, %v1092_v16 }
 0x292   : > { %v1220_v32 = vsel %vm702_vm1, %v1212_v31, %v2173_v37 }
 0x293   : > { %v1228_v12 = vsel %vm711_vm4, %v1220_v32, %v2199_v49  ;;  %v1108_v49 = vpop.permute.xlu2 %1107 }
 0x294   : > { %v1236_v33 = vsel %vm720_vm5, %v1228_v12, %v2214_v56 }
 0x295   : > { %1419 = vmatmul.msk.f32.gmra.mxu3 %vm738_vm6, %v1236_v33 }
 0x298   : > { %v1060_v35 = vpop.permute.xlu0 %1059 }
 0x299   : > { %v1200_v36 = vsel %vm684_vm14, %v1192_v23, %v1060_v35 }
 0x29a   : > { %v1208_v37 = vsel %vm693_vm15, %v1200_v36, %v1084_v28 }
 0x29b   : > { %v1216_v56 = vsel %vm702_vm1, %v1208_v37, %v1108_v49 }
 0x2a0   : > { %v1132_v38 = vpop.permute.xlu0 %1131 }
 0x2a1   : > { %v1224_v40 = vsel %vm711_vm4, %v1216_v56, %v1132_v38 }
 0x2a2   : > { %v1232_v18 = vsel %vm720_vm5, %v1224_v40, %v1156_v39 }
 0x2a3   : > { %1415 = vmatmul.msk.f32.gmra.mxu1 %vm738_vm6, %v1232_v18 }
 0x2c0   : > { %v1290_v21 = vpop.f32.mrf.mxu1 }
 0x2c1   : > { %v1291_v42 = vadd.f32 %v1499_v41, %v1290_v21 }
 0x2c3   : > { %1312 = vst.msk [vmem:[%s2344_s8 + $0x8] sm:$0xff] %vm333_vm0, %v1291_v42 }
 0x2e1   : > { %v1299_v53 = vpop.f32.mrf.mxu3 }
 0x2e2   : > { %v1300_v44 = vadd.f32 %v1500_v29, %v1299_v53 }
 0x2e4   : > { %1315 = vst.msk [vmem:[%s2344_s8 + $0x20] sm:$0xff] %vm333_vm0, %v1300_v44 }
 0x2e7   : > { %v1293_v9 = vpop.f32.mrf.mxu1 }
 0x2e8   : > { %v1294_v47 = vadd.f32 %v1501_v46, %v1293_v9 }
 0x2ea   : > { %1313 = vst.msk [vmem:[%s2344_s8 + $0x10] sm:$0xff] %vm333_vm0, %v1294_v47 }
 0x2f6   : > { %v1302_v48 = vpop.f32.mrf.mxu3 }
 0x2f7   : > { %v1303_v52 = vadd.f32 %v1502_v50, %v1302_v48 }
 0x2f9   : > { %1316 = vst.msk [vmem:[%s2344_s8 + $0x28] sm:$0xff] %vm333_vm0, %v1303_v52 }
 0x30d   : > { %v1305_v51 = vpop.f32.mrf.mxu3 }
 0x30e   : > { %v1306_v57 = vadd.f32 %v1503_v54, %v1305_v51 }
 0x310   : > { %1317 = vst.msk [vmem:[%s2344_s8 + $0x30] sm:$0xff] %vm333_vm0, %v1306_v57 }
 0x318   : > { %v1308_v58 = vpop.f32.mrf.mxu3 }
 0x319   : > { %v1309_v59 = vadd.f32 %v1504_v55, %v1308_v58 }
 0x31b   : > { %1318 = vst.msk [vmem:[%s2344_s8 + $0x38] sm:$0xff] %vm333_vm0, %v1309_v59 }
 0x320   : > { %v1296_v60 = vpop.f32.mrf.mxu1 }
 0x321   : > { %v1297_v62 = vadd.f32 %v1505_v61, %v1296_v60 }
 0x323   : > { %1314 = vst.msk [vmem:[%s2344_s8 + $0x18] sm:$0xff] %vm333_vm0, %v1297_v62 }
 0x324   : > { %1533 = shalt.err (!%p1530_p3)
}
 0x325   : > { %s1579_s18 = smov 128  }
 0x326   : > { %1445 = dma.vmem_to_hbm [thread:$0]  (%p1658_p5), %s1333_s16, 1024, %s1335_s13, %s1320_s28, %s1579_s18, %s1579_s18, %s2456_s20  }
 0x327 PF: > { %p1451_p4 = scmp.ge.s32.totalorder %s1568_s27, 2  ;;  %s1349_s19 = sand.u32 1, %s1556_s24  }
 0x328   : > { %s1350_s8 = scalar_lea.sflag [#allocation5], %s1349_s19 }
 0x329   : > { %p1448_p7 = pnand %p1451_p4, %p1662_p6 }
 0x32b   : > { %p1449_p8 = pneg %p1448_p7 }
 0x32d   : > { %1551 = dma.done.wait (%p1449_p8), %s1350_s8, 1024  }
 0x32e   : > { %1553 = vsyncadd (%p1449_p8), %s1350_s8, 4294966272  ;;  %p17_p9 = scmp.ge.s32.totalorder %s1645_s30, 4   ;;  %s2457_s24 = smov %s1560_s25 }
 0x32f   : > { %s2458_s25 = smov %s1564_s26  ;;  %s2459_s26 = smov %s1656_s10 }
 0x330   : > { %s2460_s27 = smov %s1645_s30  ;;  %19 = sbr.rel (!%p17_p9) target bundleno = 3 (0x3), region = 85 }
 0x335   :  { %1356 = vsyncpa [#allocation5], 1 }
 0x336   :  { %1358 = vsyncpa [#allocation5 + $0x1], 1 }

// kernel: _lambda_.2
= control target key start
LH: loop header
LB: loop body
LE: loop exit
PB: predicated region body
PF: predicated region fallthrough
CT: control target
= control target key end

     0   :  { %s3206_s30 = smov 0   ;;  %s5589_s0 = inlined_call_operand.vmem [shape: f32[2,16,16,4], index: 0, kind: input, shape index: {}]   ;;  %s5590_s1 = inlined_call_operand.vmem [shape: f32[1,4], index: 1, kind: input, shape index: {}]   ;;  %s5591_s2 = inlined_call_operand.vmem [shape: f32[1,4], index: 2, kind: input, shape index: {}]   ;;  %s5592_s3 = inlined_call_operand.vmem [shape: f32[36,8], index: 3, kind: input, shape index: {}]   ;;  %s5593_s4 = inlined_call_operand.vmem [shape: f32[1,8], index: 4, kind: input, shape index: {}]   ;;  %s5594_s5 = inlined_call_operand.vmem [shape: f32[1,8], index: 5, kind: input, shape index: {}]   ;;  %s5595_s6 = inlined_call_operand.vmem [shape: f32[72,8], index: 6, kind: input, shape index: {}]   ;;  %s5596_s7 = inlined_call_operand.vmem [shape: f32[4,8], index: 7, kind: input, shape index: {}]   ;;  %s5597_s8 = inlined_call_operand.vmem [shape: f32[64,256], index: 8, kind: input, shape index: {}]   ;;  %s5598_s9 = inlined_call_operand.vmem [shape: f32[2,64,8], index: 9, kind: output, shape index: {}]  }
   0x1 LB: > { %s3003_s10 = sadd.s32 4294967295, %s3141_s30   ;;  %p3007_p0 = scmp.ge.s32.totalorder %s3141_s30, 1  ;;  %s3141_s30 = sphi %s3206_s30, %s19_s30  }
   0x2   : > { %p287_p1 = scmp.lt.s32.totalorder %s3141_s30, 3 }
   0x4   : > { %p288_p2 = pnand %p3007_p0, %p287_p1 }
   0x6   : > { %291 = sbr.rel (%p288_p2) target bundleno = 1570 (0x622), region = 56 }
   0xb   : > { %vm533_vm0 = vcmask 31744   ;;  %v5599_v0 = vmov 0.0   ;;  %vm724_vm1 = vcmask 1046528   ;;  %s3144_s11 = smov 4   ;;  %p323_p3 = scmp.lt.s32.totalorder %s3003_s10, 1  ;;  %vm536_vm2 = vcmask 25600  }
   0xc   : > { %534 = vst.msk [vmem:[#allocation2] sm:$0xff] %vm533_vm0, %v5599_v0  ;;  %v3305_v6 = vld [vmem:[%s5590_s1] ss:$0 sm:$0xff]  ;;  %s3145_s20 = smov 8   ;;  %s3146_s21 = smov 12  }
   0xd   : > { %535 = vst.msk [vmem:[#allocation2 + $0x8] sm:$0xff] %vm533_vm0, %v5599_v0  ;;  %s5870_s10 = smov (!%p323_p3, %s3003_s10), 1  ;;  %v3321_v10 = vld [vmem:[%s5591_s2] ss:$0 sm:$0xff]  ;;  %s3147_s22 = smov 20  }
   0xe   : > { %538 = vst.msk [vmem:[#allocation2 + $0x18] sm:$0xff] %vm533_vm0, %v5599_v0  ;;  %s3064_s12 = sshll.u32 %s5870_s10, 8  ;;  %s3148_s23 = smov 16  }
   0xf   : > { %539 = vst.msk [vmem:[#allocation2 + $0x20] sm:$0xff] %vm533_vm0, %v5599_v0  ;;  %s3296_s15 = scalar_lea.vmem %s5589_s0, %s3064_s12  ;;  %s3149_s24 = smov 32  }
  0x10   : > { %541 = vst.msk [vmem:[#allocation2 + $0x30] sm:$0xff] %vm533_vm0, %v5599_v0  ;;  %v335_v7 = vld [vmem:[%s3296_s15 + $0x10] sm:$0xff]  ;;  %v336_v8 = vld [vmem:[%s3296_s15 + $0x18] sm:$0xff]  ;;  %v333_v11 = vld [vmem:[%s3296_s15] sm:$0xff]  ;;  %s3150_s25 = smov 28   ;;  %s3151_s26 = smov 24  }
  0x11   : > { %542 = vst.msk [vmem:[#allocation2 + $0x38] sm:$0xff] %vm533_vm0, %v5599_v0  ;;  %v371_v9 = vmul.f32 %v3305_v6, %v335_v7  ;;  %v334_v12 = vld [vmem:[%s3296_s15 + $0x8] sm:$0xff]  ;;  %v372_v13 = vmul.f32 %v3305_v6, %v336_v8  ;;  %v337_v14 = vld [vmem:[%s3296_s15 + $0x20] sm:$0xff]  ;;  %v369_v15 = vmul.f32 %v3305_v6, %v333_v11  ;;  %v339_v21 = vld [vmem:[%s3296_s15 + $0x30] sm:$0xff]  ;;  %s3152_s13 = smov 40   ;;  %s3153_s14 = smov 48  }
  0x12   : > { %544 = vst.msk [vmem:[#allocation2 + $0x48] sm:$0xff] %vm533_vm0, %v5599_v0  ;;  %v370_v17 = vmul.f32 %v3305_v6, %v334_v12  ;;  %v338_v18 = vld [vmem:[%s3296_s15 + $0x28] sm:$0xff]  ;;  %v373_v19 = vmul.f32 %v3305_v6, %v337_v14  ;;  %v340_v25 = vld [vmem:[%s3296_s15 + $0x38] sm:$0xff]  ;;  %v343_v29 = vld [vmem:[%s3296_s15 + $0x50] sm:$0xff]  ;;  %v375_v31 = vmul.f32 %v3305_v6, %v339_v21  ;;  %s3154_s16 = smov 64   ;;  %s3155_s17 = smov 56  }
  0x13   : > { %v3228_v1 = vld [vmem:[#allocation2] sm:$0xff]  ;;  %545 = vst.msk [vmem:[#allocation2 + $0x50] sm:$0xff] %vm533_vm0, %v5599_v0  ;;  %v407_v16 = vadd.f32 %v3321_v10, %v371_v9  ;;  %v408_v20 = vadd.f32 %v3321_v10, %v372_v13  ;;  %v405_v23 = vadd.f32 %v3321_v10, %v369_v15  ;;  %v374_v24 = vmul.f32 %v3305_v6, %v338_v18  ;;  %v344_v32 = vld [vmem:[%s3296_s15 + $0x58] sm:$0xff]  ;;  %v342_v40 = vld [vmem:[%s3296_s15 + $0x48] sm:$0xff] }
  0x14   : > { %v3232_v2 = vld [vmem:[#allocation2 + $0x8] sm:$0xff]  ;;  %v725_v3 = vrot.slane %v3228_v1, 1  ;;  %547 = vst.msk [vmem:[#allocation2 + $0x60] sm:$0xff] %vm533_vm0, %v5599_v0  ;;  %v406_v28 = vadd.f32 %v3321_v10, %v370_v17  ;;  %v409_v30 = vadd.f32 %v3321_v10, %v373_v19  ;;  %v376_v35 = vmul.f32 %v3305_v6, %v340_v25  ;;  %v341_v36 = vld [vmem:[%s3296_s15 + $0x40] sm:$0xff] }
  0x15   : > { %v726_v4 = vrot.slane %v3232_v2, 1  ;;  %548 = vst.msk [vmem:[#allocation2 + $0x68] sm:$0xff] %vm533_vm0, %v5599_v0  ;;  %v471_v27 = vmul.f32 0.1, %v407_v16  ;;  %vm439_vm3 = vcmp.gt.f32.partialorder %v407_v16, 0.0  ;;  %vm440_vm4 = vcmp.gt.f32.partialorder %v408_v20, 0.0 }
  0x16   : > { %550 = vst.msk [vmem:[#allocation2 + $0x78] sm:$0xff] %vm533_vm0, %v5599_v0  ;;  %v472_v34 = vmul.f32 0.1, %v408_v20  ;;  %v469_v37 = vmul.f32 0.1, %v405_v23  ;;  %v410_v38 = vadd.f32 %v3321_v10, %v374_v24  ;;  %v379_v39 = vmul.f32 %v3305_v6, %v343_v29  ;;  %v345_v44 = vld [vmem:[%s3296_s15 + $0x60] sm:$0xff] }
  0x17   : > { %v727_v5 = vsel %vm724_vm1, %v725_v3, %v726_v4  ;;  %551 = vst.msk [vmem:[#allocation2 + $0x80] sm:$0xff] %vm533_vm0, %v5599_v0  ;;  %v3379_v41 = vsel %vm439_vm3, %v407_v16, %v471_v27  ;;  %vm437_vm5 = vcmp.gt.f32.partialorder %v405_v23, 0.0  ;;  %v470_v42 = vmul.f32 0.1, %v406_v28  ;;  %v346_v48 = vld [vmem:[%s3296_s15 + $0x68] sm:$0xff]  ;;  %v349_v59 = vld [vmem:[%s3296_s15 + $0x80] sm:$0xff] }
  0x18   : > { %912 = vrot.lane.b32.xlu0 %v727_v5, %s3144_s11  ;;  %553 = vst.msk [vmem:[#allocation2 + $0x90] sm:$0xff] %vm533_vm0, %v5599_v0  ;;  %v380_v43 = vmul.f32 %v3305_v6, %v344_v32  ;;  %vm438_vm6 = vcmp.gt.f32.partialorder %v406_v28, 0.0  ;;  %v473_v45 = vmul.f32 0.1, %v409_v30  ;;  %v411_v46 = vadd.f32 %v3321_v10, %v375_v31  ;;  %v350_v60 = vld [vmem:[%s3296_s15 + $0x88] sm:$0xff]  ;;  %v348_v24 = vld [vmem:[%s3296_s15 + $0x78] sm:$0xff] }
  0x19   : > { %554 = vst.msk [vmem:[#allocation2 + $0x98] sm:$0xff] %vm533_vm0, %v5599_v0  ;;  %v377_v47 = vmul.f32 %v3305_v6, %v341_v36  ;;  %v3391_v49 = vsel %vm440_vm4, %v408_v20, %v472_v34  ;;  %vm441_vm7 = vcmp.gt.f32.partialorder %v409_v30, 0.0  ;;  %v412_v50 = vadd.f32 %v3321_v10, %v376_v35  ;;  %v347_v20 = vld [vmem:[%s3296_s15 + $0x70] sm:$0xff] }
  0x1a   : > { %556 = vst.msk [vmem:[#allocation2 + $0xa8] sm:$0xff] %vm533_vm0, %v5599_v0  ;;  %v378_v51 = vmul.f32 %v3305_v6, %v342_v40  ;;  %v3398_v52 = vsel %vm437_vm5, %v405_v23, %v469_v37  ;;  %v474_v53 = vmul.f32 0.1, %v410_v38  ;;  %v415_v54 = vadd.f32 %v3321_v10, %v379_v39  ;;  %v351_v36 = vld [vmem:[%s3296_s15 + $0x90] sm:$0xff] }
  0x1b   : > { %557 = vst.msk [vmem:[#allocation2 + $0xb0] sm:$0xff] %vm533_vm0, %v5599_v0  ;;  %v381_v55 = vmul.f32 %v3305_v6, %v345_v44  ;;  %v3405_v56 = vsel %vm438_vm6, %v406_v28, %v470_v42  ;;  %vm442_vm8 = vcmp.gt.f32.partialorder %v410_v38, 0.0  ;;  %v416_v57 = vadd.f32 %v3321_v10, %v380_v43 }
  0x1c   : > { %559 = vst.msk [vmem:[#allocation2 + $0xc0] sm:$0xff] %vm533_vm0, %v5599_v0  ;;  %v382_v58 = vmul.f32 %v3305_v6, %v346_v48  ;;  %v3414_v61 = vsel %vm441_vm7, %v409_v30, %v473_v45  ;;  %v475_v62 = vmul.f32 0.1, %v411_v46  ;;  %v413_v63 = vadd.f32 %v3321_v10, %v377_v47 }
  0x1d   : > { %560 = vst.msk [vmem:[#allocation2 + $0xc8] sm:$0xff] %vm533_vm0, %v5599_v0  ;;  %v385_v3 = vmul.f32 %v3305_v6, %v349_v59  ;;  %vm443_vm9 = vcmp.gt.f32.partialorder %v411_v46, 0.0  ;;  %v414_v5 = vadd.f32 %v3321_v10, %v378_v51  ;;  %v386_v7 = vmul.f32 %v3305_v6, %v350_v60 }
  0x1e   : > { %562 = vst.msk [vmem:[#allocation2 + $0xd8] sm:$0xff] %vm533_vm0, %v5599_v0  ;;  %v3425_v8 = vsel %vm442_vm8, %v410_v38, %v474_v53  ;;  %vm444_vm10 = vcmp.gt.f32.partialorder %v412_v50, 0.0  ;;  %v479_v9 = vmul.f32 0.1, %v415_v54  ;;  %v417_v11 = vadd.f32 %v3321_v10, %v381_v55 }
  0x1f   : > { %563 = vst.msk [vmem:[#allocation2 + $0xe0] sm:$0xff] %vm533_vm0, %v5599_v0  ;;  %vm447_vm11 = vcmp.gt.f32.partialorder %v415_v54, 0.0  ;;  %v480_v12 = vmul.f32 0.1, %v416_v57  ;;  %v418_v13 = vadd.f32 %v3321_v10, %v382_v58  ;;  %v421_v14 = vadd.f32 %v3321_v10, %v385_v3 }
  0x20   : > { %565 = vst.msk [vmem:[#allocation2 + $0xf0] sm:$0xff] %vm533_vm0, %v5599_v0  ;;  %v3434_v15 = vsel %vm443_vm9, %v411_v46, %v475_v62  ;;  %vm448_vm12 = vcmp.gt.f32.partialorder %v416_v57, 0.0  ;;  %v477_v16 = vmul.f32 0.1, %v413_v63  ;;  %vm445_vm13 = vcmp.gt.f32.partialorder %v413_v63, 0.0  ;;  %v352_v46 = vld [vmem:[%s3296_s15 + $0x98] sm:$0xff] }
  0x21   : > { %566 = vst.msk [vmem:[#allocation2 + $0xf8] sm:$0xff] %vm533_vm0, %v5599_v0  ;;  %v478_v18 = vmul.f32 0.1, %v414_v5  ;;  %v422_v19 = vadd.f32 %v3321_v10, %v386_v7  ;;  %v3444_v21 = vsel %vm447_vm11, %v415_v54, %v479_v9  ;;  %vm446_vm14 = vcmp.gt.f32.partialorder %v414_v5, 0.0 }
  0x22   : > { %568 = vst.msk [vmem:[#allocation2 + $0x108] sm:$0xff] %vm533_vm0, %v5599_v0  ;;  %v481_v23 = vmul.f32 0.1, %v417_v11  ;;  %v3449_v25 = vsel %vm448_vm12, %v416_v57, %v480_v12  ;;  %vm449_vm15 = vcmp.gt.f32.partialorder %v417_v11, 0.0  ;;  %v485_v27 = vmul.f32 0.1, %v421_v14 }
  0x23   : > { %569 = vst.msk [vmem:[#allocation2 + $0x110] sm:$0xff] %vm533_vm0, %v5599_v0  ;;  %v3456_v29 = vsel %vm445_vm13, %v413_v63, %v477_v16  ;;  %vm453_vm3 = vcmp.gt.f32.partialorder %v421_v14, 0.0  ;;  %v383_v30 = vmul.f32 %v3305_v6, %v347_v20  ;;  %v486_v34 = vmul.f32 0.1, %v422_v19  ;;  %v355_v12 = vld [vmem:[%s3296_s15 + $0xb0] sm:$0xff] }
  0x24   : > { %571 = vst.msk [vmem:[#allocation2 + $0x120] sm:$0xff] %vm533_vm0, %v5599_v0  ;;  %v384_v35 = vmul.f32 %v3305_v6, %v348_v24  ;;  %v3475_v39 = vsel %vm449_vm15, %v417_v11, %v481_v23  ;;  %vm454_vm4 = vcmp.gt.f32.partialorder %v422_v19, 0.0  ;;  %v3488_v45 = vsel %vm453_vm3, %v421_v14, %v485_v27 }
  0x25   : > { %572 = vst.msk [vmem:[#allocation2 + $0x128] sm:$0xff] %vm533_vm0, %v5599_v0  ;;  %v419_v51 = vadd.f32 %v3321_v10, %v383_v30  ;;  %v387_v53 = vmul.f32 %v3305_v6, %v351_v36  ;;  %v3511_v58 = vsel %vm454_vm4, %v422_v19, %v486_v34  ;;  %v388_v3 = vmul.f32 %v3305_v6, %v352_v46 }
  0x26   : > { %574 = vst.msk [vmem:[#allocation2 + $0x138] sm:$0xff] %vm533_vm0, %v5599_v0  ;;  %v420_v59 = vadd.f32 %v3321_v10, %v384_v35 }
  0x27   : > { %575 = vst.msk [vmem:[#allocation2 + $0x140] sm:$0xff] %vm533_vm0, %v5599_v0  ;;  %vm451_vm5 = vcmp.gt.f32.partialorder %v419_v51, 0.0  ;;  %v423_v11 = vadd.f32 %v3321_v10, %v387_v53  ;;  %v483_v16 = vmul.f32 0.1, %v419_v51  ;;  %v353_v53 = vld [vmem:[%s3296_s15 + $0xa0] sm:$0xff] }
  0x28   : > { %577 = vst.msk [vmem:[#allocation2 + $0x150] sm:$0xff] %vm533_vm0, %v5599_v0  ;;  %vm452_vm6 = vcmp.gt.f32.partialorder %v420_v59, 0.0  ;;  %v484_v27 = vmul.f32 0.1, %v420_v59 }
  0x29   : > { %578 = vst.msk [vmem:[#allocation2 + $0x158] sm:$0xff] %vm533_vm0, %v5599_v0  ;;  %v515_v30 = vsel %vm451_vm5, %v419_v51, %v483_v16  ;;  %vm455_vm7 = vcmp.gt.f32.partialorder %v423_v11, 0.0  ;;  %v487_v46 = vmul.f32 0.1, %v423_v11  ;;  %vm805_vm5 = vcmask 1045504  }
  0x2a   : > { %580 = vst.msk [vmem:[#allocation2 + $0x168] sm:$0xff] %vm533_vm0, %v5599_v0 }
  0x2b   : > { %581 = vst.msk [vmem:[#allocation2 + $0x170] sm:$0xff] %vm533_vm0, %v5599_v0 }
  0x2c   : > { %583 = vst.msk [vmem:[#allocation2 + $0x180] sm:$0xff] %vm533_vm0, %v5599_v0 }
  0x2d   : > { %584 = vst.msk [vmem:[#allocation2 + $0x188] sm:$0xff] %vm533_vm0, %v5599_v0 }
  0x2e   : > { %586 = vst.msk [vmem:[#allocation2 + $0x198] sm:$0xff] %vm533_vm0, %v5599_v0 }
  0x2f   : > { %587 = vst.msk [vmem:[#allocation2 + $0x1a0] sm:$0xff] %vm533_vm0, %v5599_v0 }
  0x30   : > { %537 = vst.msk [vmem:[#allocation2 + $0x10] sm:$0x3] %vm536_vm2, %v5599_v0 }
  0x31   : > { %540 = vst.msk [vmem:[#allocation2 + $0x28] sm:$0x3] %vm536_vm2, %v5599_v0 }
  0x32   : > { %543 = vst.msk [vmem:[#allocation2 + $0x40] sm:$0x3] %vm536_vm2, %v5599_v0 }
  0x33   : > { %546 = vst.msk [vmem:[#allocation2 + $0x58] sm:$0x3] %vm536_vm2, %v5599_v0 }
  0x34   : > { %549 = vst.msk [vmem:[#allocation2 + $0x70] sm:$0x3] %vm536_vm2, %v5599_v0 }
  0x35   : > { %552 = vst.msk [vmem:[#allocation2 + $0x88] sm:$0x3] %vm536_vm2, %v5599_v0 }
  0x36   : > { %555 = vst.msk [vmem:[#allocation2 + $0xa0] sm:$0x3] %vm536_vm2, %v5599_v0 }
  0x37   : > { %v3346_v22 = vld [vmem:[#allocation2 + $0x10] sm:$0x3]  ;;  %558 = vst.msk [vmem:[#allocation2 + $0xb8] sm:$0x3] %vm536_vm2, %v5599_v0 }
  0x38   : > { %v728_v26 = vrot.slane %v3346_v22, 1  ;;  %561 = vst.msk [vmem:[#allocation2 + $0xd0] sm:$0x3] %vm536_vm2, %v5599_v0 }
  0x39   : > { %564 = vst.msk [vmem:[#allocation2 + $0xe8] sm:$0x3] %vm536_vm2, %v5599_v0 }
  0x3a   : > { %v729_v33 = vsel %vm724_vm1, %v726_v4, %v728_v26  ;;  %567 = vst.msk [vmem:[#allocation2 + $0x100] sm:$0x3] %vm536_vm2, %v5599_v0  ;;  %v476_v4 = vmul.f32 0.1, %v412_v50  ;;  %v482_v26 = vmul.f32 0.1, %v418_v13 }
  0x3b   : > { %914 = vrot.lane.b32.xlu0 %v729_v33, %s3144_s11  ;;  %570 = vst.msk [vmem:[#allocation2 + $0x118] sm:$0x3] %vm536_vm2, %v5599_v0  ;;  %v3465_v33 = vsel %vm446_vm14, %v414_v5, %v478_v18  ;;  %v391_v18 = vmul.f32 %v3305_v6, %v355_v12  ;;  %v357_v12 = vld [vmem:[%s3296_s15 + $0xc0] sm:$0xff] }
  0x3c   : > { %573 = vst.msk [vmem:[#allocation2 + $0x130] sm:$0x3] %vm536_vm2, %v5599_v0  ;;  %v3438_v17 = vsel %vm444_vm10, %v412_v50, %v476_v4 }
  0x3d   : > { %576 = vst.msk [vmem:[#allocation2 + $0x148] sm:$0x3] %vm536_vm2, %v5599_v0  ;;  %v427_v36 = vadd.f32 %v3321_v10, %v391_v18 }
  0x3e   : > { %579 = vst.msk [vmem:[#allocation2 + $0x160] sm:$0x3] %vm536_vm2, %v5599_v0 }
  0x3f   : > { %582 = vst.msk [vmem:[#allocation2 + $0x178] sm:$0x3] %vm536_vm2, %v5599_v0  ;;  %vm459_vm9 = vcmp.gt.f32.partialorder %v427_v36, 0.0 }
  0x40   : > { %585 = vst.msk [vmem:[#allocation2 + $0x190] sm:$0x3] %vm536_vm2, %v5599_v0 }
  0x41   : > { %588 = vst.msk [vmem:[#allocation2 + $0x1a8] sm:$0x3] %vm536_vm2, %v5599_v0  ;;  %vm450_vm2 = vcmp.gt.f32.partialorder %v418_v13, 0.0 }
  0x42   : > { %592 = vst.msk [vmem:[#allocation2 + $0x31] sm:$0xff] %vm533_vm0, %v3379_v41  ;;  %v3485_v44 = vsel %vm450_vm2, %v418_v13, %v482_v26  ;;  %v356_v13 = vld [vmem:[%s3296_s15 + $0xb8] sm:$0xff]  ;;  %v424_v26 = vadd.f32 %v3321_v10, %v388_v3  ;;  %v3578_v3 = vsel %vm455_vm7, %v423_v11, %v487_v46  ;;  %vm2045_vm7 = vcmask 1043456  }
  0x43   : > { %593 = vst.msk [vmem:[#allocation2 + $0x39] sm:$0xff] %vm533_vm0, %v3391_v49  ;;  %v392_v19 = vmul.f32 %v3305_v6, %v356_v13 }
  0x44   : > { %590 = vst.msk [vmem:[#allocation2 + $0x19] sm:$0xff] %vm533_vm0, %v3398_v52  ;;  %vm456_vm8 = vcmp.gt.f32.partialorder %v424_v26, 0.0 }
  0x45   : > { %591 = vst.msk [vmem:[#allocation2 + $0x21] sm:$0xff] %vm533_vm0, %v3405_v56 }
  0x46   : > { %594 = vst.msk [vmem:[#allocation2 + $0x49] sm:$0xff] %vm533_vm0, %v3414_v61 }
  0x47   : > { %595 = vst.msk [vmem:[#allocation2 + $0x51] sm:$0xff] %vm533_vm0, %v3425_v8 }
  0x48   : > { %596 = vst.msk [vmem:[#allocation2 + $0x61] sm:$0xff] %vm533_vm0, %v3434_v15 }
  0x49   : > { %v3451_v28 = vld [vmem:[#allocation2 + $0x30] sm:$0xff]  ;;  %597 = vst.msk [vmem:[#allocation2 + $0x69] sm:$0xff] %vm533_vm0, %v3438_v17 }
  0x4a   : > { %v3459_v31 = vld [vmem:[#allocation2 + $0x38] sm:$0xff]  ;;  %v735_v32 = vrot.slane %v3451_v28, 1  ;;  %600 = vst.msk [vmem:[#allocation2 + $0x91] sm:$0xff] %vm533_vm0, %v3444_v21  ;;  %v3480_v43 = vld [vmem:[#allocation2 + $0x40] sm:$0x3] }
  0x4b   : > { %v736_v37 = vrot.slane %v3459_v31, 1  ;;  %v3470_v38 = vld [vmem:[#allocation2 + $0x18] sm:$0xff]  ;;  %601 = vst.msk [vmem:[#allocation2 + $0x99] sm:$0xff] %vm533_vm0, %v3449_v25  ;;  %v738_v63 = vrot.slane %v3480_v43, 1 }
  0x4c   : > { %v3477_v40 = vld [vmem:[#allocation2 + $0x20] sm:$0xff]  ;;  %v730_v42 = vrot.slane %v3470_v38, 1  ;;  %598 = vst.msk [vmem:[#allocation2 + $0x79] sm:$0xff] %vm533_vm0, %v3456_v29  ;;  %v3506_v57 = vld [vmem:[#allocation2 + $0x28] sm:$0x3] }
  0x4d   : > { %5681 = vst [vmem:[#allocation4_spill] sm:$0xff] %v3488_v45  ;;  %v3492_v47 = vsel %vm724_vm1, %v735_v32, %v736_v37  ;;  %v731_v48 = vrot.slane %v3477_v40, 1  ;;  %v3495_v50 = vld [vmem:[#allocation2 + $0x48] sm:$0xff]  ;;  %v733_v9 = vrot.slane %v3506_v57, 1  ;;  %v3548_v20 = vsel %vm724_vm1, %v736_v37, %v738_v63 }
  0x4e   : > { %599 = vst.msk [vmem:[#allocation2 + $0x81] sm:$0xff] %vm533_vm0, %v3465_v33  ;;  %920 = vrot.lane.b32.xlu2 %v3492_v47, %s3144_s11  ;;  %v3503_v54 = vld [vmem:[#allocation2 + $0x50] sm:$0xff]  ;;  %v740_v55 = vrot.slane %v3495_v50, 1  ;;  %v3557_v35 = vld [vmem:[#allocation2 + $0x58] sm:$0x3] }
  0x4f   : > { %602 = vst.msk [vmem:[#allocation2 + $0xa9] sm:$0xff] %vm533_vm0, %v3475_v39  ;;  %v3515_v60 = vsel %vm724_vm1, %v730_v42, %v731_v48  ;;  %v741_v62 = vrot.slane %v3503_v54, 1  ;;  %v3543_v14 = vld [vmem:[#allocation2 + $0x60] sm:$0xff]  ;;  %v3554_v32 = vsel %vm724_vm1, %v731_v48, %v733_v9  ;;  %v516_v42 = vsel %vm452_vm6, %v420_v59, %v484_v27  ;;  %v354_v9 = vld [vmem:[%s3296_s15 + $0xa8] sm:$0xff] }
  0x50   : > { %5682 = vst [vmem:[#allocation5_spill] sm:$0xff] %v3511_v58  ;;  %916 = vrot.lane.b32.xlu1 %v3515_v60, %s3144_s11  ;;  %v3524_v4 = vld [vmem:[#allocation2 + $0x68] sm:$0xff]  ;;  %v3526_v5 = vld [vmem:[#allocation2 + $0x70] sm:$0x3]  ;;  %v745_v34 = vrot.slane %v3543_v14, 1  ;;  %v428_v48 = vadd.f32 %v3321_v10, %v392_v19  ;;  %2723 = vmatpush.msra.mxu3 %v516_v42  ;;  %v390_v46 = vmul.f32 %v3305_v6, %v354_v9  ;;  %vm1712_vm6 = vcmask 64512  }
  0x51   : > { %603 = vst.msk [vmem:[#allocation2 + $0xb1] sm:$0xff] %vm533_vm0, %v3485_v44  ;;  %v3533_v7 = vsel %vm724_vm1, %v740_v55, %v741_v62  ;;  %v746_v23 = vrot.slane %v3524_v4, 1  ;;  %v748_v24 = vrot.slane %v3526_v5, 1  ;;  %v3563_v37 = vld [vmem:[#allocation2 + $0x90] sm:$0xff]  ;;  %v743_v55 = vrot.slane %v3557_v35, 1  ;;  %v358_v19 = vld [vmem:[%s3296_s15 + $0xc8] sm:$0xff] }
  0x52   : > { %606 = vst.msk [vmem:[#allocation2 + $0xd9] sm:$0xff] %vm533_vm0, %v3488_v45  ;;  %924 = vrot.lane.b32.xlu0 %v3533_v7, %s3144_s11  ;;  %v3575_v63 = vld [vmem:[#allocation2 + $0x98] sm:$0xff]  ;;  %v488_v59 = vmul.f32 0.1, %v424_v26  ;;  %v755_v16 = vrot.slane %v3563_v37, 1  ;;  %vm460_vm10 = vcmp.gt.f32.partialorder %v428_v48, 0.0  ;;  %2724 = vmatpush.msra.mxu3 %v515_v30  ;;  %v394_v0 = vmul.f32 %v3305_v6, %v358_v19 }
  0x53   : > { %607 = vst.msk [vmem:[#allocation2 + $0xe1] sm:$0xff] %vm533_vm0, %v3511_v58  ;;  %v3568_v51 = vsel %vm724_vm1, %v746_v23, %v748_v24  ;;  %v3583_v13 = vsel %vm724_vm1, %v745_v34, %v746_v23  ;;  %v491_v23 = vmul.f32 0.1, %v427_v36  ;;  %v492_v27 = vmul.f32 0.1, %v428_v48 }
  0x54   : > { %604 = vst.msk [vmem:[#allocation2 + $0xc1] sm:$0xff] %vm533_vm0, %v515_v30  ;;  %v3596_v24 = vsel %vm456_vm8, %v424_v26, %v488_v59  ;;  %v389_v34 = vmul.f32 %v3305_v6, %v353_v53  ;;  %v393_v30 = vmul.f32 %v3305_v6, %v357_v12  ;;  %v3608_v26 = vsel %vm724_vm1, %v741_v62, %v743_v55 }
  0x55   : > { %5683 = vst [vmem:[#allocation6_spill] sm:$0xff] %v3563_v37  ;;  %v3586_v18 = vld [vmem:[#allocation2 + $0x80] sm:$0xff]  ;;  %v3593_v11 = vld [vmem:[#allocation2 + $0x88] sm:$0x3]  ;;  %v3611_v59 = vsel %vm459_vm9, %v427_v36, %v491_v23  ;;  %v3614_v53 = vsel %vm460_vm10, %v428_v48, %v492_v27  ;;  %2725 = vmatpush.msra.mxu3 %v3485_v44  ;;  %v426_v62 = vadd.f32 %v3321_v10, %v390_v46  ;;  %v3626_v36 = vld [vmem:[#allocation2 + $0x78] sm:$0xff]  ;;  %v5691_v48 = vrot.slane %v3575_v63, 1 }
  0x56   : > { %922 = vrot.lane.b32.xlu2 %v3548_v20, %s3144_s11  ;;  %5684 = vst [vmem:[#allocation7_spill] sm:$0xff] %v3568_v51  ;;  %v751_v9 = vrot.slane %v3586_v18, 1  ;;  %v753_v12 = vrot.slane %v3593_v11, 1  ;;  %v429_v55 = vadd.f32 %v3321_v10, %v393_v30  ;;  %v430_v44 = vadd.f32 %v3321_v10, %v394_v0  ;;  %v362_v30 = vld [vmem:[%s3296_s15 + $0xe8] sm:$0xff] }
  0x57   : > { %605 = vst.msk [vmem:[#allocation2 + $0xc9] sm:$0xff] %vm533_vm0, %v516_v42  ;;  %v425_v42 = vadd.f32 %v3321_v10, %v389_v34  ;;  %2726 = vmatpush.msra.mxu3 %v3475_v39  ;;  %v3635_v19 = vsel %vm724_vm1, %v755_v16, %v5691_v48  ;;  %vm458_vm12 = vcmp.gt.f32.partialorder %v426_v62, 0.0  ;;  %v490_v46 = vmul.f32 0.1, %v426_v62  ;;  %v361_v16 = vld [vmem:[%s3296_s15 + $0xe0] sm:$0xff] }
  0x58   : > { %918 = vrot.lane.b32.xlu1 %v3554_v32, %s3144_s11  ;;  %5685 = vst [vmem:[#allocation8_spill] sm:$0xff] %v3575_v63  ;;  %v3637_v23 = vld [vmem:[#allocation2 + $0xb0] sm:$0xff]  ;;  %v3641_v27 = vld [vmem:[#allocation2 + $0xb8] sm:$0x3]  ;;  %v3645_v0 = vsel %vm724_vm1, %v751_v9, %v753_v12  ;;  %v750_v39 = vrot.slane %v3626_v36, 1  ;;  %vm461_vm13 = vcmp.gt.f32.partialorder %v429_v55, 0.0 }
  0x59   : > { %5686 = vst [vmem:[#allocation9_spill] sm:$0xff] %v3578_v3  ;;  %vm457_vm11 = vcmp.gt.f32.partialorder %v425_v42, 0.0  ;;  %v489_v34 = vmul.f32 0.1, %v425_v42  ;;  %2727 = vmatpush.msra.mxu3 %v3449_v25  ;;  %vm462_vm14 = vcmp.gt.f32.partialorder %v430_v44, 0.0  ;;  %v3654_v45 = vsel %vm458_vm12, %v426_v62, %v490_v46 }
  0x5a   : > { %5687 = vst [vmem:[#allocation10_spill] sm:$0xff] %v3583_v13  ;;  %930 = vrot.lane.b32.xlu0 %v3568_v51, %s3144_s11  ;;  %v493_v58 = vmul.f32 0.1, %v429_v55  ;;  %v761_v25 = vrot.slane %v3637_v23, 1  ;;  %v763_v12 = vrot.slane %v3641_v27, 1  ;;  %v3673_v46 = vsel %vm724_vm1, %v750_v39, %v751_v9 }
  0x5b   : > { %608 = vst.msk [vmem:[#allocation2 + $0xf1] sm:$0xff] %vm533_vm0, %v3578_v3  ;;  %v3652_v48 = vsel %vm457_vm11, %v425_v42, %v489_v34  ;;  %v397_v3 = vmul.f32 %v3305_v6, %v361_v16  ;;  %2728 = vmatpush.msra.mxu3 %v3444_v21  ;;  %v398_v42 = vmul.f32 %v3305_v6, %v362_v30  ;;  %v3663_v34 = vld [vmem:[#allocation2 + $0xa8] sm:$0xff]  ;;  %v3675_v16 = vld [vmem:[#allocation2 + $0xa0] sm:$0x3]  ;;  %v359_v30 = vld [vmem:[%s3296_s15 + $0xd0] sm:$0xff]  ;;  %vm1745_vm8 = vcmask 97280  }
  0x5c   : > { %5688 = vst [vmem:[#allocation11_spill] sm:$0xff] %v3596_v24  ;;  %v3668_v62 = vsel %vm461_vm13, %v429_v55, %v493_v58  ;;  %v3686_v58 = vld [vmem:[#allocation2 + $0xd8] sm:$0xff]  ;;  %v760_v9 = vrot.slane %v3663_v34, 1  ;;  %v3696_v55 = vld [vmem:[#allocation2 + $0xe0] sm:$0xff]  ;;  %vm1778_vm9 = vcmask 130048   ;;  %vm1811_vm10 = vcmask 162816  }
  0x5d   : > { %609 = vst.msk [vmem:[#allocation2 + $0xf9] sm:$0xff] %vm533_vm0, %v3596_v24  ;;  %v494_v24 = vmul.f32 0.1, %v430_v44  ;;  %v433_v21 = vadd.f32 %v3321_v10, %v397_v3  ;;  %2729 = vmatpush.msra.mxu3 %v3465_v33  ;;  %v434_v33 = vadd.f32 %v3321_v10, %v398_v42  ;;  %vm1844_vm11 = vcmask 195584  }
  0x5e   : > { %5689 = vst [vmem:[#allocation12_spill] sm:$0xff] %v3611_v59  ;;  %928 = vrot.lane.b32.xlu2 %v3583_v13, %s3144_s11  ;;  %vm1877_vm12 = vcmask 228352   ;;  %vm1910_vm13 = vcmask 261120  }
  0x5f   : > { %5690 = vst [vmem:[#allocation13_spill] sm:$0xff] %v3614_v53  ;;  %vm465_vm15 = vcmp.gt.f32.partialorder %v433_v21, 0.0  ;;  %v497_v3 = vmul.f32 0.1, %v433_v21  ;;  %2730 = vmatpush.msra.mxu3 %v3456_v29  ;;  %vm466_vm2 = vcmp.gt.f32.partialorder %v434_v33, 0.0  ;;  %v758_v29 = vrot.slane %v3675_v16, 1 }
  0x60   : > { %612 = vst.msk [vmem:[#allocation2 + $0x121] sm:$0xff] %vm533_vm0, %v3611_v59  ;;  %926 = vrot.lane.b32.xlu1 %v3608_v26, %s3144_s11  ;;  %v498_v42 = vmul.f32 0.1, %v434_v33 }
  0x61   : > { %613 = vst.msk [vmem:[#allocation2 + $0x129] sm:$0xff] %vm533_vm0, %v3614_v53  ;;  %v3702_v59 = vsel %vm465_vm15, %v433_v21, %v497_v3  ;;  %2731 = vmatpush.msra.mxu3 %v3438_v17  ;;  %v3718_v17 = vsel %vm724_vm1, %v760_v9, %v761_v25  ;;  %v3722_v3 = vld [vmem:[#allocation2 + $0xc8] sm:$0xff]  ;;  %v3724_v53 = vld [vmem:[#allocation2 + $0xd0] sm:$0x3] }
  0x62   : > { %5692 = vst [vmem:[#allocation14_spill] sm:$0xff] %v3635_v19  ;;  %936 = vrot.lane.b32.xlu0 %v3635_v19, %s3144_s11 }
  0x63   : > { %5693 = vst [vmem:[#allocation15_spill] sm:$0xff] %v3645_v0  ;;  %2732 = vmatpush.msra.mxu3 %v3434_v15  ;;  %v3737_v15 = vld [vmem:[#allocation2 + $0xc0] sm:$0xff] }
  0x64   : > { %5694 = vst [vmem:[#allocation16_spill] sm:$0xff] %v3652_v48 }
  0x65   : > { %5695 = vst [vmem:[#allocation17_spill] sm:$0xff] %v3654_v45  ;;  %2733 = vmatpush.msra.mxu3 %v3425_v8  ;;  %v768_v8 = vrot.slane %v3724_v53, 1 }
  0x66   : > { %610 = vst.msk [vmem:[#allocation2 + $0x109] sm:$0xff] %vm533_vm0, %v3652_v48  ;;  %v3678_v48 = vsel %vm462_vm14, %v430_v44, %v494_v24  ;;  %934 = vrot.lane.b32.xlu2 %v3645_v0, %s3144_s11  ;;  %v3693_v24 = vsel %vm724_vm1, %v761_v25, %v763_v12  ;;  %v395_v44 = vmul.f32 %v3305_v6, %v359_v30  ;;  %v770_v12 = vrot.slane %v3686_v58, 1 }
  0x67   : > { %611 = vst.msk [vmem:[#allocation2 + $0x111] sm:$0xff] %vm533_vm0, %v3654_v45  ;;  %v360_v45 = vld [vmem:[%s3296_s15 + $0xd8] sm:$0xff]  ;;  %2734 = vmatpush.msra.mxu3 %v3414_v61  ;;  %v766_v25 = vrot.slane %v3722_v3, 1  ;;  %vm1948_vm14 = vcmask 293888  }
  0x68   : > { %5696 = vst [vmem:[#allocation18_spill] sm:$0xff] %v3668_v62  ;;  %v396_v39 = vmul.f32 %v3305_v6, %v360_v45  ;;  %932 = vrot.lane.b32.xlu1 %v3673_v46, %s3144_s11  ;;  %v771_v6 = vrot.slane %v3696_v55, 1  ;;  %v3712_v45 = vsel %vm466_vm2, %v434_v33, %v498_v42  ;;  %v431_v30 = vadd.f32 %v3321_v10, %v395_v44  ;;  %v3744_v42 = vld [vmem:[#allocation2 + $0xf8] sm:$0xff] }
  0x69   : > { %5697 = vst [vmem:[#allocation19_spill] sm:$0xff] %v3673_v46  ;;  %v5704_v33 = vrot.slane %v3575_v63, 1  ;;  %2735 = vmatpush.msra.mxu3 %v3391_v49 }
  0x6a   : > { %5698 = vst [vmem:[#allocation20_spill] sm:$0xff] %v3678_v48  ;;  %942 = vrot.lane.b32.xlu0 %v3693_v24, %s3144_s11  ;;  %v432_v21 = vadd.f32 %v3321_v10, %v396_v39  ;;  %v3735_v10 = vsel %vm724_vm1, %v770_v12, %v771_v6  ;;  %vm463_vm3 = vcmp.gt.f32.partialorder %v431_v30, 0.0  ;;  %v495_v9 = vmul.f32 0.1, %v431_v30 }
  0x6b   : > { %614 = vst.msk [vmem:[#allocation2 + $0x139] sm:$0xff] %vm533_vm0, %v3668_v62  ;;  %v3730_v44 = vsel %vm724_vm1, %v5704_v33, %v758_v29  ;;  %v3746_v29 = vld [vmem:[#allocation2 + $0x100] sm:$0x3]  ;;  %v765_v12 = vrot.slane %v3737_v15, 1  ;;  %2736 = vmatpush.msra.mxu3 %v3379_v41  ;;  %v3760_v62 = vsel %vm724_vm1, %v766_v25, %v768_v8  ;;  %v3774_v41 = vld [vmem:[#allocation2 + $0xe8] sm:$0x3] }
  0x6c   : > { %615 = vst.msk [vmem:[#allocation2 + $0x141] sm:$0xff] %vm533_vm0, %v3678_v48  ;;  %vm464_vm4 = vcmp.gt.f32.partialorder %v432_v21, 0.0  ;;  %v496_v39 = vmul.f32 0.1, %v432_v21  ;;  %v3750_v33 = vsel %vm463_vm3, %v431_v30, %v495_v9  ;;  %v776_v48 = vrot.slane %v3744_v42, 1  ;;  %v3766_v30 = vld [vmem:[#allocation2 + $0xf0] sm:$0xff] }
  0x6d   : > { %5699 = vst [vmem:[#allocation21_spill] sm:$0xff] %v3693_v24  ;;  %v778_v49 = vrot.slane %v3746_v29, 1  ;;  %2737 = vmatpush.msra.mxu3 %v3405_v56  ;;  %v775_v9 = vrot.slane %v3766_v30, 1  ;;  %v3785_v56 = vld [vmem:[#allocation2 + $0x128] sm:$0xff]  ;;  %v3832_v24 = vld [vmem:[#allocation2 + $0x130] sm:$0x3] }
  0x6e   : > { %5700 = vst [vmem:[#allocation22_spill] sm:$0xff] %v3702_v59  ;;  %940 = vrot.lane.b32.xlu2 %v3718_v17, %s3144_s11  ;;  %v3752_v61 = vsel %vm464_vm4, %v432_v21, %v496_v39  ;;  %v3770_v21 = vsel %vm724_vm1, %v765_v12, %v766_v25  ;;  %v3783_v39 = vld [vmem:[#allocation2 + $0x120] sm:$0xff]  ;;  %v773_v25 = vrot.slane %v3774_v41, 1  ;;  %vm2309_vm3 = vcmask 58368  }
  0x6f   : > { %618 = vst.msk [vmem:[#allocation2 + $0x169] sm:$0xff] %vm533_vm0, %v3702_v59  ;;  %2738 = vmatpush.msra.mxu3 %v3398_v52  ;;  %v3778_v8 = vsel %vm724_vm1, %v776_v48, %v778_v49  ;;  %v3791_v12 = vsel %vm724_vm1, %v775_v9, %v776_v48  ;;  %v785_v52 = vrot.slane %v3783_v39, 1  ;;  %v786_v49 = vrot.slane %v3785_v56, 1 }
  0x70   : > { %5701 = vst [vmem:[#allocation23_spill] sm:$0xff] %v3712_v45  ;;  %938 = vrot.lane.b32.xlu1 %v3730_v44, %s3144_s11  ;;  %v3800_v59 = vsel %vm724_vm1, %v771_v6, %v773_v25 }
  0x71   : > { %5702 = vst [vmem:[#allocation24_spill] sm:$0xff] %v3718_v17 }
  0x72   : > { %619 = vst.msk [vmem:[#allocation2 + $0x171] sm:$0xff] %vm533_vm0, %v3712_v45  ;;  %948 = vrot.lane.b32.xlu0 %v3735_v10, %s3144_s11  ;;  %v3804_v45 = vld [vmem:[#allocation2 + $0x108] sm:$0xff] }
  0x73   : > { %5703 = vst [vmem:[#allocation25_spill] sm:$0xff] %v3722_v3  ;;  %v780_v6 = vrot.slane %v3804_v45, 1 }
  0x74   : > { %5705 = vst [vmem:[#allocation26_spill] sm:$0xff] %v3730_v44 }
  0x75   : > { %5706 = vst [vmem:[#allocation27_spill] sm:$0xff] %v3735_v10  ;;  %v3813_v10 = vld [vmem:[#allocation2 + $0x140] sm:$0xff] }
  0x76   : > { %5707 = vst [vmem:[#allocation28_spill] sm:$0xff] %v3737_v15  ;;  %946 = vrot.lane.b32.xlu2 %v3760_v62, %s3144_s11 }
  0x77   : > { %5708 = vst [vmem:[#allocation29_spill] sm:$0xff] %v3750_v33 }
  0x78   : > { %5709 = vst [vmem:[#allocation30_spill] sm:$0xff] %v3752_v61  ;;  %944 = vrot.lane.b32.xlu1 %v3770_v21, %s3144_s11 }
  0x79   : > { %616 = vst.msk [vmem:[#allocation2 + $0x151] sm:$0xff] %vm533_vm0, %v3750_v33  ;;  %v3795_v33 = vld [vmem:[#allocation2 + $0x110] sm:$0xff] }
  0x7a   : > { %5710 = vst [vmem:[#allocation31_spill] sm:$0xff] %v3760_v62  ;;  %954 = vrot.lane.b32.xlu0 %v3778_v8, %s3144_s11  ;;  %v781_v48 = vrot.slane %v3795_v33, 1  ;;  %v3815_v62 = vld [vmem:[#allocation2 + $0x148] sm:$0x3]  ;;  %v3842_v44 = vld [vmem:[#allocation2 + $0x170] sm:$0xff] }
  0x7b   : > { %617 = vst.msk [vmem:[#allocation2 + $0x159] sm:$0xff] %vm533_vm0, %v3752_v61  ;;  %v3797_v61 = vld [vmem:[#allocation2 + $0x118] sm:$0x3] }
  0x7c   : > { %5711 = vst [vmem:[#allocation32_spill] sm:$0xff] %v3770_v21  ;;  %v783_v9 = vrot.slane %v3797_v61, 1  ;;  %v3825_v21 = vld [vmem:[#allocation2 + $0x138] sm:$0xff] }
  0x7d   : > { %5712 = vst [vmem:[#allocation33_spill] sm:$0xff] %v3778_v8  ;;  %v3807_v8 = vsel %vm724_vm1, %v785_v52, %v786_v49  ;;  %v791_v52 = vrot.slane %v3813_v10, 1 }
  0x7e   : > { %5713 = vst [vmem:[#allocation34_spill] sm:$0xff] %v3791_v12  ;;  %952 = vrot.lane.b32.xlu2 %v3791_v12, %s3144_s11  ;;  %v3821_v25 = vsel %vm724_vm1, %v781_v48, %v783_v9  ;;  %v793_v12 = vrot.slane %v3815_v62, 1  ;;  %v790_v9 = vrot.slane %v3825_v21, 1 }
  0x7f   : > { %5714 = vst [vmem:[#allocation35_spill] sm:$0xff] %v3800_v59 }
  0x80   : > { %5715 = vst [vmem:[#allocation36_spill] sm:$0xff] %v3807_v8  ;;  %950 = vrot.lane.b32.xlu1 %v3800_v59, %s3144_s11  ;;  %v3828_v59 = vsel %vm724_vm1, %v780_v6, %v781_v48  ;;  %v3835_v17 = vsel %vm724_vm1, %v791_v52, %v793_v12  ;;  %v788_v48 = vrot.slane %v3832_v24, 1  ;;  %v3848_v6 = vsel %vm724_vm1, %v790_v9, %v791_v52  ;;  %v3861_v46 = vld [vmem:[#allocation2 + $0x150] sm:$0xff] }
  0x81   : > { %5716 = vst [vmem:[#allocation37_spill] sm:$0xff] %v3821_v25  ;;  %v795_v51 = vrot.slane %v3861_v46, 1 }
  0x82   : > { %960 = vrot.lane.b32.xlu0 %v3807_v8, %s3144_s11  ;;  %5717 = vst [vmem:[#allocation38_spill] sm:$0xff] %v3828_v59  ;;  %v3840_v8 = vld [vmem:[#allocation2 + $0x168] sm:$0xff]  ;;  %v3852_v19 = vld [vmem:[#allocation2 + $0x158] sm:$0xff]  ;;  %v3854_v0 = vld [vmem:[#allocation2 + $0x160] sm:$0x3] }
  0x83   : > { %5718 = vst [vmem:[#allocation39_spill] sm:$0xff] %v3835_v17  ;;  %v800_v12 = vrot.slane %v3840_v8, 1  ;;  %v796_v52 = vrot.slane %v3852_v19, 1  ;;  %v798_v9 = vrot.slane %v3854_v0, 1 }
  0x84   : > { %5719 = vst [vmem:[#allocation40_spill] sm:$0xff] %v3848_v6 }
  0x86   : > { %958 = vrot.lane.b32.xlu2 %v3821_v25, %s3144_s11  ;;  %v801_v25 = vrot.slane %v3842_v44, 1 }
  0x88   : > { %956 = vrot.lane.b32.xlu1 %v3828_v59, %s3144_s11  ;;  %v3857_v59 = vsel %vm724_vm1, %v786_v49, %v788_v48  ;;  %v3874_v49 = vsel %vm724_vm1, %v796_v52, %v798_v9  ;;  %v807_v48 = vrot.slane %v3232_v2, 2 }
  0x89   : > { %5720 = vst [vmem:[#allocation41_spill] sm:$0xff] %v3857_v59 }
  0x8a   : > { %966 = vrot.lane.b32.xlu0 %v3835_v17, %s3144_s11  ;;  %v3864_v17 = vsel %vm724_vm1, %v800_v12, %v801_v25  ;;  %5722 = vst [vmem:[#allocation43_spill] sm:$0xff] %v3874_v49  ;;  %v809_v12 = vrot.slane %v3346_v22, 2 }
  0x8b   : > { %5721 = vst [vmem:[#allocation42_spill] sm:$0xff] %v3864_v17 }
  0x8c   : > { %v810_v13 = vsel %vm805_vm5, %v807_v48, %v809_v12  ;;  %v812_v12 = vrot.slane %v3477_v40, 2 }
  0x8e   : > { %964 = vrot.lane.b32.xlu2 %v3848_v6, %s3144_s11  ;;  %v3879_v6 = vsel %vm724_vm1, %v795_v51, %v796_v52  ;;  %v816_v51 = vrot.slane %v3451_v28, 2  ;;  %v817_v52 = vrot.slane %v3459_v31, 2 }
  0x8f   : > { %5723 = vst [vmem:[#allocation44_spill] sm:$0xff] %v3879_v6 }
  0x90   : > { %962 = vrot.lane.b32.xlu1 %v3857_v59, %s3144_s11  ;;  %v3883_v59 = vld [vmem:[#allocation2 + $0x178] sm:$0x3] }
  0x91   : > { %v803_v2 = vrot.slane %v3883_v59, 1 }
  0x92   : > { %972 = vrot.lane.b32.xlu0 %v3864_v17, %s3144_s11  ;;  %v806_v17 = vrot.slane %v3228_v1, 2  ;;  %v3899_v1 = vsel %vm805_vm5, %v816_v51, %v817_v52  ;;  %v819_v51 = vrot.slane %v3480_v43, 2  ;;  %v827_v43 = vrot.slane %v3524_v4, 2 }
  0x93   : > { %v3895_v9 = vsel %vm724_vm1, %v801_v25, %v803_v2  ;;  %v822_v25 = vrot.slane %v3503_v54, 2 }
  0x94   : > { %v808_v22 = vsel %vm805_vm5, %v806_v17, %v807_v48  ;;  %5724 = vst [vmem:[#allocation45_spill] sm:$0xff] %v3895_v9  ;;  %v824_v48 = vrot.slane %v3557_v35, 2 }
  0x96   : > { %970 = vrot.lane.b32.xlu2 %v3874_v49, %s3144_s11  ;;  %v829_v49 = vrot.slane %v3526_v5, 2 }
  0x98   : > { %968 = vrot.lane.b32.xlu1 %v3879_v6, %s3144_s11  ;;  %v814_v6 = vrot.slane %v3506_v57, 2  ;;  %v3919_v57 = vsel %vm805_vm5, %v822_v25, %v824_v48  ;;  %v3935_v48 = vsel %vm805_vm5, %v817_v52, %v819_v51  ;;  %v826_v52 = vrot.slane %v3543_v14, 2 }
  0x99   : > { %v3954_v51 = vsel %vm805_vm5, %v827_v43, %v829_v49 }
  0x9a   : > { %1010 = vrot.lane.b32.xlu0 %v810_v13, %s3145_s20  ;;  %v811_v13 = vrot.slane %v3470_v38, 2  ;;  %v3909_v17 = vsel %vm805_vm5, %v812_v12, %v814_v6  ;;  %v3959_v5 = vsel %vm805_vm5, %v826_v52, %v827_v43  ;;  %v847_v52 = vrot.slane %v3722_v3, 2 }
  0x9c   : > { %v3914_v2 = vsel %vm805_vm5, %v811_v13, %v812_v12  ;;  %v831_v12 = vrot.slane %v3626_v36, 2  ;;  %v832_v13 = vrot.slane %v3586_v18, 2 }
  0x9e   : > { %1008 = vrot.lane.b32.xlu2 %v808_v22, %s3145_s20  ;;  %v821_v22 = vrot.slane %v3495_v50, 2 }
  0xa0   : > { %974 = vrot.lane.b32.xlu1 %v3895_v9, %s3144_s11  ;;  %v3930_v35 = vsel %vm805_vm5, %v821_v22, %v822_v25  ;;  %v3940_v9 = vsel %vm805_vm5, %v831_v12, %v832_v13  ;;  %v3948_v22 = vpop.permute.xlu0 %912  ;;  %v837_v12 = vrot.slane %v3575_v63, 2  ;;  %v834_v63 = vrot.slane %v3593_v11, 2 }
  0xa1   : > { %5727 = vst [vmem:[#allocation48_spill] sm:$0xff] %v3948_v22  ;;  %v836_v22 = vrot.slane %v3563_v37, 2 }
  0xa2   : > { %1016 = vrot.lane.b32.xlu0 %v3899_v1, %s3145_s20  ;;  %v3982_v37 = vsel %vm805_vm5, %v832_v13, %v834_v63  ;;  %v852_v13 = vrot.slane %v3696_v55, 2  ;;  %v849_v55 = vrot.slane %v3724_v53, 2 }
  0xa3   : > { %v3977_v43 = vsel %vm805_vm5, %v836_v22, %v837_v12 }
  0xa6   : > { %1014 = vrot.lane.b32.xlu2 %v3909_v17, %s3145_s20 }
  0xa8   : > { %1012 = vrot.lane.b32.xlu1 %v3914_v2, %s3145_s20  ;;  %v3924_v6 = vpop.permute.xlu2 %920 }
  0xa9   : > { %5725 = vst [vmem:[#allocation46_spill] sm:$0xff] %v3924_v6  ;;  %v839_v6 = vrot.slane %v3675_v16, 2 }
  0xaa   : > { %1022 = vrot.lane.b32.xlu0 %v3919_v57, %s3145_s20 }
  0xad   : > { %v3974_v16 = vpop.permute.xlu0 %914 }
  0xae   : > { %1020 = vrot.lane.b32.xlu2 %v3930_v35, %s3145_s20  ;;  %5729 = vst [vmem:[#allocation50_spill] sm:$0xff] %v3974_v16  ;;  %v844_v16 = vrot.slane %v3641_v27, 2 }
  0xb0   : > { %1018 = vrot.lane.b32.xlu1 %v3935_v48, %s3145_s20  ;;  %v3946_v25 = vpop.permute.xlu2 %922 }
  0xb1   : > { %5726 = vst [vmem:[#allocation47_spill] sm:$0xff] %v3946_v25  ;;  %v3964_v25 = vsel %vm805_vm5, %v837_v12, %v839_v6  ;;  %v846_v6 = vrot.slane %v3737_v15, 2  ;;  %v841_v12 = vrot.slane %v3663_v34, 2  ;;  %v851_v15 = vrot.slane %v3686_v58, 2 }
  0xb2   : > { %1028 = vrot.lane.b32.xlu0 %v3940_v9, %s3145_s20 }
  0xb3   : > { %v3987_v11 = vsel %vm805_vm5, %v846_v6, %v847_v52 }
  0xb6   : > { %1026 = vrot.lane.b32.xlu2 %v3954_v51, %s3145_s20 }
  0xb8   : > { %1024 = vrot.lane.b32.xlu1 %v3959_v5, %s3145_s20  ;;  %v3969_v49 = vpop.permute.xlu2 %928 }
  0xb9   : > { %5728 = vst [vmem:[#allocation49_spill] sm:$0xff] %v3969_v49  ;;  %v842_v49 = vrot.slane %v3637_v23, 2  ;;  %v854_v23 = vrot.slane %v3774_v41, 2 }
  0xba   : > { %1034 = vrot.lane.b32.xlu0 %v3964_v25, %s3145_s20 }
  0xbb   : > { %v4001_v63 = vsel %vm805_vm5, %v842_v49, %v844_v16  ;;  %v4008_v6 = vsel %vm805_vm5, %v841_v12, %v842_v49  ;;  %v4026_v49 = vsel %vm805_vm5, %v851_v15, %v852_v13  ;;  %v861_v12 = vrot.slane %v3804_v45, 2 }
  0xbc   : > { %v859_v15 = vrot.slane %v3746_v29, 2 }
  0xbe   : > { %1032 = vrot.lane.b32.xlu2 %v3977_v43, %s3145_s20 }
  0xc0   : > { %1030 = vrot.lane.b32.xlu1 %v3982_v37, %s3145_s20  ;;  %v3993_v22 = vpop.permute.xlu2 %934 }
  0xc1   : > { %5730 = vst [vmem:[#allocation51_spill] sm:$0xff] %v3993_v22  ;;  %v4013_v22 = vsel %vm805_vm5, %v852_v13, %v854_v23  ;;  %v862_v23 = vrot.slane %v3795_v33, 2  ;;  %v856_v33 = vrot.slane %v3766_v30, 2 }
  0xc2   : > { %v3996_v3 = vpop.permute.xlu1 %916  ;;  %1040 = vrot.lane.b32.xlu0 %v3987_v11, %s3145_s20 }
  0xc3   : > { %v4038_v53 = vsel %vm805_vm5, %v861_v12, %v862_v23 }
  0xc4   : > { %v4005_v27 = vpop.permute.xlu0 %924  ;;  %5733 = vst [vmem:[#allocation54_spill] sm:$0xff] %v4038_v53 }
  0xc5   : > { %5731 = vst [vmem:[#allocation52_spill] sm:$0xff] %v4005_v27  ;;  %v4033_v27 = vsel %vm805_vm5, %v847_v52, %v849_v55  ;;  %v867_v55 = vrot.slane %v3785_v56, 2  ;;  %v5738_v56 = vmov 0.0  }
  0xc6   : > { %1038 = vrot.lane.b32.xlu2 %v4001_v63, %s3145_s20  ;;  %2308 = vst.msk [vmem:[#allocation3] sm:$0xff] %vm1712_vm6, %v5738_v56 }
  0xc7   : > { %2311 = vst.msk [vmem:[#allocation3 + $0x10] sm:$0xff] %vm1712_vm6, %v5738_v56 }
  0xc8   : > { %1036 = vrot.lane.b32.xlu1 %v4008_v6, %s3145_s20  ;;  %v4018_v16 = vpop.permute.xlu2 %940  ;;  %2313 = vst.msk [vmem:[#allocation3 + $0x20] sm:$0xff] %vm1712_vm6, %v5738_v56 }
  0xc9   : > { %5732 = vst [vmem:[#allocation53_spill] sm:$0xff] %v4018_v16  ;;  %v857_v16 = vrot.slane %v3744_v42, 2  ;;  %v869_v42 = vrot.slane %v3832_v24, 2  ;;  %v864_v24 = vrot.slane %v3797_v61, 2 }
  0xca   : > { %v4021_v41 = vpop.permute.xlu1 %918  ;;  %1046 = vrot.lane.b32.xlu0 %v4013_v22, %s3145_s20  ;;  %2315 = vst.msk [vmem:[#allocation3 + $0x30] sm:$0xff] %vm1712_vm6, %v5738_v56 }
  0xcb   : > { %v4052_v52 = vsel %vm805_vm5, %v857_v16, %v859_v15  ;;  %v4059_v12 = vsel %vm805_vm5, %v856_v33, %v857_v16  ;;  %v4064_v30 = vsel %vm805_vm5, %v867_v55, %v869_v42  ;;  %v876_v33 = vrot.slane %v3861_v46, 2  ;;  %2317 = vst.msk [vmem:[#allocation3 + $0x40] sm:$0xff] %vm1712_vm6, %v5738_v56 }
  0xcc   : > { %v4030_v58 = vpop.permute.xlu0 %930  ;;  %5735 = vst [vmem:[#allocation56_spill] sm:$0xff] %v4052_v52  ;;  %v877_v42 = vrot.slane %v3852_v19, 2 }
  0xcd   : > { %5736 = vst [vmem:[#allocation57_spill] sm:$0xff] %v4064_v30 }
  0xce   : > { %1044 = vrot.lane.b32.xlu2 %v4026_v49, %s3145_s20  ;;  %2319 = vst.msk [vmem:[#allocation3 + $0x50] sm:$0xff] %vm1712_vm6, %v5738_v56  ;;  %v4101_v46 = vsel %vm805_vm5, %v876_v33, %v877_v42 }
  0xcf   : > { %5741 = vst [vmem:[#allocation61_spill] sm:$0xff] %v4101_v46 }
  0xd0   : > { %1042 = vrot.lane.b32.xlu1 %v4033_v27, %s3145_s20  ;;  %v4044_v45 = vpop.permute.xlu2 %946  ;;  %2321 = vst.msk [vmem:[#allocation3 + $0x60] sm:$0xff] %vm1712_vm6, %v5738_v56 }
  0xd1   : > { %5734 = vst [vmem:[#allocation55_spill] sm:$0xff] %v4044_v45  ;;  %v866_v45 = vrot.slane %v3783_v39, 2 }
  0xd2   : > { %v4047_v13 = vpop.permute.xlu1 %926  ;;  %1052 = vrot.lane.b32.xlu0 %v4038_v53, %s3145_s20  ;;  %2323 = vst.msk [vmem:[#allocation3 + $0x70] sm:$0xff] %vm1712_vm6, %v5738_v56 }
  0xd3   : > { %v4081_v39 = vsel %vm805_vm5, %v866_v45, %v867_v55  ;;  %v872_v45 = vrot.slane %v3813_v10, 2  ;;  %v874_v55 = vrot.slane %v3815_v62, 2  ;;  %2325 = vst.msk [vmem:[#allocation3 + $0x80] sm:$0xff] %vm1712_vm6, %v5738_v56  ;;  %v882_v10 = vrot.slane %v3842_v44, 2 }
  0xd4   : > { %v4056_v29 = vpop.permute.xlu0 %936  ;;  %2327 = vst.msk [vmem:[#allocation3 + $0x90] sm:$0xff] %vm1712_vm6, %v5738_v56  ;;  %v881_v56 = vrot.slane %v3840_v8, 2 }
  0xd5   : > { %v4123_v62 = vsel %vm805_vm5, %v872_v45, %v874_v55 }
  0xd6   : > { %1050 = vrot.lane.b32.xlu2 %v4052_v52, %s3145_s20  ;;  %5743 = vst [vmem:[#allocation63_spill] sm:$0xff] %v4123_v62 }
  0xd8   : > { %1048 = vrot.lane.b32.xlu1 %v4059_v12, %s3145_s20  ;;  %v4069_v15 = vpop.permute.xlu2 %952 }
  0xd9   : > { %5737 = vst [vmem:[#allocation58_spill] sm:$0xff] %v4069_v15  ;;  %v4092_v15 = vsel %vm805_vm5, %v862_v23, %v864_v24  ;;  %v871_v24 = vrot.slane %v3825_v21, 2 }
  0xda   : > { %v4074_v16 = vpop.permute.xlu1 %932  ;;  %1058 = vrot.lane.b32.xlu0 %v4064_v30, %s3145_s20  ;;  %5740 = vst [vmem:[#allocation60_spill] sm:$0xff] %v4092_v15 }
  0xdb   : > { %v4130_v21 = vsel %vm805_vm5, %v871_v24, %v872_v45  ;;  %v4148_v45 = vsel %vm805_vm5, %v881_v56, %v882_v10 }
  0xdc   : > { %v4087_v61 = vpop.permute.xlu0 %942 }
  0xdd   : > { %5739 = vst [vmem:[#allocation59_spill] sm:$0xff] %v4087_v61  ;;  %v5781_v61 = vld [vmem:[#allocation6_spill] sm:$0xff] }
  0xde   : > { %1056 = vrot.lane.b32.xlu2 %v4081_v39, %s3145_s20 }
  0xe0   : > { %1054 = vrot.lane.b32.xlu1 %v4092_v15, %s3145_s20  ;;  %v4109_v23 = vpop.permute.xlu2 %958 }
  0xe1   : > { %5742 = vst [vmem:[#allocation62_spill] sm:$0xff] %v4109_v23  ;;  %v884_v23 = vrot.slane %v3883_v59, 2  ;;  %v879_v59 = vrot.slane %v3854_v0, 2 }
  0xe2   : > { %v4116_v33 = vpop.permute.xlu1 %938  ;;  %1064 = vrot.lane.b32.xlu0 %v4101_v46, %s3145_s20 }
  0xe3   : > { %v4135_v53 = vsel %vm805_vm5, %v882_v10, %v884_v23  ;;  %v4153_v23 = vsel %vm805_vm5, %v877_v42, %v879_v59 }
  0xe4   : > { %v4127_v15 = vpop.permute.xlu0 %948 }
  0xe5   : > { %5744 = vst [vmem:[#allocation64_spill] sm:$0xff] %v4127_v15 }
  0xe6   : > { %1062 = vrot.lane.b32.xlu2 %v4123_v62, %s3145_s20  ;;  %v3101_v62 = vld [vmem:[#allocation2] sm:$0xff] }
  0xe8   : > { %1060 = vrot.lane.b32.xlu1 %v4130_v21, %s3145_s20  ;;  %v4140_v55 = vpop.permute.xlu2 %964 }
  0xe9   : > { %5745 = vst [vmem:[#allocation65_spill] sm:$0xff] %v4140_v55 }
  0xea   : > { %v4143_v46 = vpop.permute.xlu1 %944  ;;  %1070 = vrot.lane.b32.xlu0 %v4135_v53, %s3145_s20 }
  0xeb   : > { %5746 = vst [vmem:[#allocation66_spill] sm:$0xff] %v4143_v46 }
  0xec   : > { %v4150_v24 = vpop.permute.xlu0 %954 }
  0xed   : > { %5747 = vst [vmem:[#allocation67_spill] sm:$0xff] %v4150_v24 }
  0xee   : > { %1068 = vrot.lane.b32.xlu2 %v4148_v45, %s3145_s20 }
  0xf0   : > { %1066 = vrot.lane.b32.xlu1 %v4153_v23, %s3145_s20  ;;  %v4159_v0 = vpop.permute.xlu2 %970 }
  0xf1   : > { %5748 = vst [vmem:[#allocation68_spill] sm:$0xff] %v4159_v0 }
  0xf2   : > { %v4161_v55 = vpop.permute.xlu1 %950  ;;  %1108 = vrot.lane.b32.xlu0 %v3451_v28, %s3146_s21 }
  0xf3   : > { %5749 = vst [vmem:[#allocation69_spill] sm:$0xff] %v4161_v55 }
  0xf4   : > { %v4165_v56 = vpop.permute.xlu0 %960 }
  0xf5   : > { %5750 = vst [vmem:[#allocation70_spill] sm:$0xff] %v4165_v56 }
  0xf6   : > { %1106 = vrot.lane.b32.xlu2 %v3477_v40, %s3146_s21 }
  0xf8   : > { %1104 = vrot.lane.b32.xlu1 %v3470_v38, %s3146_s21  ;;  %v4171_v42 = vpop.permute.xlu2 %1008 }
  0xfa   : > { %v4173_v10 = vpop.permute.xlu1 %956  ;;  %1114 = vrot.lane.b32.xlu0 %v3503_v54, %s3146_s21 }
  0xfb   : > { %5751 = vst [vmem:[#allocation71_spill] sm:$0xff] %v4173_v10 }
  0xfc   : > { %v4177_v59 = vpop.permute.xlu0 %966 }
  0xfd   : > { %5752 = vst [vmem:[#allocation72_spill] sm:$0xff] %v4177_v59 }
  0xfe   : > { %1112 = vrot.lane.b32.xlu2 %v3495_v50, %s3146_s21 }
 0x100   : > { %1110 = vrot.lane.b32.xlu1 %v3459_v31, %s3146_s21  ;;  %v4183_v24 = vpop.permute.xlu2 %1014 }
 0x102   : > { %v4185_v40 = vpop.permute.xlu1 %962  ;;  %1120 = vrot.lane.b32.xlu0 %v3626_v36, %s3146_s21 }
 0x103   : > { %5753 = vst [vmem:[#allocation73_spill] sm:$0xff] %v4185_v40 }
 0x104   : > { %v4189_v38 = vpop.permute.xlu0 %972 }
 0x105   : > { %5754 = vst [vmem:[#allocation74_spill] sm:$0xff] %v4189_v38 }
 0x106   : > { %1118 = vrot.lane.b32.xlu2 %v3524_v4, %s3146_s21 }
 0x108   : > { %1116 = vrot.lane.b32.xlu1 %v3543_v14, %s3146_s21  ;;  %v4195_v55 = vpop.permute.xlu2 %1020 }
 0x10a   : > { %v4197_v15 = vpop.permute.xlu1 %968  ;;  %1296 = vrot.lane.b32.xlu0 %v3914_v2, %s3147_s22 }
 0x10b   : > { %5755 = vst [vmem:[#allocation75_spill] sm:$0xff] %v4197_v15 }
 0x10c   : > { %v4201_v40 = vpop.permute.xlu0 %1010 }
 0x10e   : > { %1200 = vrot.lane.b32.xlu2 %v3515_v60, %s3148_s23 }
 0x110   : > { %1122 = vrot.lane.b32.xlu1 %v3586_v18, %s3146_s21  ;;  %v4207_v56 = vpop.permute.xlu2 %1026 }
 0x112   : > { %v4209_v38 = vpop.permute.xlu1 %974  ;;  %1584 = vrot.lane.b32.xlu0 %v3899_v1, %s3149_s24 }
 0x113   : > { %5756 = vst [vmem:[#allocation76_spill] sm:$0xff] %v4209_v38 }
 0x114   : > { %v4213_v0 = vpop.permute.xlu0 %1016 }
 0x116   : > { %1488 = vrot.lane.b32.xlu2 %v3492_v47, %s3150_s25 }
 0x118   : > { %1392 = vrot.lane.b32.xlu1 %v3451_v28, %s3151_s26  ;;  %v4219_v60 = vpop.permute.xlu2 %1032 }
 0x11a   : > { %v4221_v2 = vpop.permute.xlu1 %1012  ;;  %1394 = vrot.lane.b32.xlu0 %v3459_v31, %s3151_s26 }
 0x11c   : > { %v4225_v38 = vpop.permute.xlu0 %1022 }
 0x11e   : > { %1298 = vrot.lane.b32.xlu2 %v3909_v17, %s3147_s22 }
 0x120   : > { %1202 = vrot.lane.b32.xlu1 %v3554_v32, %s3148_s23  ;;  %v4231_v46 = vpop.permute.xlu2 %1038 }
 0x121   : > { %5757 = vst [vmem:[#allocation77_spill] sm:$0xff] %v4231_v46 }
 0x122   : > { %v4233_v10 = vpop.permute.xlu1 %1018  ;;  %1204 = vrot.lane.b32.xlu0 %v3492_v47, %s3148_s23 }
 0x124   : > { %v4237_v28 = vpop.permute.xlu0 %1028 }
 0x126   : > { %1586 = vrot.lane.b32.xlu2 %v3935_v48, %s3149_s24 }
 0x128   : > { %1490 = vrot.lane.b32.xlu1 %v3548_v20, %s3150_s25  ;;  %v4243_v31 = vpop.permute.xlu2 %1044 }
 0x129   : > { %5758 = vst [vmem:[#allocation78_spill] sm:$0xff] %v4243_v31 }
 0x12a   : > { %v4245_v17 = vpop.permute.xlu1 %1024  ;;  %1492 = vrot.lane.b32.xlu0 %v3533_v7, %s3150_s25 }
 0x12c   : > { %v4249_v32 = vpop.permute.xlu0 %1034 }
 0x12d   : > { %5759 = vst [vmem:[#allocation79_spill] sm:$0xff] %v4249_v32 }
 0x12e   : > { %1396 = vrot.lane.b32.xlu2 %v3495_v50, %s3151_s26 }
 0x130   : > { %1300 = vrot.lane.b32.xlu1 %v3899_v1, %s3147_s22  ;;  %v4255_v47 = vpop.permute.xlu2 %1050 }
 0x131   : > { %5760 = vst [vmem:[#allocation80_spill] sm:$0xff] %v4255_v47 }
 0x132   : > { %v4257_v46 = vpop.permute.xlu1 %1030  ;;  %1302 = vrot.lane.b32.xlu0 %v3935_v48, %s3147_s22 }
 0x134   : > { %v4261_v31 = vpop.permute.xlu0 %1040 }
 0x135   : > { %5761 = vst [vmem:[#allocation81_spill] sm:$0xff] %v4261_v31 }
 0x136   : > { %1206 = vrot.lane.b32.xlu2 %v3548_v20, %s3148_s23 }
 0x138   : > { %1588 = vrot.lane.b32.xlu1 %v3930_v35, %s3149_s24  ;;  %v4267_v15 = vpop.permute.xlu2 %1056 }
 0x139   : > { %5762 = vst [vmem:[#allocation82_spill] sm:$0xff] %v4267_v15 }
 0x13a   : > { %v4269_v50 = vpop.permute.xlu1 %1036  ;;  %1590 = vrot.lane.b32.xlu0 %v3919_v57, %s3149_s24 }
 0x13b   : > { %5763 = vst [vmem:[#allocation83_spill] sm:$0xff] %v4269_v50 }
 0x13c   : > { %v4273_v1 = vpop.permute.xlu0 %1046 }
 0x13d   : > { %5764 = vst [vmem:[#allocation84_spill] sm:$0xff] %v4273_v1 }
 0x13e   : > { %1494 = vrot.lane.b32.xlu2 %v3608_v26, %s3150_s25 }
 0x140   : > { %1398 = vrot.lane.b32.xlu1 %v3503_v54, %s3151_s26  ;;  %v4279_v48 = vpop.permute.xlu2 %1062 }
 0x141   : > { %5765 = vst [vmem:[#allocation85_spill] sm:$0xff] %v4279_v48  ;;  %v5782_v48 = vld [vmem:[#allocation48_spill] sm:$0xff] }
 0x142   : > { %v4281_v20 = vpop.permute.xlu1 %1042  ;;  %1400 = vrot.lane.b32.xlu0 %v3543_v14, %s3151_s26  ;;  %v5771_v14 = vld [vmem:[#allocation10_spill] sm:$0xff]  ;;  %v1680_v50 = vsel %vm533_vm0, %v3101_v62, %v5782_v48 }
 0x143   : > { %5766 = vst [vmem:[#allocation86_spill] sm:$0xff] %v4281_v20  ;;  %v1713_v30 = vsel %vm1712_vm6, %v1680_v50, %v4171_v42 }
 0x144   : > { %v4285_v47 = vpop.permute.xlu0 %1052 }
 0x145   : > { %5767 = vst [vmem:[#allocation87_spill] sm:$0xff] %v4285_v47 }
 0x146   : > { %1304 = vrot.lane.b32.xlu2 %v3930_v35, %s3147_s22 }
 0x148   : > { %1208 = vrot.lane.b32.xlu1 %v3533_v7, %s3148_s23  ;;  %v4291_v1 = vpop.permute.xlu2 %1068  ;;  %v5773_v7 = vld [vmem:[#allocation7_spill] sm:$0xff] }
 0x149   : > { %5768 = vst [vmem:[#allocation88_spill] sm:$0xff] %v4291_v1 }
 0x14a   : > { %v4293_v15 = vpop.permute.xlu1 %1048  ;;  %1210 = vrot.lane.b32.xlu0 %v3608_v26, %s3148_s23 }
 0x14b   : > { %5769 = vst [vmem:[#allocation89_spill] sm:$0xff] %v4293_v15 }
 0x14c   : > { %v4297_v54 = vpop.permute.xlu0 %1058 }
 0x14d   : > { %5770 = vst [vmem:[#allocation90_spill] sm:$0xff] %v4297_v54 }
 0x14e   : > { %1592 = vrot.lane.b32.xlu2 %v3959_v5, %s3149_s24 }
 0x150   : > { %1496 = vrot.lane.b32.xlu1 %v5771_v14, %s3150_s25  ;;  %v4303_v20 = vpop.permute.xlu2 %1106 }
 0x152   : > { %v4305_v35 = vpop.permute.xlu1 %1054  ;;  %1498 = vrot.lane.b32.xlu0 %v5773_v7, %s3150_s25 }
 0x153   : > { %5772 = vst [vmem:[#allocation10_spill] sm:$0xff] %v4305_v35 }
 0x154   : > { %v4309_v1 = vpop.permute.xlu0 %1064 }
 0x155   : > { %5774 = vst [vmem:[#allocation7_spill] sm:$0xff] %v4309_v1 }
 0x156   : > { %1402 = vrot.lane.b32.xlu2 %v3524_v4, %s3151_s26 }
 0x158   : > { %1306 = vrot.lane.b32.xlu1 %v3919_v57, %s3147_s22  ;;  %v4315_v26 = vpop.permute.xlu2 %1112  ;;  %v1947_v57 = vld [vmem:[%s5592_s3 + $0x20] sm:$0xf] }
 0x159   : > { %3012 = vmatpush.msk.msra.mxu0 %vm2045_vm7, %v1947_v57  ;;  %3067 = vmatpush.msk.msra.mxu2 %vm2045_vm7, %v1947_v57 }
 0x15a   : > { %v4317_v15 = vpop.permute.xlu1 %1060  ;;  %1308 = vrot.lane.b32.xlu0 %v3959_v5, %s3147_s22  ;;  %3066 = vmatpush.msk.msra.mxu1 %vm2045_vm7, %v1947_v57  ;;  %v1944_v57 = vld [vmem:[%s5592_s3 + $0x8] sm:$0xff] }
 0x15b   : > { %5775 = vst [vmem:[#allocation91_spill] sm:$0xff] %v4317_v15  ;;  %v5778_v15 = vld [vmem:[#allocation19_spill] sm:$0xff] }
 0x15c   : > { %v4321_v54 = vpop.permute.xlu0 %1070 }
 0x15d   : > { %5776 = vst [vmem:[#allocation92_spill] sm:$0xff] %v4321_v54 }
 0x15e   : > { %1212 = vrot.lane.b32.xlu2 %v5771_v14, %s3148_s23  ;;  %v1946_v14 = vld [vmem:[%s5592_s3 + $0x18] sm:$0xff] }
 0x15f   : > { %2061 = vmatpush.msra.mxu0 %v1946_v14  ;;  %3069 = vmatpush.msra.mxu2 %v1946_v14 }
 0x160   : > { %1594 = vrot.lane.b32.xlu1 %v3954_v51, %s3149_s24  ;;  %v4327_v35 = vpop.permute.xlu2 %1118  ;;  %3068 = vmatpush.msra.mxu1 %v1946_v14 }
 0x162   : > { %v4329_v4 = vpop.permute.xlu1 %1066  ;;  %1596 = vrot.lane.b32.xlu0 %v3940_v9, %s3149_s24 }
 0x163   : > { %5777 = vst [vmem:[#allocation93_spill] sm:$0xff] %v4329_v4  ;;  %v1945_v4 = vld [vmem:[%s5592_s3 + $0x10] sm:$0xff] }
 0x164   : > { %v4336_v5 = vpop.permute.xlu0 %1108  ;;  %2062 = vmatpush.msra.mxu0 %v1945_v4  ;;  %3071 = vmatpush.msra.mxu2 %v1945_v4 }
 0x165   : > { %3070 = vmatpush.msra.mxu1 %v1945_v4 }
 0x166   : > { %1500 = vrot.lane.b32.xlu2 %v5778_v15, %s3150_s25  ;;  %2063 = vmatpush.msra.mxu0 %v1944_v57 }
 0x167   : > { %3073 = vmatpush.msra.mxu2 %v1944_v57  ;;  %3072 = vmatpush.msra.mxu1 %v1944_v57  ;;  %v5779_v57 = vld [vmem:[#allocation15_spill] sm:$0xff] }
 0x168   : > { %1404 = vrot.lane.b32.xlu1 %v3626_v36, %s3151_s26  ;;  %v1201_v54 = vpop.permute.xlu2 %1200  ;;  %v1943_v36 = vld [vmem:[%s5592_s3] sm:$0xff] }
 0x169   : > { %2064 = vmatpush.msra.mxu0 %v1943_v36  ;;  %3075 = vmatpush.msra.mxu2 %v1943_v36 }
 0x16a   : > { %v1105_v31 = vpop.permute.xlu1 %1104  ;;  %1406 = vrot.lane.b32.xlu0 %v3586_v18, %s3151_s26  ;;  %3074 = vmatpush.msra.mxu1 %v1943_v36  ;;  %v5780_v36 = vld [vmem:[#allocation14_spill] sm:$0xff] }
 0x16c   : > { %v4359_v14 = vpop.permute.xlu0 %1114 }
 0x16e   : > { %1310 = vrot.lane.b32.xlu2 %v3954_v51, %s3147_s22 }
 0x170   : > { %1214 = vrot.lane.b32.xlu1 %v5773_v7, %s3148_s23  ;;  %v1489_v18 = vpop.permute.xlu2 %1488 }
 0x172   : > { %v4365_v4 = vpop.permute.xlu1 %1110  ;;  %1216 = vrot.lane.b32.xlu0 %v5778_v15, %s3148_s23 }
 0x174   : > { %v4369_v47 = vpop.permute.xlu0 %1120 }
 0x176   : > { %1598 = vrot.lane.b32.xlu2 %v3982_v37, %s3149_s24 }
 0x178   : > { %1502 = vrot.lane.b32.xlu1 %v5779_v57, %s3150_s25  ;;  %v1299_v1 = vpop.permute.xlu2 %1298 }
 0x17a   : > { %v4375_v51 = vpop.permute.xlu1 %1116  ;;  %1504 = vrot.lane.b32.xlu0 %v5780_v36, %s3150_s25 }
 0x17c   : > { %v1297_v7 = vpop.permute.xlu0 %1296 }
 0x17e   : > { %1408 = vrot.lane.b32.xlu2 %v5781_v61, %s3151_s26  ;;  %v1746_v61 = vsel %vm1745_vm8, %v1713_v30, %v1105_v31 }
 0x180   : > { %1312 = vrot.lane.b32.xlu1 %v3940_v9, %s3147_s22  ;;  %v1587_v15 = vpop.permute.xlu2 %1586  ;;  %v1779_v9 = vsel %vm1778_vm9, %v1746_v61, %v1201_v54  ;;  %v5783_v54 = vld [vmem:[#allocation26_spill] sm:$0xff]  ;;  %v3102_v61 = vld [vmem:[#allocation2 + $0x8] sm:$0xff] }
 0x181   : > { %v1812_v62 = vsel %vm1811_vm10, %v1779_v9, %v1297_v7  ;;  %v5785_v9 = vld [vmem:[#allocation50_spill] sm:$0xff] }
 0x182   : > { %v4383_v52 = vpop.permute.xlu1 %1122  ;;  %1314 = vrot.lane.b32.xlu0 %v3982_v37, %s3147_s22  ;;  %v1681_v32 = vsel %vm533_vm0, %v3102_v61, %v5785_v9 }
 0x184   : > { %v1585_v59 = vpop.permute.xlu0 %1584 }
 0x186   : > { %1218 = vrot.lane.b32.xlu2 %v5779_v57, %s3148_s23  ;;  %v5784_v57 = vld [vmem:[#allocation8_spill] sm:$0xff] }
 0x188   : > { %1600 = vrot.lane.b32.xlu1 %v3977_v43, %s3149_s24  ;;  %v1397_v37 = vpop.permute.xlu2 %1396 }
 0x18a   : > { %v1393_v48 = vpop.permute.xlu1 %1392  ;;  %1602 = vrot.lane.b32.xlu0 %v3964_v25, %s3149_s24 }
 0x18b   : > { %v1845_v30 = vsel %vm1844_vm11, %v1812_v62, %v1393_v48  ;;  %v1714_v62 = vsel %vm1712_vm6, %v1681_v32, %v4201_v40 }
 0x18c   : > { %v1395_v42 = vpop.permute.xlu0 %1394  ;;  %v1878_v31 = vsel %vm1877_vm12, %v1845_v30, %v1489_v18 }
 0x18d   : > { %v1911_v50 = vsel %vm1910_vm13, %v1878_v31, %v1585_v59  ;;  %v1747_v59 = vsel %vm1745_vm8, %v1714_v62, %v4303_v20 }
 0x18e   : > { %3013 = vmatmul.msk.f32.vlgmr.msra.gmra.mxu0 %vm1948_vm14, %v1911_v50  ;;  %1506 = vrot.lane.b32.xlu2 %v5783_v54, %s3150_s25  ;;  %v4420_v50 = vld [vmem:[#allocation2 + $0x90] sm:$0xff] }
 0x190   : > { %1410 = vrot.lane.b32.xlu1 %v5784_v57, %s3151_s26  ;;  %v1207_v7 = vpop.permute.xlu2 %1206 }
 0x192   : > { %v1203_v48 = vpop.permute.xlu1 %1202  ;;  %1316 = vrot.lane.b32.xlu0 %v3977_v43, %s3147_s22 }
 0x193   : > { %v1780_v18 = vsel %vm1778_vm9, %v1747_v59, %v1203_v48 }
 0x194   : > { %v1205_v30 = vpop.permute.xlu0 %1204  ;;  %v1813_v31 = vsel %vm1811_vm10, %v1780_v18, %v1299_v1  ;;  %v5786_v1 = vld [vmem:[#allocation24_spill] sm:$0xff] }
 0x195   : > { %v1846_v32 = vsel %vm1844_vm11, %v1813_v31, %v1395_v42 }
 0x196   : > { %1220 = vrot.lane.b32.xlu2 %v5780_v36, %s3148_s23  ;;  %v3104_v36 = vld [vmem:[#allocation2 + $0x18] sm:$0xff] }
 0x197   : > { %v1682_v9 = vsel %vm533_vm0, %v3104_v36, %v3996_v3 }
 0x198   : > { %1124 = vrot.lane.b32.xlu1 %v4420_v50, %s3146_s21  ;;  %v1495_v40 = vpop.permute.xlu2 %1494  ;;  %v1715_v62 = vsel %vm1712_vm6, %v1682_v9, %v4221_v2  ;;  %v4464_v9 = vld [vmem:[#allocation2 + $0xb0] sm:$0xff] }
 0x199   : > { %v1748_v48 = vsel %vm1745_vm8, %v1715_v62, %v4336_v5 }
 0x19a   : > { %v1491_v43 = vpop.permute.xlu1 %1490  ;;  %1604 = vrot.lane.b32.xlu0 %v4008_v6, %s3149_s24  ;;  %v1781_v59 = vsel %vm1778_vm9, %v1748_v48, %v1205_v30 }
 0x19b   : > { %v1879_v20 = vsel %vm1877_vm12, %v1846_v32, %v1491_v43  ;;  %v4447_v32 = vld [vmem:[#allocation2 + $0x98] sm:$0xff] }
 0x19c   : > { %v1493_v57 = vpop.permute.xlu0 %1492  ;;  %v1912_v61 = vsel %vm1910_vm13, %v1879_v20, %v1587_v15  ;;  %v5787_v20 = vld [vmem:[#allocation21_spill] sm:$0xff] }
 0x19d   : > { %3014 = vmatmul.msk.f32.gmra.mxu0 %vm1948_vm14, %v1912_v61 }
 0x19e   : > { %1508 = vrot.lane.b32.xlu2 %v5786_v1, %s3150_s25 }
 0x1a0   : > { %1412 = vrot.lane.b32.xlu1 %v3663_v34, %s3151_s26  ;;  %v1305_v42 = vpop.permute.xlu2 %1304 }
 0x1a2   : > { %v1301_v15 = vpop.permute.xlu1 %1300  ;;  %1318 = vrot.lane.b32.xlu0 %v3964_v25, %s3147_s22 }
 0x1a3   : > { %v1814_v18 = vsel %vm1811_vm10, %v1781_v59, %v1301_v15 }
 0x1a4   : > { %v1303_v31 = vpop.permute.xlu0 %1302  ;;  %v1847_v3 = vsel %vm1844_vm11, %v1814_v18, %v1397_v37  ;;  %v3108_v18 = vld [vmem:[#allocation2 + $0x30] sm:$0xff] }
 0x1a5   : > { %v1880_v25 = vsel %vm1877_vm12, %v1847_v3, %v1493_v57 }
 0x1a6   : > { %1222 = vrot.lane.b32.xlu2 %v5783_v54, %s3148_s23  ;;  %v3106_v54 = vld [vmem:[#allocation2 + $0x20] sm:$0xff] }
 0x1a7   : > { %v1683_v37 = vsel %vm533_vm0, %v3106_v54, %v4021_v41 }
 0x1a8   : > { %1126 = vrot.lane.b32.xlu1 %v4447_v32, %s3146_s21  ;;  %v1593_v2 = vpop.permute.xlu2 %1592  ;;  %v1716_v61 = vsel %vm1712_vm6, %v1683_v37, %v4183_v24 }
 0x1a9   : > { %v1749_v36 = vsel %vm1745_vm8, %v1716_v61, %v4365_v4 }
 0x1aa   : > { %v1589_v5 = vpop.permute.xlu1 %1588  ;;  %1606 = vrot.lane.b32.xlu0 %v4001_v63, %s3149_s24  ;;  %v1782_v62 = vsel %vm1778_vm9, %v1749_v36, %v1207_v7 }
 0x1ab   : > { %v1913_v30 = vsel %vm1910_vm13, %v1880_v25, %v1589_v5  ;;  %v1815_v48 = vsel %vm1811_vm10, %v1782_v62, %v1303_v31  ;;  %v5788_v31 = vld [vmem:[#allocation46_spill] sm:$0xff]  ;;  %v5791_v62 = vld [vmem:[#allocation47_spill] sm:$0xff] }
 0x1ac   : > { %3015 = vmatmul.msk.f32.gmra.mxu0 %vm1948_vm14, %v1913_v30  ;;  %v1591_v43 = vpop.permute.xlu0 %1590 }
 0x1ae   : > { %1510 = vrot.lane.b32.xlu2 %v5787_v20, %s3150_s25 }
 0x1b0   : > { %1414 = vrot.lane.b32.xlu1 %v4464_v9, %s3151_s26  ;;  %v1403_v57 = vpop.permute.xlu2 %1402 }
 0x1b2   : > { %v1399_v41 = vpop.permute.xlu1 %1398  ;;  %1320 = vrot.lane.b32.xlu0 %v4008_v6, %s3147_s22  ;;  %v1684_v6 = vsel %vm533_vm0, %v3108_v18, %v5788_v31  ;;  %v3110_v18 = vld [vmem:[%s5590_s1] ss:$0 sm:$0xff] }
 0x1b3   : > { %v1848_v15 = vsel %vm1844_vm11, %v1815_v48, %v1399_v41  ;;  %v1717_v3 = vsel %vm1712_vm6, %v1684_v6, %v4213_v0 }
 0x1b4   : > { %v1401_v24 = vpop.permute.xlu0 %1400  ;;  %v1881_v59 = vsel %vm1877_vm12, %v1848_v15, %v1495_v40  ;;  %v1750_v40 = vsel %vm1745_vm8, %v1717_v3, %v4315_v26 }
 0x1b5   : > { %v1914_v4 = vsel %vm1910_vm13, %v1881_v59, %v1591_v43  ;;  %v5790_v43 = vld [vmem:[#allocation28_spill] sm:$0xff] }
 0x1b6   : > { %3016 = vmatmul.msk.f32.gmra.mxu0 %vm1948_vm14, %v1914_v4  ;;  %1224 = vrot.lane.b32.xlu2 %v5786_v1, %s3148_s23 }
 0x1b8   : > { %1128 = vrot.lane.b32.xlu1 %v3663_v34, %s3146_s21  ;;  %v1213_v7 = vpop.permute.xlu2 %1212  ;;  %v5789_v34 = vld [vmem:[#allocation32_spill] sm:$0xff] }
 0x1ba   : > { %v1209_v5 = vpop.permute.xlu1 %1208  ;;  %1608 = vrot.lane.b32.xlu0 %v3987_v11, %s3149_s24 }
 0x1bb   : > { %v1783_v1 = vsel %vm1778_vm9, %v1750_v40, %v1209_v5  ;;  %v5793_v5 = vld [vmem:[#allocation25_spill] sm:$0xff] }
 0x1bc   : > { %v1211_v25 = vpop.permute.xlu0 %1210  ;;  %v1816_v30 = vsel %vm1811_vm10, %v1783_v1, %v1305_v42  ;;  %v3109_v42 = vld [vmem:[#allocation2 + $0x38] sm:$0xff] }
 0x1bd   : > { %v1849_v0 = vsel %vm1844_vm11, %v1816_v30, %v1401_v24  ;;  %v1685_v48 = vsel %vm533_vm0, %v3109_v42, %v5791_v62  ;;  %v363_v24 = vld [vmem:[%s3296_s15 + $0xf0] sm:$0xff] }
 0x1be   : > { %1512 = vrot.lane.b32.xlu2 %v5789_v34, %s3150_s25  ;;  %v399_v31 = vmul.f32 %v3110_v18, %v363_v24  ;;  %v5794_v42 = vld [vmem:[#allocation52_spill] sm:$0xff] }
 0x1c0   : > { %1416 = vrot.lane.b32.xlu1 %v5790_v43, %s3151_s26  ;;  %v1501_v54 = vpop.permute.xlu2 %1500 }
 0x1c2   : > { %v1497_v37 = vpop.permute.xlu1 %1496  ;;  %1322 = vrot.lane.b32.xlu0 %v4001_v63, %s3147_s22  ;;  %v1718_v63 = vsel %vm1712_vm6, %v1685_v48, %v4233_v10  ;;  %v5792_v10 = vld [vmem:[#allocation31_spill] sm:$0xff] }
 0x1c3   : > { %v1882_v26 = vsel %vm1877_vm12, %v1849_v0, %v1497_v37  ;;  %v5795_v48 = vld [vmem:[#allocation43_spill] sm:$0xff] }
 0x1c4   : > { %v1499_v61 = vpop.permute.xlu0 %1498  ;;  %v1915_v36 = vsel %vm1910_vm13, %v1882_v26, %v1593_v2  ;;  %v1751_v2 = vsel %vm1745_vm8, %v1718_v63, %v4359_v14  ;;  %v3111_v14 = vld [vmem:[%s5591_s2] ss:$0 sm:$0xff]  ;;  %v364_v26 = vld [vmem:[%s3296_s15 + $0xf8] sm:$0xff] }
 0x1c5   : > { %3017 = vmatmul.msk.f32.gmra.mxu0 %vm1948_vm14, %v1915_v36  ;;  %v435_v6 = vadd.f32 %v3111_v14, %v399_v31  ;;  %v3112_v36 = vld [vmem:[#allocation2 + $0x48] sm:$0xff] }
 0x1c6   : > { %1226 = vrot.lane.b32.xlu2 %v5787_v20, %s3148_s23  ;;  %v1784_v20 = vsel %vm1778_vm9, %v1751_v2, %v1211_v25  ;;  %v1686_v62 = vsel %vm533_vm0, %v3112_v36, %v5794_v42  ;;  %v5797_v36 = vld [vmem:[#allocation27_spill] sm:$0xff]  ;;  %v5798_v42 = vld [vmem:[#allocation49_spill] sm:$0xff] }
 0x1c7   : > { %v499_v1 = vmul.f32 0.1, %v435_v6  ;;  %vm467_vm15 = vcmp.gt.f32.partialorder %v435_v6, 0.0 }
 0x1c8   : > { %1130 = vrot.lane.b32.xlu1 %v4464_v9, %s3146_s21  ;;  %v4506_v41 = vpop.permute.xlu2 %1310 }
 0x1c9   : > { %v4531_v0 = vsel %vm467_vm15, %v435_v6, %v499_v1 }
 0x1ca   : > { %v1307_v15 = vpop.permute.xlu1 %1306  ;;  %1610 = vrot.lane.b32.xlu0 %v4033_v27, %s3149_s24  ;;  %620 = vst.msk [vmem:[#allocation2 + $0x181] sm:$0xff] %vm533_vm0, %v4531_v0 }
 0x1cb   : > { %v1817_v59 = vsel %vm1811_vm10, %v1784_v20, %v1307_v15 }
 0x1cc   : > { %v1309_v4 = vpop.permute.xlu0 %1308  ;;  %v1850_v3 = vsel %vm1844_vm11, %v1817_v59, %v1403_v57 }
 0x1cd   : > { %v1883_v30 = vsel %vm1877_vm12, %v1850_v3, %v1499_v61  ;;  %v1719_v61 = vsel %vm1712_vm6, %v1686_v62, %v4195_v55  ;;  %v4568_v3 = vld [vmem:[#allocation2 + $0xd8] sm:$0xff] }
 0x1ce   : > { %1514 = vrot.lane.b32.xlu2 %v5792_v10, %s3150_s25  ;;  %v1752_v63 = vsel %vm1745_vm8, %v1719_v61, %v4375_v51 }
 0x1cf   : > { %v1785_v20 = vsel %vm1778_vm9, %v1752_v63, %v1213_v7  ;;  %v3113_v7 = vld [vmem:[#allocation2 + $0x50] sm:$0xff]  ;;  %v4597_v63 = vld [vmem:[#allocation2 + $0xc8] sm:$0xff] }
 0x1d0   : > { %1418 = vrot.lane.b32.xlu1 %v5793_v5, %s3151_s26  ;;  %v1599_v40 = vpop.permute.xlu2 %1598  ;;  %v1818_v24 = vsel %vm1811_vm10, %v1785_v20, %v1309_v4 }
 0x1d2   : > { %v1595_v25 = vpop.permute.xlu1 %1594  ;;  %1132 = vrot.lane.b32.xlu0 %v5790_v43, %s3146_s21  ;;  %v400_v43 = vmul.f32 %v3110_v18, %v364_v26 }
 0x1d3   : > { %v1916_v37 = vsel %vm1910_vm13, %v1883_v30, %v1595_v25  ;;  %v5796_v25 = vld [vmem:[#allocation45_spill] sm:$0xff] }
 0x1d4   : > { %3018 = vmatmul.msk.f32.gmra.mxu0 %vm1948_vm14, %v1916_v37  ;;  %v1597_v57 = vpop.permute.xlu0 %1596  ;;  %v436_v15 = vadd.f32 %v3111_v14, %v400_v43 }
 0x1d6   : > { %1254 = vrot.lane.b32.xlu2 %v5795_v48, %s3148_s23  ;;  %vm468_vm2 = vcmp.gt.f32.partialorder %v436_v15, 0.0  ;;  %v500_v18 = vmul.f32 0.1, %v436_v15 }
 0x1d8   : > { %1158 = vrot.lane.b32.xlu1 %v3852_v19, %s3146_s21  ;;  %v1409_v2 = vpop.permute.xlu2 %1408  ;;  %v4554_v6 = vsel %vm468_vm2, %v436_v15, %v500_v18 }
 0x1d9   : > { %621 = vst.msk [vmem:[#allocation2 + $0x189] sm:$0xff] %vm533_vm0, %v4554_v6 }
 0x1da   : > { %v1405_v59 = vpop.permute.xlu1 %1404  ;;  %1446 = vrot.lane.b32.xlu0 %v3842_v44, %s3151_s26 }
 0x1db   : > { %v1851_v55 = vsel %vm1844_vm11, %v1818_v24, %v1405_v59  ;;  %v5799_v59 = vld [vmem:[#allocation42_spill] sm:$0xff] }
 0x1dc   : > { %v1407_v31 = vpop.permute.xlu0 %1406  ;;  %v1884_v51 = vsel %vm1877_vm12, %v1851_v55, %v1501_v54  ;;  %v1687_v54 = vsel %vm533_vm0, %v3113_v7, %v4047_v13 }
 0x1dd   : > { %v1917_v19 = vsel %vm1910_vm13, %v1884_v51, %v1597_v57  ;;  %v1720_v4 = vsel %vm1712_vm6, %v1687_v54, %v4225_v38 }
 0x1de   : > { %3019 = vmatmul.msk.f32.gmra.mxu0 %vm1948_vm14, %v1917_v19  ;;  %1228 = vrot.lane.b32.xlu2 %v5789_v34, %s3148_s23  ;;  %v1753_v34 = vsel %vm1745_vm8, %v1720_v4, %v4327_v35 }
 0x1e0   : > { %1350 = vrot.lane.b32.xlu1 %v4153_v23, %s3147_s22  ;;  %v1219_v44 = vpop.permute.xlu2 %1218  ;;  %v4615_v7 = vld [vmem:[#allocation2 + $0x188] sm:$0xff] }
 0x1e2   : > { %v1215_v14 = vpop.permute.xlu1 %1214  ;;  %1420 = vrot.lane.b32.xlu0 %v4568_v3, %s3151_s26 }
 0x1e3   : > { %v1786_v5 = vsel %vm1778_vm9, %v1753_v34, %v1215_v14  ;;  %v890_v14 = vrot.slane %v4615_v7, 1 }
 0x1e4   : > { %v1217_v1 = vpop.permute.xlu0 %1216  ;;  %v1819_v13 = vsel %vm1811_vm10, %v1786_v5, %v4506_v41  ;;  %v3115_v41 = vld [vmem:[#allocation2 + $0x60] sm:$0xff] }
 0x1e5   : > { %v1852_v30 = vsel %vm1844_vm11, %v1819_v13, %v1407_v31 }
 0x1e6   : > { %1542 = vrot.lane.b32.xlu2 %v5796_v25, %s3150_s25 }
 0x1e8   : > { %1324 = vrot.lane.b32.xlu1 %v3987_v11, %s3147_s22  ;;  %v1507_v38 = vpop.permute.xlu2 %1506  ;;  %v1688_v11 = vsel %vm533_vm0, %v3115_v41, %v5798_v42  ;;  %v3119_v41 = vld [vmem:[#allocation2 + $0x78] sm:$0xff] }
 0x1e9   : > { %v1721_v43 = vsel %vm1712_vm6, %v1688_v11, %v4245_v17  ;;  %v4606_v17 = vld [vmem:[#allocation2 + $0x180] sm:$0xff]  ;;  %v1690_v42 = vsel %vm533_vm0, %v3119_v41, %v4074_v16 }
 0x1ea   : > { %v1503_v37 = vpop.permute.xlu1 %1502  ;;  %1612 = vrot.lane.b32.xlu0 %v4026_v49, %s3149_s24  ;;  %v1754_v61 = vsel %vm1745_vm8, %v1721_v43, %v4369_v47  ;;  %v889_v4 = vrot.slane %v4606_v17, 1  ;;  %v1723_v11 = vsel %vm1712_vm6, %v1690_v42, %v4237_v28 }
 0x1eb   : > { %v1885_v35 = vsel %vm1877_vm12, %v1852_v30, %v1503_v37  ;;  %v1787_v15 = vsel %vm1778_vm9, %v1754_v61, %v1217_v1 }
 0x1ec   : > { %v1505_v57 = vpop.permute.xlu0 %1504  ;;  %v1918_v26 = vsel %vm1910_vm13, %v1885_v35, %v1599_v40 }
 0x1ed   : > { %3020 = vmatmul.msk.f32.gmra.mxu0 %vm1948_vm14, %v1918_v26  ;;  %v895_v26 = vrot.slane %v4615_v7, 2 }
 0x1ee   : > { %1516 = vrot.lane.b32.xlu2 %v5797_v36, %s3150_s25 }
 0x1f0   : > { %1638 = vrot.lane.b32.xlu1 %v4135_v53, %s3149_s24  ;;  %v1221_v62 = vpop.permute.xlu2 %1220 }
 0x1f2   : > { %v1313_v40 = vpop.permute.xlu1 %1312  ;;  %1134 = vrot.lane.b32.xlu0 %v4597_v63, %s3146_s21 }
 0x1f3   : > { %v1820_v20 = vsel %vm1811_vm10, %v1787_v15, %v1313_v40  ;;  %v5800_v40 = vld [vmem:[#allocation35_spill] sm:$0xff] }
 0x1f4   : > { %v1315_v24 = vpop.permute.xlu0 %1314  ;;  %v1853_v18 = vsel %vm1844_vm11, %v1820_v20, %v1409_v2  ;;  %v3117_v2 = vld [vmem:[#allocation2 + $0x68] sm:$0xff] }
 0x1f5   : > { %v1886_v31 = vsel %vm1877_vm12, %v1853_v18, %v1505_v57  ;;  %v1689_v54 = vsel %vm533_vm0, %v3117_v2, %v4030_v58  ;;  %v894_v57 = vrot.slane %v4606_v17, 2 }
 0x1f6   : > { %1256 = vrot.lane.b32.xlu2 %v5799_v59, %s3148_s23 }
 0x1f8   : > { %1160 = vrot.lane.b32.xlu1 %v3840_v8, %s3146_s21  ;;  %v1509_v47 = vpop.permute.xlu2 %1508  ;;  %v1722_v8 = vsel %vm1712_vm6, %v1689_v54, %v4207_v56  ;;  %v3122_v54 = vld [vmem:[#allocation2 + $0x80] sm:$0xff] }
 0x1f9   : > { %v1755_v34 = vsel %vm1745_vm8, %v1722_v8, %v4383_v52  ;;  %v4639_v52 = vsel %vm724_vm1, %v889_v4, %v890_v14  ;;  %v5802_v8 = vld [vmem:[#allocation51_spill] sm:$0xff] }
 0x1fa   : > { %v1601_v55 = vpop.permute.xlu1 %1600  ;;  %1448 = vrot.lane.b32.xlu0 %v4606_v17, %s3151_s26  ;;  %v1788_v1 = vsel %vm1778_vm9, %v1755_v34, %v1219_v44  ;;  %v1691_v4 = vsel %vm533_vm0, %v3122_v54, %v5802_v8 }
 0x1fb   : > { %v1919_v51 = vsel %vm1910_vm13, %v1886_v31, %v1601_v55  ;;  %v1821_v58 = vsel %vm1811_vm10, %v1788_v1, %v1315_v24  ;;  %v5801_v24 = vld [vmem:[#allocation36_spill] sm:$0xff]  ;;  %v1724_v34 = vsel %vm1712_vm6, %v1691_v4, %v4257_v46 }
 0x1fc   : > { %3021 = vmatmul.msk.f32.gmra.mxu0 %vm1948_vm14, %v1919_v51  ;;  %v1603_v19 = vpop.permute.xlu0 %1602 }
 0x1fe   : > { %1230 = vrot.lane.b32.xlu2 %v5792_v10, %s3148_s23  ;;  %v4631_v10 = vld [vmem:[#allocation2 + $0xe0] sm:$0xff] }
 0x200   : > { %1352 = vrot.lane.b32.xlu1 %v4148_v45, %s3147_s22  ;;  %v1223_v5 = vpop.permute.xlu2 %1222 }
 0x202   : > { %v1411_v13 = vpop.permute.xlu1 %1410  ;;  %1422 = vrot.lane.b32.xlu0 %v4631_v10, %s3151_s26 }
 0x203   : > { %v1854_v56 = vsel %vm1844_vm11, %v1821_v58, %v1411_v13 }
 0x204   : > { %v1317_v30 = vpop.permute.xlu0 %1316  ;;  %v1887_v37 = vsel %vm1877_vm12, %v1854_v56, %v1507_v38 }
 0x205   : > { %v1920_v44 = vsel %vm1910_vm13, %v1887_v37, %v1603_v19  ;;  %v4678_v19 = vld [vmem:[#allocation2 + $0x120] sm:$0xff] }
 0x206   : > { %3022 = vmatmul.msk.f32.gmra.mxu0 %vm1948_vm14, %v1920_v44  ;;  %1544 = vrot.lane.b32.xlu2 %v4639_v52, %s3150_s25  ;;  %v4695_v44 = vld [vmem:[#allocation2 + $0x138] sm:$0xff] }
 0x208   : > { %1326 = vrot.lane.b32.xlu1 %v4033_v27, %s3147_s22  ;;  %v1511_v35 = vpop.permute.xlu2 %1510  ;;  %v4660_v27 = vsel %vm805_vm5, %v894_v57, %v895_v26 }
 0x20a   : > { %v1125_v38 = vpop.permute.xlu1 %1124  ;;  %1614 = vrot.lane.b32.xlu0 %v4013_v22, %s3149_s24 }
 0x20b   : > { %v1756_v43 = vsel %vm1745_vm8, %v1723_v11, %v1125_v38  ;;  %v5803_v11 = vld [vmem:[#allocation40_spill] sm:$0xff] }
 0x20c   : > { %v1605_v61 = vpop.permute.xlu0 %1604  ;;  %v1789_v16 = vsel %vm1778_vm9, %v1756_v43, %v1221_v62  ;;  %v4674_v62 = vld [vmem:[#allocation2 + $0x170] sm:$0xff] }
 0x20d   : > { %v1822_v20 = vsel %vm1811_vm10, %v1789_v16, %v1317_v30 }
 0x20e   : > { %1518 = vrot.lane.b32.xlu2 %v5800_v40, %s3150_s25 }
 0x210   : > { %1640 = vrot.lane.b32.xlu1 %v4660_v27, %s3149_s24  ;;  %v1225_v15 = vpop.permute.xlu2 %1224 }
 0x212   : > { %v1413_v28 = vpop.permute.xlu1 %1412  ;;  %1244 = vrot.lane.b32.xlu0 %v5801_v24, %s3148_s23 }
 0x213   : > { %v1855_v18 = vsel %vm1844_vm11, %v1822_v20, %v1413_v28 }
 0x214   : > { %v1319_v55 = vpop.permute.xlu0 %1318  ;;  %v1888_v31 = vsel %vm1877_vm12, %v1855_v18, %v1509_v47 }
 0x215   : > { %v1921_v51 = vsel %vm1910_vm13, %v1888_v31, %v1605_v61 }
 0x216   : > { %3023 = vmatmul.msk.f32.gmra.mxu0 %vm1948_vm14, %v1921_v51  ;;  %1162 = vrot.lane.b32.xlu2 %v4674_v62, %s3146_s21 }
 0x218   : > { %1148 = vrot.lane.b32.xlu1 %v4678_v19, %s3146_s21  ;;  %v1513_v2 = vpop.permute.xlu2 %1512 }
 0x21a   : > { %v1127_v47 = vpop.permute.xlu1 %1126  ;;  %1340 = vrot.lane.b32.xlu0 %v4081_v39, %s3147_s22 }
 0x21b   : > { %v1757_v1 = vsel %vm1745_vm8, %v1724_v34, %v1127_v47 }
 0x21c   : > { %v1607_v58 = vpop.permute.xlu0 %1606  ;;  %v1790_v13 = vsel %vm1778_vm9, %v1757_v1, %v1223_v5  ;;  %v1692_v5 = vsel %vm533_vm0, %v4420_v50, %v4056_v29  ;;  %v5805_v1 = vld [vmem:[#allocation34_spill] sm:$0xff] }
 0x21d   : > { %v1823_v30 = vsel %vm1811_vm10, %v1790_v13, %v1319_v55  ;;  %v4734_v55 = vld [vmem:[#allocation2 + $0xf0] sm:$0xff] }
 0x21e   : > { %1136 = vrot.lane.b32.xlu2 %v4568_v3, %s3146_s21 }
 0x220   : > { %1258 = vrot.lane.b32.xlu1 %v5796_v25, %s3148_s23  ;;  %v1227_v56 = vpop.permute.xlu2 %1226 }
 0x222   : > { %v1415_v37 = vpop.permute.xlu1 %1414  ;;  %1436 = vrot.lane.b32.xlu0 %v4695_v44, %s3151_s26 }
 0x223   : > { %v1856_v46 = vsel %vm1844_vm11, %v1823_v30, %v1415_v37  ;;  %v5806_v30 = vld [vmem:[#allocation41_spill] sm:$0xff] }
 0x224   : > { %v1321_v57 = vpop.permute.xlu0 %1320  ;;  %v1889_v41 = vsel %vm1877_vm12, %v1856_v46, %v1511_v35  ;;  %v1725_v35 = vsel %vm1712_vm6, %v1692_v5, %v4219_v60  ;;  %v5807_v5 = vld [vmem:[#allocation57_spill] sm:$0xff] }
 0x225   : > { %v1922_v42 = vsel %vm1910_vm13, %v1889_v41, %v1607_v58 }
 0x226   : > { %3024 = vmatmul.msk.f32.gmra.mxu0 %vm1948_vm14, %v1922_v42  ;;  %1232 = vrot.lane.b32.xlu2 %v5797_v36, %s3148_s23  ;;  %v672_v36 = vld [vmem:[#allocation2 + $0x190] sm:$0x3] }
 0x227   : > { %v892_v50 = vrot.slane %v672_v36, 1  ;;  %v897_v51 = vrot.slane %v672_v36, 2  ;;  %v5808_v36 = vld [vmem:[#allocation53_spill] sm:$0xff] }
 0x228   : > { %1354 = vrot.lane.b32.xlu1 %v4135_v53, %s3147_s22  ;;  %v1515_v25 = vpop.permute.xlu2 %1514 }
 0x229   : > { %v4751_v34 = vsel %vm805_vm5, %v895_v26, %v897_v51 }
 0x22a   : > { %v1129_v38 = vpop.permute.xlu1 %1128  ;;  %1532 = vrot.lane.b32.xlu0 %v5803_v11, %s3150_s25 }
 0x22b   : > { %v1758_v43 = vsel %vm1745_vm8, %v1725_v35, %v1129_v38  ;;  %v4779_v35 = vld [vmem:[#allocation2 + $0x140] sm:$0xff] }
 0x22c   : > { %v1609_v61 = vpop.permute.xlu0 %1608  ;;  %v1791_v53 = vsel %vm1778_vm9, %v1758_v43, %v1225_v15  ;;  %v4731_v15 = vsel %vm724_vm1, %v890_v14, %v892_v50  ;;  %v5804_v14 = vld [vmem:[#allocation79_spill] sm:$0xff]  ;;  %v5809_v50 = vld [vmem:[#allocation72_spill] sm:$0xff] }
 0x22d   : > { %v1824_v16 = vsel %vm1811_vm10, %v1791_v53, %v1321_v57 }
 0x22e   : > { %1328 = vrot.lane.b32.xlu2 %v4026_v49, %s3147_s22 }
 0x230   : > { %1450 = vrot.lane.b32.xlu1 %v4615_v7, %s3151_s26  ;;  %v4720_v29 = vpop.permute.xlu2 %1254 }
 0x232   : > { %v1417_v20 = vpop.permute.xlu1 %1416  ;;  %1628 = vrot.lane.b32.xlu0 %v4130_v21, %s3149_s24 }
 0x233   : > { %v1857_v60 = vsel %vm1844_vm11, %v1824_v16, %v1417_v20  ;;  %v1707_v16 = vsel %vm533_vm0, %v4779_v35, %v5809_v50  ;;  %v5810_v20 = vld [vmem:[#allocation83_spill] sm:$0xff]  ;;  %v5814_v50 = vld [vmem:[#allocation56_spill] sm:$0xff] }
 0x234   : > { %v1323_v28 = vpop.permute.xlu0 %1322  ;;  %v1890_v49 = vsel %vm1877_vm12, %v1857_v60, %v1513_v2  ;;  %v1693_v2 = vsel %vm533_vm0, %v4447_v32, %v4116_v33  ;;  %v5811_v60 = vld [vmem:[#allocation85_spill] sm:$0xff] }
 0x235   : > { %v1923_v18 = vsel %vm1910_vm13, %v1890_v49, %v1609_v61  ;;  %v1726_v8 = vsel %vm1712_vm6, %v1693_v2, %v5804_v14  ;;  %v3127_v61 = vld [vmem:[#allocation2 + $0xa8] sm:$0xff] }
 0x236   : > { %3025 = vmatmul.msk.f32.gmra.mxu0 %vm1948_vm14, %v1923_v18  ;;  %1424 = vrot.lane.b32.xlu2 %v4734_v55, %s3151_s26  ;;  %v1694_v53 = vsel %vm533_vm0, %v3127_v61, %v5808_v36  ;;  %v5812_v14 = vld [vmem:[#allocation39_spill] sm:$0xff] }
 0x238   : > { %1546 = vrot.lane.b32.xlu1 %v4731_v15, %s3150_s25  ;;  %v1229_v31 = vpop.permute.xlu2 %1228 }
 0x23a   : > { %v1131_v54 = vpop.permute.xlu1 %1130  ;;  %1616 = vrot.lane.b32.xlu0 %v4059_v12, %s3149_s24 }
 0x23b   : > { %v1759_v4 = vsel %vm1745_vm8, %v1726_v8, %v1131_v54 }
 0x23c   : > { %v1611_v47 = vpop.permute.xlu0 %1610  ;;  %v1792_v33 = vsel %vm1778_vm9, %v1759_v4, %v1227_v56  ;;  %v4767_v56 = vld [vmem:[#allocation2 + $0x128] sm:$0xff] }
 0x23d   : > { %v1825_v58 = vsel %vm1811_vm10, %v1792_v33, %v1323_v28  ;;  %v1740_v28 = vsel %vm1712_vm6, %v1707_v16, %v5811_v60 }
 0x23e   : > { %1520 = vrot.lane.b32.xlu2 %v5805_v1, %s3150_s25 }
 0x240   : > { %1642 = vrot.lane.b32.xlu1 %v4751_v34, %s3149_s24  ;;  %v1543_v32 = vpop.permute.xlu2 %1542 }
 0x242   : > { %v1419_v13 = vpop.permute.xlu1 %1418  ;;  %1246 = vrot.lane.b32.xlu0 %v5806_v30, %s3148_s23 }
 0x243   : > { %v1858_v37 = vsel %vm1844_vm11, %v1825_v58, %v1419_v13 }
 0x244   : > { %v1133_v46 = vpop.permute.xlu0 %1132  ;;  %v1891_v26 = vsel %vm1877_vm12, %v1858_v37, %v1515_v25 }
 0x245   : > { %v1924_v57 = vsel %vm1910_vm13, %v1891_v26, %v1611_v47 }
 0x246   : > { %3026 = vmatmul.msk.f32.gmra.mxu0 %vm1948_vm14, %v1924_v57  ;;  %1164 = vrot.lane.b32.xlu2 %v4606_v17, %s3146_s21 }
 0x248   : > { %1150 = vrot.lane.b32.xlu1 %v4767_v56, %s3146_s21  ;;  %v1517_v41 = vpop.permute.xlu2 %1516 }
 0x24a   : > { %v1159_v42 = vpop.permute.xlu1 %1158  ;;  %1342 = vrot.lane.b32.xlu0 %v5807_v5, %s3147_s22 }
 0x24b   : > { %v1773_v18 = vsel %vm1745_vm8, %v1740_v28, %v1159_v42 }
 0x24c   : > { %v1447_v38 = vpop.permute.xlu0 %1446 }
 0x24e   : > { %1138 = vrot.lane.b32.xlu2 %v4631_v10, %s3146_s21 }
 0x250   : > { %1260 = vrot.lane.b32.xlu1 %v4639_v52, %s3148_s23  ;;  %v4777_v25 = vpop.permute.xlu2 %1256  ;;  %v1727_v52 = vsel %vm1712_vm6, %v1694_v53, %v5810_v20 }
 0x251   : > { %v1760_v49 = vsel %vm1745_vm8, %v1727_v52, %v1133_v46  ;;  %v5815_v52 = vld [vmem:[#allocation33_spill] sm:$0xff] }
 0x252   : > { %v1351_v17 = vpop.permute.xlu1 %1350  ;;  %1438 = vrot.lane.b32.xlu0 %v4779_v35, %s3151_s26  ;;  %v1793_v2 = vsel %vm1778_vm9, %v1760_v49, %v1229_v31  ;;  %v4810_v31 = vld [vmem:[#allocation2 + $0x1a0] sm:$0xff] }
 0x253   : > { %v903_v26 = vrot.slane %v4810_v31, 1 }
 0x254   : > { %v1421_v43 = vpop.permute.xlu0 %1420 }
 0x256   : > { %1234 = vrot.lane.b32.xlu2 %v5800_v40, %s3148_s23  ;;  %v1806_v40 = vsel %vm1778_vm9, %v1773_v18, %v4720_v29  ;;  %v5816_v18 = vld [vmem:[#allocation59_spill] sm:$0xff] }
 0x257   : > { %v1839_v4 = vsel %vm1811_vm10, %v1806_v40, %v1351_v17  ;;  %v5817_v40 = vld [vmem:[#allocation75_spill] sm:$0xff] }
 0x258   : > { %1356 = vrot.lane.b32.xlu1 %v4660_v27, %s3147_s22  ;;  %v1231_v51 = vpop.permute.xlu2 %1230  ;;  %v673_v27 = vld [vmem:[#allocation2 + $0x198] sm:$0xff]  ;;  %v1872_v37 = vsel %vm1844_vm11, %v1839_v4, %v1447_v38 }
 0x259   : > { %v902_v46 = vrot.slane %v673_v27, 1  ;;  %v1905_v42 = vsel %vm1877_vm12, %v1872_v37, %v1543_v32  ;;  %v907_v36 = vrot.slane %v673_v27, 2  ;;  %v908_v32 = vrot.slane %v4810_v31, 2  ;;  %v5818_v4 = vld [vmem:[#allocation77_spill] sm:$0xff] }
 0x25a   : > { %v1325_v54 = vpop.permute.xlu1 %1324  ;;  %1534 = vrot.lane.b32.xlu0 %v5812_v14, %s3150_s25 }
 0x25b   : > { %v1826_v8 = vsel %vm1811_vm10, %v1793_v2, %v1325_v54  ;;  %v904_v38 = vsel %vm724_vm1, %v902_v46, %v903_v26  ;;  %v909_v20 = vsel %vm805_vm5, %v907_v36, %v908_v32  ;;  %v1695_v2 = vsel %vm533_vm0, %v4464_v9, %v5816_v18  ;;  %v4845_v54 = vld [vmem:[#allocation2 + $0x150] sm:$0xff]  ;;  %v675_v18 = vld [vmem:[#allocation2 + $0x1a8] sm:$0x3] }
 0x25c   : > { %v1859_v47 = vsel %vm1844_vm11, %v1826_v8, %v1421_v43  ;;  %v1613_v33 = vpop.permute.xlu0 %1612  ;;  %v4824_v43 = vld [vmem:[#allocation2 + $0xf8] sm:$0xff]  ;;  %v1708_v8 = vsel %vm533_vm0, %v4845_v54, %v5817_v40 }
 0x25d   : > { %v1892_v58 = vsel %vm1877_vm12, %v1859_v47, %v1517_v41  ;;  %v5813_v41 = vld [vmem:[#allocation63_spill] sm:$0xff]  ;;  %v1728_v47 = vsel %vm1712_vm6, %v1695_v2, %v5818_v4 }
 0x25e   : > { %v1925_v13 = vsel %vm1910_vm13, %v1892_v58, %v1613_v33  ;;  %1330 = vrot.lane.b32.xlu2 %v4013_v22, %s3147_s22  ;;  %v5819_v33 = vld [vmem:[#allocation7_spill] sm:$0xff] }
 0x25f   : > { %3027 = vmatmul.msk.f32.gmra.mxu0 %vm1948_vm14, %v1925_v13 }
 0x260   : > { %1452 = vrot.lane.b32.xlu1 %v673_v27, %s3151_s26  ;;  %v1545_v29 = vpop.permute.xlu2 %1544 }
 0x262   : > { %v1639_v57 = vpop.permute.xlu1 %1638  ;;  %1630 = vrot.lane.b32.xlu0 %v5813_v41, %s3149_s24 }
 0x263   : > { %v1938_v22 = vsel %vm1910_vm13, %v1905_v42, %v1639_v57 }
 0x264   : > { %3040 = vmatmul.msk.f32.vlgmr.msra.gmra.mxu2 %vm1948_vm14, %v1938_v22  ;;  %v1135_v17 = vpop.permute.xlu0 %1134 }
 0x265   : > { %v1761_v58 = vsel %vm1745_vm8, %v1728_v47, %v1135_v17 }
 0x266   : > { %1426 = vrot.lane.b32.xlu2 %v4824_v43, %s3151_s26  ;;  %v1794_v13 = vsel %vm1778_vm9, %v1761_v58, %v1231_v51  ;;  %v5822_v58 = vld [vmem:[#allocation71_spill] sm:$0xff] }
 0x268   : > { %1548 = vrot.lane.b32.xlu1 %v904_v38, %s3150_s25  ;;  %v1519_v61 = vpop.permute.xlu2 %1518 }
 0x26a   : > { %v1161_v53 = vpop.permute.xlu1 %1160  ;;  %1618 = vrot.lane.b32.xlu0 %v5814_v50, %s3149_s24 }
 0x26c   : > { %v1449_v16 = vpop.permute.xlu0 %1448 }
 0x26e   : > { %1522 = vrot.lane.b32.xlu2 %v5815_v52, %s3150_s25 }
 0x270   : > { %1644 = vrot.lane.b32.xlu1 %v909_v20, %s3149_s24  ;;  %v4838_v60 = vpop.permute.xlu2 %1162 }
 0x272   : > { %v1353_v28 = vpop.permute.xlu1 %1352  ;;  %1248 = vrot.lane.b32.xlu0 %v5803_v11, %s3148_s23  ;;  %v1741_v11 = vsel %vm1712_vm6, %v1708_v8, %v5819_v33  ;;  %v4904_v33 = vld [vmem:[#allocation2 + $0x108] sm:$0xff] }
 0x273   : > { %v1774_v27 = vsel %vm1745_vm8, %v1741_v11, %v1161_v53  ;;  %v910_v11 = vrot.slane %v675_v18, 2 }
 0x274   : > { %v1423_v49 = vpop.permute.xlu0 %1422 }
 0x276   : > { %1166 = vrot.lane.b32.xlu2 %v4615_v7, %s3146_s21  ;;  %v1807_v7 = vsel %vm1778_vm9, %v1774_v27, %v4777_v25  ;;  %v1702_v27 = vsel %vm533_vm0, %v4904_v33, %v5822_v58 }
 0x277   : > { %v1840_v57 = vsel %vm1811_vm10, %v1807_v7, %v1353_v28  ;;  %v5820_v28 = vld [vmem:[#allocation44_spill] sm:$0xff]  ;;  %v5824_v7 = vld [vmem:[#allocation87_spill] sm:$0xff] }
 0x278   : > { %1152 = vrot.lane.b32.xlu1 %v4695_v44, %s3146_s21  ;;  %v4860_v9 = vpop.permute.xlu2 %1136  ;;  %v1873_v51 = vsel %vm1844_vm11, %v1840_v57, %v1449_v16 }
 0x279   : > { %v1906_v36 = vsel %vm1877_vm12, %v1873_v51, %v1545_v29 }
 0x27a   : > { %v1327_v37 = vpop.permute.xlu1 %1326  ;;  %1344 = vrot.lane.b32.xlu0 %v4130_v21, %s3147_s22 }
 0x27b   : > { %v1827_v46 = vsel %vm1811_vm10, %v1794_v13, %v1327_v37  ;;  %v5823_v37 = vld [vmem:[#allocation54_spill] sm:$0xff] }
 0x27c   : > { %v1860_v42 = vsel %vm1844_vm11, %v1827_v46, %v1423_v49  ;;  %v1615_v22 = vpop.permute.xlu0 %1614 }
 0x27d   : > { %v1893_v17 = vsel %vm1877_vm12, %v1860_v42, %v1519_v61  ;;  %v4881_v61 = vpop.f32.mrf.mxu0 }
 0x27e   : > { %v1926_v38 = vsel %vm1910_vm13, %v1893_v17, %v1615_v22  ;;  %1140 = vrot.lane.b32.xlu2 %v4734_v55, %s3146_s21  ;;  %v911_v22 = vsel %vm805_vm5, %v908_v32, %v910_v11  ;;  %v5825_v17 = vld [vmem:[#allocation38_spill] sm:$0xff] }
 0x27f   : > { %3028 = vmatmul.msk.f32.gmra.mxu0 %vm1948_vm14, %v1926_v38 }
 0x280   : > { %1262 = vrot.lane.b32.xlu1 %v4731_v15, %s3148_s23  ;;  %v1233_v21 = vpop.permute.xlu2 %1232 }
 0x282   : > { %v1641_v25 = vpop.permute.xlu1 %1640  ;;  %1440 = vrot.lane.b32.xlu0 %v4845_v54, %s3151_s26 }
 0x283   : > { %v1939_v53 = vsel %vm1910_vm13, %v1906_v36, %v1641_v25 }
 0x284   : > { %3041 = vmatmul.msk.f32.gmra.mxu2 %vm1948_vm14, %v1939_v53  ;;  %v1245_v20 = vpop.permute.xlu0 %1244 }
 0x285   : > { %v4891_v49 = vpop.f32.mrf.mxu0 }
 0x286   : > { %1236 = vrot.lane.b32.xlu2 %v5805_v1, %s3148_s23  ;;  %v905_v1 = vrot.slane %v675_v18, 1 }
 0x288   : > { %1358 = vrot.lane.b32.xlu1 %v4751_v34, %s3147_s22  ;;  %v1329_v15 = vpop.permute.xlu2 %1328  ;;  %v5821_v34 = vld [vmem:[#allocation61_spill] sm:$0xff]  ;;  %v906_v47 = vsel %vm724_vm1, %v903_v26, %v905_v1  ;;  %v1735_v26 = vsel %vm1712_vm6, %v1702_v27, %v5824_v7  ;;  %v5826_v1 = vld [vmem:[#allocation66_spill] sm:$0xff] }
 0x28a   : > { %v1149_v16 = vpop.permute.xlu1 %1148  ;;  %1536 = vrot.lane.b32.xlu0 %v5820_v28, %s3150_s25 }
 0x28b   : > { %v1768_v57 = vsel %vm1745_vm8, %v1735_v26, %v1149_v16 }
 0x28c   : > { %v1341_v29 = vpop.permute.xlu0 %1340  ;;  %v1801_v38 = vsel %vm1778_vm9, %v1768_v57, %v1245_v20  ;;  %v3131_v20 = vld [vmem:[#allocation2 + $0xc0] sm:$0xff]  ;;  %v3132_v57 = vld [vmem:[#allocation2 + $0x158] sm:$0xff] }
 0x28d   : > { %v4899_v8 = vpop.f32.mrf.mxu0  ;;  %v1834_v25 = vsel %vm1811_vm10, %v1801_v38, %v1341_v29  ;;  %v5827_v29 = vld [vmem:[#allocation81_spill] sm:$0xff] }
 0x28e   : > { %1332 = vrot.lane.b32.xlu2 %v4059_v12, %s3147_s22 }
 0x290   : > { %1454 = vrot.lane.b32.xlu1 %v4810_v31, %s3151_s26  ;;  %v1425_v2 = vpop.permute.xlu2 %1424 }
 0x292   : > { %v1259_v40 = vpop.permute.xlu1 %1258  ;;  %1632 = vrot.lane.b32.xlu0 %v5821_v34, %s3149_s24 }
 0x294   : > { %v1437_v4 = vpop.permute.xlu0 %1436 }
 0x295   : > { %v4916_v46 = vpop.f32.mrf.mxu0  ;;  %v1867_v31 = vsel %vm1844_vm11, %v1834_v25, %v1437_v4  ;;  %v5829_v25 = vld [vmem:[#allocation93_spill] sm:$0xff] }
 0x296   : > { %1428 = vrot.lane.b32.xlu2 %v4904_v33, %s3151_s26 }
 0x298   : > { %1550 = vrot.lane.b32.xlu1 %v906_v47, %s3150_s25  ;;  %v1521_v12 = vpop.permute.xlu2 %1520  ;;  %v1696_v47 = vsel %vm533_vm0, %v3131_v20, %v5826_v1  ;;  %v4972_v1 = vld [vmem:[#allocation2 + $0x110] sm:$0xff] }
 0x299   : > { %v1729_v11 = vsel %vm1712_vm6, %v1696_v47, %v5827_v29 }
 0x29a   : > { %v1355_v13 = vpop.permute.xlu1 %1354  ;;  %1620 = vrot.lane.b32.xlu0 %v5823_v37, %s3149_s24  ;;  %v1762_v4 = vsel %vm1745_vm8, %v1729_v11, %v4860_v9  ;;  %v5831_v11 = vld [vmem:[#allocation37_spill] sm:$0xff] }
 0x29b   : > { %v1795_v27 = vsel %vm1778_vm9, %v1762_v4, %v1233_v21 }
 0x29c   : > { %v1533_v42 = vpop.permute.xlu0 %1532  ;;  %v1828_v7 = vsel %vm1811_vm10, %v1795_v27, %v1329_v15 }
 0x29d   : > { %v4931_v53 = vpop.f32.mrf.mxu0  ;;  %v1900_v32 = vsel %vm1877_vm12, %v1867_v31, %v1533_v42  ;;  %v1861_v42 = vsel %vm1844_vm11, %v1828_v7, %v1425_v2 }
 0x29e   : > { %1524 = vrot.lane.b32.xlu2 %v5825_v17, %s3150_s25  ;;  %v1894_v38 = vsel %vm1877_vm12, %v1861_v42, %v1521_v12  ;;  %v3134_v42 = vld [vmem:[#allocation2 + $0x168] sm:$0xff] }
 0x2a0   : > { %1646 = vrot.lane.b32.xlu1 %v911_v22, %s3149_s24  ;;  %v4926_v51 = vpop.permute.xlu2 %1164  ;;  %v5828_v22 = vld [vmem:[#allocation68_spill] sm:$0xff] }
 0x2a1   : > { %v1709_v9 = vsel %vm533_vm0, %v3132_v57, %v5828_v22  ;;  %v5833_v22 = vld [vmem:[#allocation10_spill] sm:$0xff] }
 0x2a2   : > { %v1451_v36 = vpop.permute.xlu1 %1450  ;;  %1142 = vrot.lane.b32.xlu0 %v4824_v43, %s3146_s21  ;;  %v1742_v31 = vsel %vm1712_vm6, %v1709_v9, %v5829_v25 }
 0x2a3   : > { %v1775_v15 = vsel %vm1745_vm8, %v1742_v31, %v4838_v60 }
 0x2a4   : > { %v1629_v16 = vpop.permute.xlu0 %1628  ;;  %v1808_v2 = vsel %vm1778_vm9, %v1775_v15, %v1259_v40 }
 0x2a5   : > { %v1933_v18 = vsel %vm1910_vm13, %v1900_v32, %v1629_v16  ;;  %v1841_v32 = vsel %vm1811_vm10, %v1808_v2, %v1355_v13 }
 0x2a6   : > { %3035 = vmatmul.msk.f32.vlgmr.msra.gmra.mxu1 %vm1948_vm14, %v1933_v18  ;;  %1250 = vrot.lane.b32.xlu2 %v5812_v14, %s3148_s23  ;;  %v4952_v14 = vpop.f32.mrf.mxu0  ;;  %v1874_v16 = vsel %vm1844_vm11, %v1841_v32, %v1451_v36  ;;  %v5830_v36 = vld [vmem:[#allocation60_spill] sm:$0xff] }
 0x2a8   : > { %1154 = vrot.lane.b32.xlu1 %v4779_v35, %s3146_s21  ;;  %v4947_v58 = vpop.permute.xlu2 %1138 }
 0x2aa   : > { %v1547_v26 = vpop.permute.xlu1 %1546  ;;  %1442 = vrot.lane.b32.xlu0 %v3132_v57, %s3151_s26 }
 0x2ab   : > { %v1907_v18 = vsel %vm1877_vm12, %v1874_v16, %v1547_v26  ;;  %v5832_v26 = vld [vmem:[#allocation62_spill] sm:$0xff]  ;;  %v5834_v16 = vld [vmem:[#allocation55_spill] sm:$0xff] }
 0x2ac   : > { %v1617_v35 = vpop.permute.xlu0 %1616  ;;  %v1703_v57 = vsel %vm533_vm0, %v4972_v1, %v5832_v26  ;;  %v5836_v26 = vld [vmem:[#allocation74_spill] sm:$0xff] }
 0x2ad   : > { %v1927_v21 = vsel %vm1910_vm13, %v1894_v38, %v1617_v35 }
 0x2ae   : > { %3029 = vmatmul.msk.f32.gmra.mxu0 %vm1948_vm14, %v1927_v21  ;;  %1238 = vrot.lane.b32.xlu2 %v5815_v52, %s3148_s23  ;;  %v4976_v60 = vpop.f32.mrf.mxu0 }
 0x2b0   : > { %1346 = vrot.lane.b32.xlu1 %v5813_v41, %s3147_s22  ;;  %v1235_v12 = vpop.permute.xlu2 %1234 }
 0x2b2   : > { %v1643_v20 = vpop.permute.xlu1 %1642  ;;  %1430 = vrot.lane.b32.xlu0 %v4972_v1, %s3151_s26 }
 0x2b3   : > { %v1940_v52 = vsel %vm1910_vm13, %v1907_v18, %v1643_v20  ;;  %v5835_v18 = vld [vmem:[#allocation86_spill] sm:$0xff] }
 0x2b4   : > { %3042 = vmatmul.msk.f32.gmra.mxu2 %vm1948_vm14, %v1940_v52  ;;  %v1247_v40 = vpop.permute.xlu0 %1246 }
 0x2b6   : > { %1538 = vrot.lane.b32.xlu2 %v5795_v48, %s3150_s25  ;;  %v4986_v47 = vpop.f32.mrf.mxu0 }
 0x2b8   : > { %1334 = vrot.lane.b32.xlu1 %v5814_v50, %s3147_s22  ;;  %v1331_v41 = vpop.permute.xlu2 %1330 }
 0x2ba   : > { %v1151_v13 = vpop.permute.xlu1 %1150  ;;  %1622 = vrot.lane.b32.xlu0 %v5830_v36, %s3149_s24 }
 0x2bc   : > { %v1343_v29 = vpop.permute.xlu0 %1342 }
 0x2be   : > { %1526 = vrot.lane.b32.xlu2 %v5831_v11, %s3150_s25  ;;  %v4994_v48 = vpop.f32.mrf.mxu0 }
 0x2c0   : > { %1634 = vrot.lane.b32.xlu1 %v4153_v23, %s3149_s24  ;;  %v1427_v4 = vpop.permute.xlu2 %1426 }
 0x2c2   : > { %v1261_v27 = vpop.permute.xlu1 %1260  ;;  %1144 = vrot.lane.b32.xlu0 %v4904_v33, %s3146_s21  ;;  %v1736_v33 = vsel %vm1712_vm6, %v1703_v57, %v5833_v22  ;;  %v1710_v57 = vsel %vm533_vm0, %v3134_v42, %v5836_v26  ;;  %v5840_v26 = vld [vmem:[#allocation64_spill] sm:$0xff] }
 0x2c3   : > { %v1769_v38 = vsel %vm1745_vm8, %v1736_v33, %v1151_v13 }
 0x2c4   : > { %v1439_v50 = vpop.permute.xlu0 %1438 }
 0x2c6   : > { %1252 = vrot.lane.b32.xlu2 %v5820_v28, %s3148_s23  ;;  %v5006_v9 = vpop.f32.mrf.mxu0 }
 0x2c8   : > { %1156 = vrot.lane.b32.xlu1 %v4845_v54, %s3146_s21  ;;  %v1523_v7 = vpop.permute.xlu2 %1522  ;;  %v1802_v54 = vsel %vm1778_vm9, %v1769_v38, %v1247_v40 }
 0x2c9   : > { %v1835_v25 = vsel %vm1811_vm10, %v1802_v54, %v1343_v29 }
 0x2ca   : > { %v1357_v23 = vpop.permute.xlu1 %1356  ;;  %1444 = vrot.lane.b32.xlu0 %v3134_v42, %s3151_s26  ;;  %v1868_v15 = vsel %vm1844_vm11, %v1835_v25, %v1439_v50 }
 0x2cc   : > { %v1535_v28 = vpop.permute.xlu0 %1534 }
 0x2cd   : > { %v1901_v2 = vsel %vm1877_vm12, %v1868_v15, %v1535_v28 }
 0x2ce   : > { %1240 = vrot.lane.b32.xlu2 %v5825_v17, %s3148_s23  ;;  %v5019_v21 = vpop.f32.mrf.mxu0 }
 0x2d0   : > { %1348 = vrot.lane.b32.xlu1 %v5821_v34, %s3147_s22  ;;  %v5014_v35 = vpop.permute.xlu2 %1166  ;;  %v1697_v34 = vsel %vm533_vm0, %v4597_v63, %v5834_v16 }
 0x2d1   : > { %v1730_v20 = vsel %vm1712_vm6, %v1697_v34, %v5835_v18 }
 0x2d2   : > { %v1453_v31 = vpop.permute.xlu1 %1452  ;;  %1432 = vrot.lane.b32.xlu0 %v4678_v19, %s3151_s26  ;;  %v1763_v52 = vsel %vm1745_vm8, %v1730_v20, %v4947_v58 }
 0x2d3   : > { %v1796_v13 = vsel %vm1778_vm9, %v1763_v52, %v1235_v12 }
 0x2d4   : > { %v1631_v17 = vpop.permute.xlu0 %1630  ;;  %v1829_v63 = vsel %vm1811_vm10, %v1796_v13, %v1331_v41 }
 0x2d5   : > { %v1934_v32 = vsel %vm1910_vm13, %v1901_v2, %v1631_v17  ;;  %v1862_v50 = vsel %vm1844_vm11, %v1829_v63, %v1427_v4  ;;  %v5838_v2 = vld [vmem:[#allocation70_spill] sm:$0xff] }
 0x2d6   : > { %3036 = vmatmul.msk.f32.gmra.mxu1 %vm1948_vm14, %v1934_v32  ;;  %1540 = vrot.lane.b32.xlu2 %v5799_v59, %s3150_s25  ;;  %v2099_v59 = vpop.f32.mrf.mxu0  ;;  %v1895_v58 = vsel %vm1877_vm12, %v1862_v50, %v1523_v7  ;;  %v5839_v32 = vld [vmem:[#allocation82_spill] sm:$0xff] }
 0x2d8   : > { %1336 = vrot.lane.b32.xlu1 %v5823_v37, %s3147_s22  ;;  %v5036_v40 = vpop.permute.xlu2 %1140  ;;  %v5837_v37 = vld [vmem:[#allocation88_spill] sm:$0xff] }
 0x2d9   : > { %v1743_v33 = vsel %vm1712_vm6, %v1710_v57, %v5837_v37  ;;  %v1698_v57 = vsel %vm533_vm0, %v4568_v3, %v5840_v26  ;;  %v5856_v26 = vld [vmem:[#allocation17_spill] sm:$0xff] }
 0x2da   : > { %v1549_v29 = vpop.permute.xlu1 %1548  ;;  %1624 = vrot.lane.b32.xlu0 %v4081_v39, %s3149_s24  ;;  %v1776_v41 = vsel %vm1745_vm8, %v1743_v33, %v4926_v51 }
 0x2db   : > { %v1809_v39 = vsel %vm1778_vm9, %v1776_v41, %v1261_v27 }
 0x2dc   : > { %v1619_v22 = vpop.permute.xlu0 %1618  ;;  %v1842_v4 = vsel %vm1811_vm10, %v1809_v39, %v1357_v23  ;;  %v5842_v39 = vld [vmem:[#allocation76_spill] sm:$0xff] }
 0x2dd   : > { %v1928_v12 = vsel %vm1910_vm13, %v1895_v58, %v1619_v22  ;;  %v1875_v42 = vsel %vm1844_vm11, %v1842_v4, %v1453_v31  ;;  %v5841_v22 = vld [vmem:[#allocation78_spill] sm:$0xff]  ;;  %v1711_v4 = vsel %vm533_vm0, %v4674_v62, %v5842_v39 }
 0x2de   : > { %3030 = vmatmul.msk.f32.gmra.mxu0 %vm1948_vm14, %v1928_v12  ;;  %1528 = vrot.lane.b32.xlu2 %v5801_v24, %s3150_s25  ;;  %v1908_v38 = vsel %vm1877_vm12, %v1875_v42, %v1549_v29  ;;  %v2102_v51 = vpop.f32.mrf.mxu0  ;;  %v1731_v37 = vsel %vm1712_vm6, %v1698_v57, %v5841_v22  ;;  %v5857_v22 = vld [vmem:[#allocation16_spill] sm:$0xff] }
 0x2df   : > { %v1764_v33 = vsel %vm1745_vm8, %v1731_v37, %v5036_v40 }
 0x2e0   : > { %1636 = vrot.lane.b32.xlu1 %v4148_v45, %s3149_s24  ;;  %v1237_v7 = vpop.permute.xlu2 %1236 }
 0x2e1   : > { %v1797_v12 = vsel %vm1778_vm9, %v1764_v33, %v1237_v7 }
 0x2e2   : > { %v1645_v28 = vpop.permute.xlu1 %1644  ;;  %1338 = vrot.lane.b32.xlu0 %v5830_v36, %s3147_s22 }
 0x2e3   : > { %v1941_v54 = vsel %vm1910_vm13, %v1908_v38, %v1645_v28  ;;  %v5843_v38 = vld [vmem:[#allocation92_spill] sm:$0xff] }
 0x2e4   : > { %3043 = vmatmul.msk.f32.gmra.mxu2 %vm1948_vm14, %v1941_v54  ;;  %v1249_v24 = vpop.permute.xlu0 %1248  ;;  %v1744_v40 = vsel %vm1712_vm6, %v1711_v4, %v5843_v38  ;;  %v5861_v4 = vld [vmem:[#allocation4_spill] sm:$0xff] }
 0x2e5   : > { %v1777_v7 = vsel %vm1745_vm8, %v1744_v40, %v5014_v35 }
 0x2e6   : > { %1242 = vrot.lane.b32.xlu2 %v5831_v11, %s3148_s23  ;;  %v2105_v23 = vpop.f32.mrf.mxu0 }
 0x2e8   : > { %1146 = vrot.lane.b32.xlu1 %v4972_v1, %s3146_s21  ;;  %v1333_v45 = vpop.permute.xlu2 %1332  ;;  %v1704_v1 = vsel %vm533_vm0, %v4678_v19, %v5838_v2 }
 0x2ea   : > { %v1153_v27 = vpop.permute.xlu1 %1152  ;;  %1626 = vrot.lane.b32.xlu0 %v5807_v5, %s3149_s24  ;;  %v1737_v5 = vsel %vm1712_vm6, %v1704_v1, %v5839_v32  ;;  %v5852_v32 = vld [vmem:[#allocation20_spill] sm:$0xff] }
 0x2eb   : > { %v1770_v16 = vsel %vm1745_vm8, %v1737_v5, %v1153_v27 }
 0x2ec   : > { %v1345_v25 = vpop.permute.xlu0 %1344  ;;  %v1803_v20 = vsel %vm1778_vm9, %v1770_v16, %v1249_v24  ;;  %v5853_v16 = vld [vmem:[#allocation18_spill] sm:$0xff] }
 0x2ed   : > { %v1836_v52 = vsel %vm1811_vm10, %v1803_v20, %v1345_v25 }
 0x2ee   : > { %1530 = vrot.lane.b32.xlu2 %v5806_v30, %s3150_s25  ;;  %v2108_v31 = vpop.f32.mrf.mxu0 }
 0x2f0   : > { %1434 = vrot.lane.b32.xlu1 %v4767_v56, %s3151_s26  ;;  %v1429_v15 = vpop.permute.xlu2 %1428 }
 0x2f2   : > { %v1263_v36 = vpop.permute.xlu1 %1262 }
 0x2f4   : > { %v1441_v11 = vpop.permute.xlu0 %1440 }
 0x2f5   : > { %v1869_v63 = vsel %vm1844_vm11, %v1836_v52, %v1441_v11  ;;  %v5851_v11 = vld [vmem:[#allocation90_spill] sm:$0xff]  ;;  %v5854_v52 = vld [vmem:[#allocation13_spill] sm:$0xff] }
 0x2f8   : > { %v1525_v30 = vpop.permute.xlu2 %1524 }
 0x2fa   : > { %v1359_v17 = vpop.permute.xlu1 %1358 }
 0x2fc   : > { %v2111_v34 = vpop.f32.mrf.mxu0  ;;  %v1537_v18 = vpop.permute.xlu0 %1536 }
 0x2fd   : > { %2178 = vmatpush.msrb.mxu1 %v2111_v34  ;;  %v1902_v19 = vsel %vm1877_vm12, %v1869_v63, %v1537_v18 }
 0x2ff   : > { %2179 = vmatpush.msrb.mxu1 %v2108_v31  ;;  %v5848_v31 = vld [vmem:[#allocation73_spill] sm:$0xff] }
 0x300   : > { %v1251_v58 = vpop.permute.xlu2 %1250 }
 0x301   : > { %2180 = vmatpush.msrb.mxu1 %v2105_v23  ;;  %v5845_v23 = vld [vmem:[#allocation22_spill] sm:$0xff] }
 0x302   : > { %v1455_v13 = vpop.permute.xlu1 %1454 }
 0x303   : > { %2181 = vmatpush.msrb.mxu1 %v2102_v51 }
 0x304   : > { %v1633_v29 = vpop.permute.xlu0 %1632 }
 0x305   : > { %2182 = vmatpush.msrb.mxu1 %v2099_v59  ;;  %v1935_v50 = vsel %vm1910_vm13, %v1902_v19, %v1633_v29  ;;  %v1830_v59 = vsel %vm1811_vm10, %v1797_v12, %v1333_v45  ;;  %v5855_v29 = vld [vmem:[#allocation12_spill] sm:$0xff]  ;;  %v5858_v12 = vld [vmem:[#allocation11_spill] sm:$0xff] }
 0x306   : > { %3037 = vmatmul.msk.f32.gmra.mxu1 %vm1948_vm14, %v1935_v50  ;;  %v1863_v3 = vsel %vm1844_vm11, %v1830_v59, %v1429_v15  ;;  %v5850_v15 = vld [vmem:[#allocation29_spill] sm:$0xff] }
 0x307   : > { %2183 = vmatpush.msrb.mxu1 %v5019_v21  ;;  %v1896_v21 = vsel %vm1877_vm12, %v1863_v3, %v1525_v30  ;;  %v5859_v59 = vld [vmem:[#allocation9_spill] sm:$0xff] }
 0x308   : > { %v1239_v28 = vpop.permute.xlu2 %1238  ;;  %v5860_v3 = vld [vmem:[#allocation5_spill] sm:$0xff] }
 0x309   : > { %2184 = vmatpush.msrb.mxu1 %v5006_v9 }
 0x30a   : > { %v1551_v41 = vpop.permute.xlu1 %1550 }
 0x30b   : > { %2185 = vmatpush.msrb.mxu1 %v4994_v48  ;;  %v1810_v48 = vsel %vm1778_vm9, %v1777_v7, %v1263_v36  ;;  %v5846_v36 = vld [vmem:[#allocation30_spill] sm:$0xff] }
 0x30c   : > { %v1621_v42 = vpop.permute.xlu0 %1620  ;;  %v1843_v62 = vsel %vm1811_vm10, %v1810_v48, %v1359_v17  ;;  %v5863_v48 = vld [vmem:[#allocation65_spill] sm:$0xff] }
 0x30d   : > { %2186 = vmatpush.msrb.mxu1 %v4986_v47  ;;  %v1929_v9 = vsel %vm1910_vm13, %v1896_v21, %v1621_v42  ;;  %v1876_v51 = vsel %vm1844_vm11, %v1843_v62, %v1455_v13  ;;  %v1706_v62 = vsel %vm533_vm0, %v4695_v44, %v5863_v48  ;;  %v2169_v48 = vld [vmem:[%s5597_s8 + $0x38] sm:$0xff] }
 0x30e   : > { %3031 = vmatmul.msk.f32.gmra.mxu0 %vm1948_vm14, %v1929_v9  ;;  %v1909_v47 = vsel %vm1877_vm12, %v1876_v51, %v1551_v41  ;;  %v5862_v9 = vld [vmem:[#allocation58_spill] sm:$0xff] }
 0x30f   : > { %2187 = vmatpush.msrb.mxu1 %v4976_v60  ;;  %v1700_v7 = vsel %vm533_vm0, %v4734_v55, %v5862_v9  ;;  %v2167_v9 = vld [vmem:[%s5597_s8 + $0x28] sm:$0xff] }
 0x310   : > { %v1539_v45 = vpop.permute.xlu2 %1538 }
 0x311   : > { %2188 = vmatpush.msrb.mxu1 %v4952_v14 }
 0x312   : > { %v1647_v54 = vpop.permute.xlu1 %1646 }
 0x313   : > { %2189 = vmatpush.msrb.mxu1 %v4931_v53  ;;  %v1942_v35 = vsel %vm1910_vm13, %v1909_v47, %v1647_v54  ;;  %v5844_v53 = vld [vmem:[#allocation23_spill] sm:$0xff] }
 0x314   : > { %3044 = vmatmul.msk.f32.gmra.mxu2 %vm1948_vm14, %v1942_v35  ;;  %v1143_v24 = vpop.permute.xlu0 %1142  ;;  %v5865_v47 = vld [vmem:[#allocation91_spill] sm:$0xff] }
 0x315   : > { %2190 = vmatpush.msrb.mxu1 %v4916_v46  ;;  %v1739_v54 = vsel %vm1712_vm6, %v1706_v62, %v5865_v47  ;;  %v2171_v62 = vld [vmem:[%s5597_s8 + $0x48] sm:$0xff]  ;;  %v5868_v47 = vmov 0.0  }
 0x316   : > { %2312 = vst.msk [vmem:[#allocation3 + $0x18] sm:$0x3] %vm2309_vm3, %v5868_v47 }
 0x317   : > { %2191 = vmatpush.msrb.mxu1 %v4899_v8  ;;  %v5847_v8 = vld [vmem:[#allocation69_spill] sm:$0xff]  ;;  %2310 = vst.msk [vmem:[#allocation3 + $0x8] sm:$0x3] %vm2309_vm3, %v5868_v47 }
 0x318   : > { %v1527_v46 = vpop.permute.xlu2 %1526  ;;  %2314 = vst.msk [vmem:[#allocation3 + $0x28] sm:$0x3] %vm2309_vm3, %v5868_v47 }
 0x319   : > { %2192 = vmatpush.msrb.mxu1 %v4891_v49  ;;  %v1699_v49 = vsel %vm533_vm0, %v4631_v10, %v5847_v8  ;;  %2316 = vst.msk [vmem:[#allocation3 + $0x38] sm:$0x3] %vm2309_vm3, %v5868_v47 }
 0x31a   : > { %v1155_v60 = vpop.permute.xlu1 %1154  ;;  %2318 = vst.msk [vmem:[#allocation3 + $0x48] sm:$0x3] %vm2309_vm3, %v5868_v47 }
 0x31b   : > { %2193 = vmatpush.msrb.mxu1 %v4881_v61  ;;  %v1705_v61 = vsel %vm533_vm0, %v4767_v56, %v5848_v31  ;;  %2320 = vst.msk [vmem:[#allocation3 + $0x58] sm:$0x3] %vm2309_vm3, %v5868_v47 }
 0x31c   : > { %v1443_v14 = vpop.permute.xlu0 %1442  ;;  %v1738_v2 = vsel %vm1712_vm6, %v1705_v61, %v5851_v11  ;;  %2322 = vst.msk [vmem:[#allocation3 + $0x68] sm:$0x3] %vm2309_vm3, %v5868_v47 }
 0x31d   : > { %2764 = vmatpush.msra.mxu1 %v4554_v6  ;;  %v5849_v6 = vld [vmem:[#allocation84_spill] sm:$0xff]  ;;  %v1771_v17 = vsel %vm1745_vm8, %v1738_v2, %v1155_v60  ;;  %2324 = vst.msk [vmem:[#allocation3 + $0x78] sm:$0x3] %vm2309_vm3, %v5868_v47 }
 0x31e   : > { %v1804_v56 = vsel %vm1778_vm9, %v1771_v17, %v1251_v58  ;;  %v5867_v2 = vld [vmem:[#allocation80_spill] sm:$0xff]  ;;  %2326 = vst.msk [vmem:[#allocation3 + $0x88] sm:$0x3] %vm2309_vm3, %v5868_v47 }
 0x31f   : > { %2765 = vmatpush.msra.mxu1 %v4531_v0  ;;  %v1732_v0 = vsel %vm1712_vm6, %v1699_v49, %v5849_v6  ;;  %2328 = vst.msk [vmem:[#allocation3 + $0x98] sm:$0x3] %vm2309_vm3, %v5868_v47 }
 0x320   : > { %v1765_v1 = vsel %vm1745_vm8, %v1732_v0, %v1143_v24  ;;  %v1253_v63 = vpop.permute.xlu2 %1252  ;;  %v5866_v0 = vld [vmem:[#allocation67_spill] sm:$0xff] }
 0x321   : > { %2766 = vmatpush.msra.mxu1 %v5844_v53  ;;  %v1798_v10 = vsel %vm1778_vm9, %v1765_v1, %v1239_v28  ;;  %v5864_v28 = vld [vmem:[#allocation89_spill] sm:$0xff] }
 0x322   : > { %v1347_v27 = vpop.permute.xlu1 %1346  ;;  %v1733_v51 = vsel %vm1712_vm6, %v1700_v7, %v5864_v28  ;;  %v2174_v7 = vld [vmem:[%s5597_s8 + $0x60] sm:$0xff]  ;;  %v5238_v28 = vld [vmem:[%s5597_s8 + $0x58] sm:$0xff] }
 0x323   : > { %2767 = vmatpush.msra.mxu1 %v5845_v23  ;;  %v1837_v18 = vsel %vm1811_vm10, %v1804_v56, %v1347_v27 }
 0x324   : > { %v1431_v25 = vpop.permute.xlu0 %1430  ;;  %v1870_v50 = vsel %vm1844_vm11, %v1837_v18, %v1443_v14 }
 0x325   : > { %2768 = vmatpush.msra.mxu1 %v5846_v36  ;;  %v1903_v58 = vsel %vm1877_vm12, %v1870_v50, %v1539_v45 }
 0x327   : > { %2769 = vmatpush.msra.mxu1 %v5850_v15  ;;  %v1701_v15 = vsel %vm533_vm0, %v4824_v43, %v5866_v0  ;;  %v2147_v43 = vpop.f32.mrf.mxu2 }
 0x328   : > { %v1241_v41 = vpop.permute.xlu2 %1240  ;;  %v1734_v1 = vsel %vm1712_vm6, %v1701_v15, %v5867_v2 }
 0x329   : > { %2770 = vmatpush.msra.mxu1 %v5852_v32 }
 0x32a   : > { %v1335_v5 = vpop.permute.xlu1 %1334 }
 0x32b   : > { %2771 = vmatpush.msra.mxu1 %v5853_v16  ;;  %v1831_v34 = vsel %vm1811_vm10, %v1798_v10, %v1335_v5  ;;  %v2114_v50 = vpop.f32.mrf.mxu0 }
 0x32c   : > { %v1864_v30 = vsel %vm1844_vm11, %v1831_v34, %v1431_v25  ;;  %v1623_v20 = vpop.permute.xlu0 %1622 }
 0x32d   : > { %2772 = vmatpush.msra.mxu1 %v5854_v52  ;;  %v1897_v13 = vsel %vm1877_vm12, %v1864_v30, %v1527_v46 }
 0x32e   : > { %v1930_v19 = vsel %vm1910_vm13, %v1897_v13, %v1623_v20 }
 0x32f   : > { %2773 = vmatpush.msra.mxu1 %v5855_v29  ;;  %3032 = vmatmul.msk.f32.gmra.mxu0 %vm1948_vm14, %v1930_v19  ;;  %v2150_v20 = vpop.f32.mrf.mxu2  ;;  %v2132_v19 = vpop.f32.mrf.mxu1 }
 0x330   : > { %v1541_v42 = vpop.permute.xlu2 %1540 }
 0x331   : > { %2774 = vmatpush.msra.mxu1 %v5856_v26 }
 0x332   : > { %v1635_v57 = vpop.permute.xlu1 %1634 }
 0x333   : > { %2775 = vmatpush.msra.mxu1 %v5857_v22  ;;  %v1936_v37 = vsel %vm1910_vm13, %v1903_v58, %v1635_v57 }
 0x334   : > { %3038 = vmatmul.msk.f32.gmra.mxu1 %vm1948_vm14, %v1936_v37  ;;  %v1145_v33 = vpop.permute.xlu0 %1144  ;;  %v2162_v37 = vld [vmem:[%s5597_s8] sm:$0xff] }
 0x335   : > { %2776 = vmatpush.msra.mxu1 %v5858_v12  ;;  %v1766_v35 = vsel %vm1745_vm8, %v1733_v51, %v1145_v33  ;;  %2739 = vmatmul.f32.vlgmr.msra.gmra.mxu3 %v2162_v37  ;;  %v5244_v51 = vld [vmem:[%s5597_s8 + $0x68] sm:$0xff] }
 0x336   : > { %v1799_v60 = vsel %vm1778_vm9, %v1766_v35, %v1241_v41  ;;  %v2176_v35 = vld [vmem:[%s5597_s8 + $0x70] sm:$0xff] }
 0x337   : > { %2777 = vmatpush.msra.mxu1 %v5859_v59  ;;  %v2153_v52 = vpop.f32.mrf.mxu2  ;;  %v2164_v59 = vld [vmem:[%s5597_s8 + $0x10] sm:$0xff] }
 0x338   : > { %v1529_v14 = vpop.permute.xlu2 %1528 }
 0x339   : > { %2778 = vmatpush.msra.mxu1 %v5860_v3  ;;  %v2166_v3 = vld [vmem:[%s5597_s8 + $0x20] sm:$0xff] }
 0x33a   : > { %v1157_v39 = vpop.permute.xlu1 %1156 }
 0x33b   : > { %2779 = vmatpush.msra.mxu1 %v5861_v4  ;;  %v1772_v24 = vsel %vm1745_vm8, %v1739_v54, %v1157_v39  ;;  %v2168_v4 = vld [vmem:[%s5597_s8 + $0x30] sm:$0xff]  ;;  %v5252_v54 = vld [vmem:[%s5597_s8 + $0x78] sm:$0xff] }
 0x33c   : > { %v1445_v21 = vpop.permute.xlu0 %1444  ;;  %v1805_v55 = vsel %vm1778_vm9, %v1772_v24, %v1253_v63  ;;  %v5272_v24 = vld [vmem:[#allocation3] sm:$0xff] }
 0x33d   : > { %2742 = vmatmul.f32.gmra.mxu3 %v2164_v59 }
 0x340   : > { %v1243_v61 = vpop.permute.xlu2 %1242 }
 0x342   : > { %v1349_v38 = vpop.permute.xlu1 %1348 }
 0x343   : > { %v1838_v44 = vsel %vm1811_vm10, %v1805_v55, %v1349_v38  ;;  %v2165_v38 = vld [vmem:[%s5597_s8 + $0x18] sm:$0xff] }
 0x344   : > { %v1433_v40 = vpop.permute.xlu0 %1432  ;;  %v1871_v36 = vsel %vm1844_vm11, %v1838_v44, %v1445_v21  ;;  %v2163_v21 = vld [vmem:[%s5597_s8 + $0x8] sm:$0xff] }
 0x345   : > { %v1904_v8 = vsel %vm1877_vm12, %v1871_v36, %v1541_v42  ;;  %2745 = vmatmul.f32.gmra.mxu3 %v2166_v3  ;;  %v2170_v42 = vld [vmem:[%s5597_s8 + $0x40] sm:$0xff] }
 0x348   : > { %v1531_v10 = vpop.permute.xlu2 %1530 }
 0x34a   : > { %v1337_v45 = vpop.permute.xlu1 %1336 }
 0x34b   : > { %v1832_v53 = vsel %vm1811_vm10, %v1799_v60, %v1337_v45  ;;  %v2339_v60 = vld [vmem:[#allocation3 + $0x8] sm:$0x3]  ;;  %v2398_v45 = vrot.slane %v5272_v24, 2 }
 0x34c   : > { %v1865_v27 = vsel %vm1844_vm11, %v1832_v53, %v1433_v40  ;;  %v1625_v23 = vpop.permute.xlu0 %1624  ;;  %v2172_v40 = vld [vmem:[%s5597_s8 + $0x50] sm:$0xff]  ;;  %v2399_v55 = vrot.slane %v2339_v60, 2  ;;  %v2375_v53 = vrot.slane %v2339_v60, 1 }
 0x34d   : > { %v1898_v25 = vsel %vm1877_vm12, %v1865_v27, %v1529_v14  ;;  %2748 = vmatmul.f32.gmra.mxu3 %v2168_v4  ;;  %v2374_v14 = vrot.slane %v5272_v24, 1 }
 0x34e   : > { %v1931_v46 = vsel %vm1910_vm13, %v1898_v25, %v1625_v23  ;;  %v2400_v44 = vsel %vm805_vm5, %v2398_v45, %v2399_v55  ;;  %v5287_v25 = vld [vmem:[%s5593_s4] ss:$0 sm:$0xff] }
 0x34f   : > { %3033 = vmatmul.msk.f32.gmra.mxu0 %vm1948_vm14, %v1931_v46  ;;  %v2376_v27 = vsel %vm724_vm1, %v2374_v14, %v2375_v53  ;;  %2462 = vrot.lane.b32.xlu2 %v2400_v44, %s3148_s23 }
 0x350   : > { %2438 = vrot.lane.b32.xlu1 %v2376_v27, %s3145_s20 }
 0x352   : > { %v1637_v49 = vpop.permute.xlu1 %1636 }
 0x353   : > { %v1937_v31 = vsel %vm1910_vm13, %v1904_v8, %v1637_v49  ;;  %v2135_v29 = vpop.f32.mrf.mxu1  ;;  %v5292_v8 = vld [vmem:[%s5594_s5] ss:$0 sm:$0xff] }
 0x354   : > { %3039 = vmatmul.msk.f32.gmra.mxu1 %vm1948_vm14, %v1937_v31  ;;  %v1339_v6 = vpop.permute.xlu0 %1338 }
 0x355   : > { %2751 = vmatmul.f32.gmra.mxu3 %v2170_v42 }
 0x35a   : > { %v1147_v11 = vpop.permute.xlu1 %1146 }
 0x35b   : > { %v1767_v17 = vsel %vm1745_vm8, %v1734_v1, %v1147_v11  ;;  %v2117_v57 = vpop.f32.mrf.mxu0 }
 0x35c   : > { %v1800_v32 = vsel %vm1778_vm9, %v1767_v17, %v1243_v61  ;;  %v1627_v56 = vpop.permute.xlu0 %1626  ;;  %2194 = vmatmul.f32.vlgmr.msrb.gmra.mxu1 %v2162_v37 }
 0x35d   : > { %v1833_v5 = vsel %vm1811_vm10, %v1800_v32, %v1339_v6  ;;  %2754 = vmatmul.f32.gmra.mxu3 %v2172_v40 }
 0x362   : > { %v1435_v16 = vpop.permute.xlu1 %1434 }
 0x363   : > { %v1866_v34 = vsel %vm1844_vm11, %v1833_v5, %v1435_v16 }
 0x364   : > { %v1899_v18 = vsel %vm1877_vm12, %v1866_v34, %v1531_v10  ;;  %2197 = vmatmul.f32.gmra.mxu1 %v2164_v59 }
 0x365   : > { %v1932_v30 = vsel %vm1910_vm13, %v1899_v18, %v1627_v56  ;;  %2757 = vmatmul.f32.gmra.mxu3 %v2174_v7 }
 0x366   : > { %3034 = vmatmul.msk.f32.gmra.mxu0 %vm1948_vm14, %v1932_v30 }
 0x367   : > { %v2156_v13 = vpop.f32.mrf.mxu2 }
 0x36c   : > { %2200 = vmatmul.f32.gmra.mxu1 %v2166_v3 }
 0x36d   : > { %2760 = vmatmul.f32.gmra.mxu3 %v2176_v35 }
 0x374   : > { %2203 = vmatmul.f32.gmra.mxu1 %v2168_v4 }
 0x37c   : > { %2206 = vmatmul.f32.gmra.mxu1 %v2170_v42 }
 0x383   : > { %v2138_v26 = vpop.f32.mrf.mxu1 }
 0x384   : > { %2209 = vmatmul.f32.gmra.mxu1 %v2172_v40 }
 0x38b   : > { %v2120_v22 = vpop.f32.mrf.mxu0 }
 0x38c   : > { %2212 = vmatmul.f32.gmra.mxu1 %v2174_v7 }
 0x394   : > { %2215 = vmatmul.f32.gmra.mxu1 %v2176_v35 }
 0x397   : > { %v2159_v63 = vpop.f32.mrf.mxu2 }
 0x398   : > { %2219 = vmatpush.msrb.mxu2 %v2159_v63 }
 0x39a   : > { %2220 = vmatpush.msrb.mxu2 %v2156_v13 }
 0x39c   : > { %2221 = vmatpush.msrb.mxu2 %v2153_v52  ;;  %2780 = vmatmul.f32.vlgmr.msra.gmra.mxu1 %v2163_v21 }
 0x39e   : > { %2222 = vmatpush.msrb.mxu2 %v2150_v20 }
 0x3a0   : > { %2223 = vmatpush.msrb.mxu2 %v2147_v43 }
 0x3a4   : > { %2783 = vmatmul.f32.gmra.mxu1 %v2165_v38 }
 0x3ac   : > { %v2123_v12 = vpop.f32.mrf.mxu0  ;;  %2786 = vmatmul.f32.gmra.mxu1 %v2167_v9 }
 0x3b1   : > { %v2141_v58 = vpop.f32.mrf.mxu1 }
 0x3b4   : > { %2789 = vmatmul.f32.gmra.mxu1 %v2169_v48 }
 0x3bc   : > { %2792 = vmatmul.f32.gmra.mxu1 %v2171_v62 }
 0x3c4   : > { %2795 = vmatmul.f32.gmra.mxu1 %v5238_v28 }
 0x3cc   : > { %v2126_v41 = vpop.f32.mrf.mxu0  ;;  %2798 = vmatmul.f32.gmra.mxu1 %v5244_v51 }
 0x3d1   : > { %v2144_v33 = vpop.f32.mrf.mxu1 }
 0x3d2   : > { %2224 = vmatpush.msrb.mxu2 %v2144_v33 }
 0x3d4   : > { %2225 = vmatpush.msrb.mxu2 %v2141_v58  ;;  %2801 = vmatmul.f32.gmra.mxu1 %v5252_v54 }
 0x3d6   : > { %2226 = vmatpush.msrb.mxu2 %v2138_v26 }
 0x3d8   : > { %2227 = vmatpush.msrb.mxu2 %v2135_v29 }
 0x3d9   : > { %v2195_v23 = vpop.f32.mrf.mxu1 }
 0x3da   : > { %2228 = vmatpush.msrb.mxu2 %v2132_v19 }
 0x3e1   : > { %v2198_v61 = vpop.f32.mrf.mxu1 }
 0x3e3   : > { %v2129_v39 = vpop.f32.mrf.mxu0 }
 0x3e4   : > { %2229 = vmatpush.msrb.mxu2 %v2129_v39 }
 0x3e6   : > { %2230 = vmatpush.msrb.mxu2 %v2126_v41 }
 0x3e8   : > { %2231 = vmatpush.msrb.mxu2 %v2123_v12 }
 0x3e9   : > { %v2201_v17 = vpop.f32.mrf.mxu1 }
 0x3ea   : > { %2232 = vmatpush.msrb.mxu2 %v2120_v22 }
 0x3ec   : > { %2233 = vmatpush.msrb.mxu2 %v2117_v57 }
 0x3ee   : > { %2234 = vmatpush.msrb.mxu2 %v2114_v50 }
 0x3ef   : > { %2235 = vmatmul.f32.vlgmr.msrb.gmra.mxu2 %v2163_v21 }
 0x3f1   : > { %v2204_v29 = vpop.f32.mrf.mxu1 }
 0x3f7   : > { %2238 = vmatmul.f32.gmra.mxu2 %v2165_v38 }
 0x3f9   : > { %v2207_v40 = vpop.f32.mrf.mxu1 }
 0x3ff   : > { %2241 = vmatmul.f32.gmra.mxu2 %v2167_v9 }
 0x401   : > { %v2210_v44 = vpop.f32.mrf.mxu1 }
 0x407   : > { %2244 = vmatmul.f32.gmra.mxu2 %v2169_v48 }
 0x40f   : > { %2247 = vmatmul.f32.gmra.mxu2 %v2171_v62 }
 0x417   : > { %2250 = vmatmul.f32.gmra.mxu2 %v5238_v28 }
 0x41f   : > { %2253 = vmatmul.f32.gmra.mxu2 %v5244_v51 }
 0x427   : > { %2256 = vmatmul.f32.gmra.mxu2 %v5252_v54 }
 0x472   : > { %v2236_v46 = vpop.f32.mrf.mxu2 }
 0x473   : > { %v2237_v36 = vadd.f32 %v2236_v46, %v2195_v23 }
 0x475   : > { %v2264_v49 = vmul.f32 %v5287_v25, %v2237_v36 }
 0x477   : > { %v2276_v31 = vadd.f32 %v5292_v8, %v2264_v49 }
 0x479   : > { %vm2284_vm4 = vcmp.gt.f32.partialorder %v2276_v31, 0.0  ;;  %v2292_v6 = vmul.f32 0.1, %v2276_v31 }
 0x47a   : > { %v2239_v0 = vpop.f32.mrf.mxu2 }
 0x47b   : > { %v2300_v15 = vsel %vm2284_vm4, %v2276_v31, %v2292_v6  ;;  %v2240_v11 = vadd.f32 %v2239_v0, %v2198_v61  ;;  %vm2671_vm4 = vcmask 392192  }
 0x47c   : > { %2330 = vst.msk [vmem:[#allocation3 + $0x11] sm:$0xff] %vm1712_vm6, %v2300_v15 }
 0x47d   : > { %v2265_v2 = vmul.f32 %v5287_v25, %v2240_v11 }
 0x47f   : > { %v2277_v1 = vadd.f32 %v5292_v8, %v2265_v2 }
 0x481   : > { %vm2285_vm8 = vcmp.gt.f32.partialorder %v2277_v1, 0.0  ;;  %v2293_v32 = vmul.f32 0.1, %v2277_v1 }
 0x482   : > { %v2242_v10 = vpop.f32.mrf.mxu2 }
 0x483   : > { %v2301_v5 = vsel %vm2285_vm8, %v2277_v1, %v2293_v32  ;;  %v5299_v16 = vld [vmem:[#allocation3 + $0x10] sm:$0xff]  ;;  %v2341_v56 = vld [vmem:[#allocation3 + $0x18] sm:$0x3]  ;;  %v2243_v34 = vadd.f32 %v2242_v10, %v2201_v17  ;;  %v2213_v32 = vpop.f32.mrf.mxu1  ;;  %vm2680_vm8 = vcmask 457728  }
 0x484   : > { %2331 = vst.msk [vmem:[#allocation3 + $0x21] sm:$0xff] %vm1712_vm6, %v2301_v5  ;;  %2486 = vrot.lane.b32.xlu0 %v5299_v16, %s3151_s26  ;;  %v2377_v18 = vrot.slane %v5299_v16, 1  ;;  %v2401_v30 = vrot.slane %v5299_v16, 2  ;;  %v2402_v43 = vrot.slane %v2341_v56, 2  ;;  %v2378_v20 = vrot.slane %v2341_v56, 1 }
 0x485   : > { %v2266_v52 = vmul.f32 %v5287_v25, %v2243_v34 }
 0x486   : > { %v2403_v13 = vsel %vm805_vm5, %v2401_v30, %v2402_v43  ;;  %v2379_v63 = vsel %vm724_vm1, %v2377_v18, %v2378_v20 }
 0x487   : > { %2534 = vrot.lane.b32.xlu2 %v2403_v13, %s3152_s13  ;;  %2510 = vrot.lane.b32.xlu1 %v2379_v63, %s3149_s24  ;;  %v2278_v19 = vadd.f32 %v5292_v8, %v2266_v52 }
 0x489   : > { %vm2286_vm10 = vcmp.gt.f32.partialorder %v2278_v19, 0.0  ;;  %v2294_v50 = vmul.f32 0.1, %v2278_v19 }
 0x48a   : > { %v2245_v26 = vpop.f32.mrf.mxu2 }
 0x48b   : > { %v5312_v57 = vld [vmem:[#allocation3 + $0x20] sm:$0xff]  ;;  %v2302_v58 = vsel %vm2286_vm10, %v2278_v19, %v2294_v50  ;;  %v2343_v22 = vld [vmem:[#allocation3 + $0x28] sm:$0x3]  ;;  %v2246_v37 = vadd.f32 %v2245_v26, %v2204_v29  ;;  %v2706_v26 = vld [vmem:[%s5595_s6 + $0x40] sm:$0xff]  ;;  %vm2689_vm10 = vcmask 523264  }
 0x48c   : > { %2558 = vrot.lane.b32.xlu0 %v5312_v57, %s3153_s14  ;;  %2332 = vst.msk [vmem:[#allocation3 + $0x31] sm:$0xff] %vm1712_vm6, %v2302_v58  ;;  %v2404_v33 = vrot.slane %v5312_v57, 2  ;;  %v2405_v12 = vrot.slane %v2343_v22, 2  ;;  %v2380_v59 = vrot.slane %v5312_v57, 1  ;;  %v2381_v41 = vrot.slane %v2343_v22, 1  ;;  %2906 = vmatpush.msrb.mxu3 %v2706_v26  ;;  %v2705_v58 = vld [vmem:[%s5595_s6 + $0x38] sm:$0xff] }
 0x48d   : > { %v2267_v3 = vmul.f32 %v5287_v25, %v2246_v37  ;;  %v2704_v22 = vld [vmem:[%s5595_s6 + $0x30] sm:$0xff]  ;;  %v5399_v37 = vpop.permute.xlu2 %2462 }
 0x48e   : > { %v2406_v39 = vsel %vm805_vm5, %v2404_v33, %v2405_v12  ;;  %v2382_v4 = vsel %vm724_vm1, %v2380_v59, %v2381_v41  ;;  %2907 = vmatpush.msrb.mxu3 %v2705_v58  ;;  %v2703_v33 = vld [vmem:[%s5595_s6 + $0x28] sm:$0xff]  ;;  %v2216_v12 = vpop.f32.mrf.mxu1 }
 0x48f   : > { %2606 = vrot.lane.b32.xlu2 %v2406_v39, %s3154_s16  ;;  %2582 = vrot.lane.b32.xlu1 %v2382_v4, %s3155_s17  ;;  %v2279_v21 = vadd.f32 %v5292_v8, %v2267_v3 }
 0x490   : > { %2908 = vmatpush.msrb.mxu3 %v2704_v22 }
 0x491   : > { %vm2287_vm12 = vcmp.gt.f32.partialorder %v2279_v21, 0.0  ;;  %v2295_v42 = vmul.f32 0.1, %v2279_v21 }
 0x492   : > { %v2248_v9 = vpop.f32.mrf.mxu2  ;;  %2909 = vmatpush.msrb.mxu3 %v2703_v33 }
 0x493   : > { %v2303_v38 = vsel %vm2287_vm12, %v2279_v21, %v2295_v42  ;;  %v2249_v7 = vadd.f32 %v2248_v9, %v2207_v40  ;;  %v2345_v48 = vld [vmem:[#allocation3 + $0x38] sm:$0x3]  ;;  %v5335_v28 = vld [vmem:[#allocation3 + $0x30] sm:$0xff]  ;;  %v2701_v42 = vld [vmem:[%s5595_s6 + $0x18] sm:$0xff]  ;;  %vm2874_vm12 = vcmask 588800  }
 0x494   : > { %2440 = vrot.lane.b32.xlu0 %v2379_v63, %s3145_s20  ;;  %2333 = vst.msk [vmem:[#allocation3 + $0x41] sm:$0xff] %vm1712_vm6, %v2303_v38  ;;  %v2383_v47 = vrot.slane %v5335_v28, 1  ;;  %v2384_v35 = vrot.slane %v2345_v48, 1  ;;  %v2407_v54 = vrot.slane %v5335_v28, 2  ;;  %v2408_v55 = vrot.slane %v2345_v48, 2  ;;  %v2740_v48 = vpop.f32.mrf.mxu3 }
 0x495   : > { %v2268_v62 = vmul.f32 %v5287_v25, %v2249_v7  ;;  %v2700_v7 = vld [vmem:[%s5595_s6 + $0x10] sm:$0xff] }
 0x496   : > { %v2385_v14 = vsel %vm724_vm1, %v2383_v47, %v2384_v35  ;;  %v2409_v53 = vsel %vm805_vm5, %v2407_v54, %v2408_v55  ;;  %v2805_v54 = vld [vmem:[%s5596_s7] sm:$0xf] }
 0x497   : > { %2488 = vrot.lane.b32.xlu2 %v5312_v57, %s3151_s26  ;;  %2464 = vrot.lane.b32.xlu1 %v2403_v13, %s3148_s23  ;;  %v2280_v51 = vadd.f32 %v5292_v8, %v2268_v62  ;;  %v2699_v62 = vld [vmem:[%s5595_s6 + $0x8] sm:$0xff]  ;;  %v2698_v55 = vld [vmem:[%s5595_s6] sm:$0xff] }
 0x498   : > { %3045 = vmatpush.msk.msra.mxu2 %vm2045_vm7, %v2805_v54  ;;  %vm2662_vm7 = vcmask 326656   ;;  %v2357_v54 = vld [vmem:[#allocation3 + $0x98] sm:$0x3] }
 0x499   : > { %vm2288_vm14 = vcmp.gt.f32.partialorder %v2280_v51, 0.0  ;;  %v2296_v60 = vmul.f32 0.1, %v2280_v51 }
 0x49a   : > { %v2251_v27 = vpop.f32.mrf.mxu2 }
 0x49b   : > { %v2304_v45 = vsel %vm2288_vm14, %v2280_v51, %v2296_v60  ;;  %v5350_v23 = vld [vmem:[#allocation3 + $0x40] sm:$0xff]  ;;  %v2347_v46 = vld [vmem:[#allocation3 + $0x48] sm:$0x3]  ;;  %v2252_v36 = vadd.f32 %v2251_v27, %v2210_v44  ;;  %v2781_v51 = vpop.f32.mrf.mxu1 }
 0x49c   : > { %2512 = vrot.lane.b32.xlu0 %v2382_v4, %s3149_s24  ;;  %2334 = vst.msk [vmem:[#allocation3 + $0x51] sm:$0xff] %vm1712_vm6, %v2304_v45  ;;  %v2386_v31 = vrot.slane %v5350_v23, 1  ;;  %v2387_v61 = vrot.slane %v2347_v46, 1  ;;  %v2410_v2 = vrot.slane %v5350_v23, 2  ;;  %v2411_v1 = vrot.slane %v2347_v46, 2 }
 0x49d   : > { %v2269_v49 = vmul.f32 %v5287_v25, %v2252_v36  ;;  %v2782_v60 = vadd.f32 %v2781_v51, %v2740_v48  ;;  %v2439_v36 = vpop.permute.xlu1 %2438 }
 0x49e   : > { %v2388_v15 = vsel %vm724_vm1, %v2386_v31, %v2387_v61  ;;  %v2412_v17 = vsel %vm805_vm5, %v2410_v2, %v2411_v1  ;;  %v2743_v2 = vpop.f32.mrf.mxu3 }
 0x49f   : > { %2560 = vrot.lane.b32.xlu2 %v5335_v28, %s3153_s14  ;;  %2536 = vrot.lane.b32.xlu1 %v2406_v39, %s3152_s13  ;;  %v2281_v6 = vadd.f32 %v5292_v8, %v2269_v49 }
 0x4a0   : > { %3046 = vmatmul.msk.f32.vlgmr.msra.gmra.mxu2 %vm533_vm0, %v2782_v60 }
 0x4a1   : > { %vm2289_vm15 = vcmp.gt.f32.partialorder %v2281_v6, 0.0  ;;  %v2297_v0 = vmul.f32 0.1, %v2281_v6 }
 0x4a2   : > { %v2254_v10 = vpop.f32.mrf.mxu2 }
 0x4a3   : > { %v2305_v11 = vsel %vm2289_vm15, %v2281_v6, %v2297_v0  ;;  %v2255_v5 = vadd.f32 %v2254_v10, %v2213_v32  ;;  %v5372_v34 = vld [vmem:[#allocation3 + $0x50] sm:$0xff]  ;;  %v2349_v30 = vld [vmem:[#allocation3 + $0x58] sm:$0x3]  ;;  %v2784_v1 = vpop.f32.mrf.mxu1 }
 0x4a4   : > { %2584 = vrot.lane.b32.xlu0 %v2385_v14, %s3155_s17  ;;  %2335 = vst.msk [vmem:[#allocation3 + $0x61] sm:$0xff] %vm1712_vm6, %v2305_v11  ;;  %v2413_v20 = vrot.slane %v5372_v34, 2  ;;  %v2414_v52 = vrot.slane %v2349_v30, 2  ;;  %v2389_v13 = vrot.slane %v5372_v34, 1  ;;  %v2390_v63 = vrot.slane %v2349_v30, 1 }
 0x4a5   : > { %v2270_v56 = vmul.f32 %v5287_v25, %v2255_v5  ;;  %v2785_v32 = vadd.f32 %v2784_v1, %v2743_v2 }
 0x4a6   : > { %v2415_v29 = vsel %vm805_vm5, %v2413_v20, %v2414_v52  ;;  %v2391_v50 = vsel %vm724_vm1, %v2389_v13, %v2390_v63 }
 0x4a7   : > { %2442 = vrot.lane.b32.xlu2 %v2382_v4, %s3145_s20  ;;  %2608 = vrot.lane.b32.xlu1 %v2409_v53, %s3154_s16  ;;  %v2282_v18 = vadd.f32 %v5292_v8, %v2270_v56 }
 0x4a8   : > { %3047 = vmatmul.msk.f32.gmra.mxu2 %vm533_vm0, %v2785_v32 }
 0x4a9   : > { %vm2290_vm2 = vcmp.gt.f32.partialorder %v2282_v18, 0.0  ;;  %v2298_v43 = vmul.f32 0.1, %v2282_v18 }
 0x4aa   : > { %v2257_v59 = vpop.f32.mrf.mxu2 }
 0x4ab   : > { %v2306_v19 = vsel %vm2290_vm2, %v2282_v18, %v2298_v43  ;;  %v2258_v41 = vadd.f32 %v2257_v59, %v2216_v12  ;;  %v2351_v3 = vld [vmem:[#allocation3 + $0x68] sm:$0x3]  ;;  %v5409_v21 = vld [vmem:[#allocation3 + $0x60] sm:$0xff] }
 0x4ac   : > { %2466 = vrot.lane.b32.xlu0 %v2406_v39, %s3148_s23  ;;  %2336 = vst.msk [vmem:[#allocation3 + $0x71] sm:$0xff] %vm1712_vm6, %v2306_v19  ;;  %v2702_v39 = vld [vmem:[%s5595_s6 + $0x20] sm:$0xff]  ;;  %v2392_v38 = vrot.slane %v5409_v21, 1  ;;  %v2393_v40 = vrot.slane %v2351_v3, 1  ;;  %v2416_v45 = vrot.slane %v5409_v21, 2 }
 0x4ad   : > { %v2271_v4 = vmul.f32 %v5287_v25, %v2258_v41  ;;  %2910 = vmatpush.msrb.mxu3 %v2702_v39  ;;  %v2787_v39 = vpop.f32.mrf.mxu1 }
 0x4ae   : > { %v2394_v47 = vsel %vm724_vm1, %v2392_v38, %v2393_v40 }
 0x4af   : > { %2514 = vrot.lane.b32.xlu2 %v2385_v14, %s3149_s24  ;;  %2490 = vrot.lane.b32.xlu1 %v5335_v28, %s3151_s26  ;;  %v2283_v9 = vadd.f32 %v5292_v8, %v2271_v4 }
 0x4b0   : > { %2911 = vmatpush.msrb.mxu3 %v2701_v42 }
 0x4b1   : > { %vm2291_vm3 = vcmp.gt.f32.partialorder %v2283_v9, 0.0  ;;  %v2299_v25 = vmul.f32 0.1, %v2283_v9 }
 0x4b2   : > { %2912 = vmatpush.msrb.mxu3 %v2700_v7 }
 0x4b3   : > { %v2307_v35 = vsel %vm2291_vm3, %v2283_v9, %v2299_v25  ;;  %v5441_v27 = vld [vmem:[#allocation3 + $0x70] sm:$0xff]  ;;  %v2353_v46 = vld [vmem:[#allocation3 + $0x78] sm:$0x3] }
 0x4b4   : > { %2538 = vrot.lane.b32.xlu0 %v2409_v53, %s3152_s13  ;;  %2337 = vst.msk [vmem:[#allocation3 + $0x81] sm:$0xff] %vm1712_vm6, %v2307_v35  ;;  %2913 = vmatpush.msrb.mxu3 %v2699_v62  ;;  %v2395_v49 = vrot.slane %v5441_v27, 1  ;;  %v2396_v31 = vrot.slane %v2353_v46, 1  ;;  %v2420_v11 = vrot.slane %v2353_v46, 2 }
 0x4b6   : > { %2914 = vmatpush.msrb.mxu3 %v2698_v55  ;;  %v2397_v6 = vsel %vm724_vm1, %v2395_v49, %v2396_v31  ;;  %v2790_v49 = vpop.f32.mrf.mxu1 }
 0x4b7   : > { %2586 = vrot.lane.b32.xlu2 %v2388_v15, %s3155_s17  ;;  %2562 = vrot.lane.b32.xlu1 %v5350_v23, %s3153_s14 }
 0x4bb   : > { %v2354_v26 = vld [vmem:[#allocation3 + $0x80] sm:$0xff]  ;;  %v2355_v58 = vld [vmem:[#allocation3 + $0x88] sm:$0x3] }
 0x4bc   : > { %2610 = vrot.lane.b32.xlu0 %v2412_v17, %s3154_s16  ;;  %v2424_v33 = vrot.slane %v2354_v26, 1  ;;  %v2427_v12 = vrot.slane %v2354_v26, 2  ;;  %v2428_v59 = vrot.slane %v2355_v58, 2  ;;  %v2425_v41 = vrot.slane %v2355_v58, 1 }
 0x4be   : > { %v2429_v38 = vsel %vm805_vm5, %v2427_v12, %v2428_v59  ;;  %v2426_v40 = vsel %vm724_vm1, %v2424_v33, %v2425_v41 }
 0x4bf   : > { %2468 = vrot.lane.b32.xlu2 %v2409_v53, %s3148_s23  ;;  %2444 = vrot.lane.b32.xlu1 %v2385_v14, %s3145_s20  ;;  %v2417_v14 = vrot.slane %v2351_v3, 2  ;;  %v2746_v3 = vpop.f32.mrf.mxu3 }
 0x4c0   : > { %v2788_v4 = vadd.f32 %v2787_v39, %v2746_v3 }
 0x4c1   : > { %v2418_v53 = vsel %vm805_vm5, %v2416_v45, %v2417_v14  ;;  %v2356_v14 = vld [vmem:[#allocation3 + $0x90] sm:$0xff] }
 0x4c2   : > { %3048 = vmatmul.msk.f32.gmra.mxu2 %vm533_vm0, %v2788_v4  ;;  %v2432_v55 = vrot.slane %v2356_v14, 1  ;;  %v2435_v31 = vrot.slane %v2356_v14, 2 }
 0x4c4   : > { %2492 = vrot.lane.b32.xlu0 %v5350_v23, %s3151_s26 }
 0x4c7   : > { %2540 = vrot.lane.b32.xlu2 %v2412_v17, %s3152_s13  ;;  %2516 = vrot.lane.b32.xlu1 %v2388_v15, %s3149_s24 }
 0x4cc   : > { %2564 = vrot.lane.b32.xlu0 %v5372_v34, %s3153_s14 }
 0x4cf   : > { %2612 = vrot.lane.b32.xlu2 %v2415_v29, %s3154_s16  ;;  %2588 = vrot.lane.b32.xlu1 %v2391_v50, %s3155_s17 }
 0x4d4   : > { %2446 = vrot.lane.b32.xlu0 %v2388_v15, %s3145_s20  ;;  %v2419_v15 = vrot.slane %v5441_v27, 2 }
 0x4d6   : > { %v2421_v18 = vsel %vm805_vm5, %v2419_v15, %v2420_v11 }
 0x4d7   : > { %2494 = vrot.lane.b32.xlu2 %v5372_v34, %s3151_s26  ;;  %2470 = vrot.lane.b32.xlu1 %v2412_v17, %s3148_s23  ;;  %v2630_v17 = vsel %vm1712_vm6, %v5272_v24, %v2439_v36  ;;  %v2749_v36 = vpop.f32.mrf.mxu3 }
 0x4d8   : > { %v2638_v56 = vsel %vm1778_vm9, %v2630_v17, %v5399_v37 }
 0x4dc   : > { %2518 = vrot.lane.b32.xlu0 %v2391_v50, %s3149_s24 }
 0x4df   : > { %2566 = vrot.lane.b32.xlu2 %v5409_v21, %s3153_s14  ;;  %2542 = vrot.lane.b32.xlu1 %v2415_v29, %s3152_s13 }
 0x4e1   : > { %v2535_v8 = vpop.permute.xlu2 %2534 }
 0x4e4   : > { %2590 = vrot.lane.b32.xlu0 %v2394_v47, %s3155_s17 }
 0x4e7   : > { %2448 = vrot.lane.b32.xlu2 %v2391_v50, %s3145_s20  ;;  %2614 = vrot.lane.b32.xlu1 %v2418_v53, %s3154_s16 }
 0x4e9   : > { %v2607_v44 = vpop.permute.xlu2 %2606 }
 0x4ec   : > { %2472 = vrot.lane.b32.xlu0 %v2415_v29, %s3148_s23 }
 0x4ef   : > { %2520 = vrot.lane.b32.xlu2 %v2394_v47, %s3149_s24  ;;  %2496 = vrot.lane.b32.xlu1 %v5409_v21, %s3151_s26 }
 0x4f1   : > { %v2489_v61 = vpop.permute.xlu2 %2488 }
 0x4f4   : > { %2544 = vrot.lane.b32.xlu0 %v2418_v53, %s3152_s13 }
 0x4f6   : > { %v2487_v0 = vpop.permute.xlu0 %2486 }
 0x4f7   : > { %2592 = vrot.lane.b32.xlu2 %v2397_v6, %s3155_s17  ;;  %2568 = vrot.lane.b32.xlu1 %v5441_v27, %s3153_s14  ;;  %v2646_v30 = vsel %vm1844_vm11, %v2638_v56, %v2487_v0 }
 0x4f9   : > { %v2561_v10 = vpop.permute.xlu2 %2560  ;;  %v2511_v5 = vpop.permute.xlu1 %2510 }
 0x4fa   : > { %v2654_v43 = vsel %vm1910_vm13, %v2646_v30, %v2511_v5 }
 0x4fb   : > { %v2663_v24 = vsel %vm2662_vm7, %v2654_v43, %v2535_v8 }
 0x4fc   : > { %2616 = vrot.lane.b32.xlu0 %v2421_v18, %s3154_s16 }
 0x4fe   : > { %v2559_v20 = vpop.permute.xlu0 %2558 }
 0x4ff   : > { %2474 = vrot.lane.b32.xlu2 %v2418_v53, %s3148_s23  ;;  %2450 = vrot.lane.b32.xlu1 %v2394_v47, %s3145_s20  ;;  %v2672_v52 = vsel %vm2671_vm4, %v2663_v24, %v2559_v20  ;;  %v2433_v53 = vrot.slane %v2357_v54, 1 }
 0x501   : > { %v2443_v13 = vpop.permute.xlu2 %2442  ;;  %v2583_v63 = vpop.permute.xlu1 %2582  ;;  %v2434_v15 = vsel %vm724_vm1, %v2432_v55, %v2433_v53 }
 0x502   : > { %v2681_v19 = vsel %vm2680_vm8, %v2672_v52, %v2583_v63  ;;  %v2632_v11 = vsel %vm1712_vm6, %v5312_v57, %v2443_v13  ;;  %v2752_v63 = vpop.f32.mrf.mxu3 }
 0x503   : > { %v2690_v29 = vsel %vm2689_vm10, %v2681_v19, %v2607_v44  ;;  %v2793_v19 = vpop.f32.mrf.mxu1 }
 0x504   : > { %2498 = vrot.lane.b32.xlu0 %v5441_v27, %s3151_s26  ;;  %3054 = vmatmul.msk.f32.vlgmr.msrb.gmra.mxu3 %vm2874_vm12, %v2690_v29 }
 0x506   : > { %v2441_v50 = vpop.permute.xlu0 %2440 }
 0x507   : > { %2546 = vrot.lane.b32.xlu2 %v2421_v18, %s3152_s13  ;;  %2522 = vrot.lane.b32.xlu1 %v2397_v6, %s3149_s24  ;;  %v2631_v9 = vsel %vm1712_vm6, %v5299_v16, %v2441_v50  ;;  %v2794_v50 = vadd.f32 %v2793_v19, %v2752_v63 }
 0x509   : > { %v2515_v22 = vpop.permute.xlu2 %2514  ;;  %v2465_v37 = vpop.permute.xlu1 %2464 }
 0x50a   : > { %v2639_v7 = vsel %vm1778_vm9, %v2631_v9, %v2465_v37 }
 0x50b   : > { %v2647_v48 = vsel %vm1844_vm11, %v2639_v7, %v2489_v61  ;;  %v2436_v61 = vrot.slane %v2357_v54, 2  ;;  %v2796_v9 = vpop.f32.mrf.mxu1 }
 0x50c   : > { %2570 = vrot.lane.b32.xlu0 %v2354_v26, %s3153_s14 }
 0x50d   : > { %v2437_v2 = vsel %vm805_vm5, %v2435_v31, %v2436_v61 }
 0x50e   : > { %v2513_v42 = vpop.permute.xlu0 %2512 }
 0x50f   : > { %2618 = vrot.lane.b32.xlu2 %v2429_v38, %s3154_s16  ;;  %2594 = vrot.lane.b32.xlu1 %v2426_v40, %s3155_s17  ;;  %v2655_v62 = vsel %vm1910_vm13, %v2647_v48, %v2513_v42 }
 0x511   : > { %v2537_v25 = vpop.permute.xlu1 %2536  ;;  %v2587_v51 = vpop.permute.xlu2 %2586 }
 0x512   : > { %v2664_v8 = vsel %vm2662_vm7, %v2655_v62, %v2537_v25 }
 0x513   : > { %v2673_v16 = vsel %vm2671_vm4, %v2664_v8, %v2561_v10 }
 0x514   : > { %2452 = vrot.lane.b32.xlu0 %v2397_v6, %s3145_s20  ;;  %v2791_v6 = vadd.f32 %v2790_v49, %v2749_v36  ;;  %s3065_s20 = sshll.u32 %s5870_s10, 6 }
 0x516   : > { %v2585_v47 = vpop.permute.xlu0 %2584  ;;  %3049 = vmatmul.msk.f32.gmra.mxu2 %vm533_vm0, %v2791_v6 }
 0x517   : > { %2500 = vrot.lane.b32.xlu2 %v2354_v26, %s3151_s26  ;;  %2476 = vrot.lane.b32.xlu1 %v2421_v18, %s3148_s23  ;;  %v2682_v35 = vsel %vm2680_vm8, %v2673_v16, %v2585_v47  ;;  %s5558_s26 = scalar_lea.vmem %s5598_s9, %s3065_s20 }
 0x519   : > { %v2609_v60 = vpop.permute.xlu1 %2608  ;;  %v2469_v44 = vpop.permute.xlu2 %2468 }
 0x51a   : > { %v2691_v45 = vsel %vm2689_vm10, %v2682_v35, %v2609_v60 }
 0x51b   : > { %3055 = vmatmul.msk.f32.gmra.mxu3 %vm2874_vm12, %v2691_v45 }
 0x51c   : > { %2524 = vrot.lane.b32.xlu0 %v2426_v40, %s3149_s24  ;;  %v2755_v40 = vpop.f32.mrf.mxu3 }
 0x51d   : > { %v2797_v7 = vadd.f32 %v2796_v9, %v2755_v40 }
 0x51e   : > { %v2467_v46 = vpop.permute.xlu0 %2466  ;;  %3050 = vmatmul.msk.f32.gmra.mxu2 %vm533_vm0, %v2794_v50 }
 0x51f   : > { %2548 = vrot.lane.b32.xlu1 %v2429_v38, %s3152_s13  ;;  %2572 = vrot.lane.b32.xlu2 %v2356_v14, %s3153_s14  ;;  %v2640_v1 = vsel %vm1778_vm9, %v2632_v11, %v2467_v46  ;;  %v2799_v46 = vpop.f32.mrf.mxu1 }
 0x521   : > { %v2491_v0 = vpop.permute.xlu1 %2490  ;;  %v2541_v10 = vpop.permute.xlu2 %2540 }
 0x522   : > { %v2648_v17 = vsel %vm1844_vm11, %v2640_v1, %v2491_v0 }
 0x523   : > { %v2656_v5 = vsel %vm1910_vm13, %v2648_v17, %v2515_v22 }
 0x524   : > { %2596 = vrot.lane.b32.xlu0 %v2434_v15, %s3155_s17 }
 0x526   : > { %v2539_v32 = vpop.permute.xlu0 %2538  ;;  %3051 = vmatmul.msk.f32.gmra.mxu2 %vm533_vm0, %v2797_v7 }
 0x527   : > { %2620 = vrot.lane.b32.xlu1 %v2437_v2, %s3154_s16  ;;  %v2665_v18 = vsel %vm2662_vm7, %v2656_v5, %v2539_v32 }
 0x529   : > { %v2563_v56 = vpop.permute.xlu1 %2562  ;;  %v2613_v52 = vpop.permute.xlu2 %2612 }
 0x52a   : > { %v2674_v30 = vsel %vm2671_vm4, %v2665_v18, %v2563_v56 }
 0x52b   : > { %v2683_v43 = vsel %vm2680_vm8, %v2674_v30, %v2587_v51 }
 0x52e   : > { %v2611_v57 = vpop.permute.xlu0 %2610 }
 0x52f   : > { %v2692_v20 = vsel %vm2689_vm10, %v2683_v43, %v2611_v57  ;;  %v2802_v57 = vpop.f32.mrf.mxu1 }
 0x530   : > { %3056 = vmatmul.msk.f32.gmra.mxu3 %vm2874_vm12, %v2692_v20 }
 0x531   : > { %v2445_v24 = vpop.permute.xlu1 %2444  ;;  %v2495_v22 = vpop.permute.xlu2 %2494 }
 0x532   : > { %v2633_v29 = vsel %vm1712_vm6, %v5335_v28, %v2445_v24 }
 0x533   : > { %v2641_v58 = vsel %vm1778_vm9, %v2633_v29, %v2469_v44  ;;  %v2758_v44 = vpop.f32.mrf.mxu3 }
 0x534   : > { %v2800_v36 = vadd.f32 %v2799_v46, %v2758_v44 }
 0x536   : > { %v2493_v13 = vpop.permute.xlu0 %2492  ;;  %3052 = vmatmul.msk.f32.gmra.mxu2 %vm533_vm0, %v2800_v36 }
 0x537   : > { %v2649_v37 = vsel %vm1844_vm11, %v2641_v58, %v2493_v13 }
 0x539   : > { %v2517_v26 = vpop.permute.xlu1 %2516  ;;  %v2567_v4 = vpop.permute.xlu2 %2566 }
 0x53a   : > { %v2657_v33 = vsel %vm1910_vm13, %v2649_v37, %v2517_v26 }
 0x53b   : > { %v2666_v59 = vsel %vm2662_vm7, %v2657_v33, %v2541_v10  ;;  %v2761_v30 = vpop.f32.mrf.mxu3  ;;  %v2850_v33 = vpop.f32.mrf.mxu2 }
 0x53c   : > { %v2803_v24 = vadd.f32 %v2802_v57, %v2761_v30 }
 0x53e   : > { %v2565_v12 = vpop.permute.xlu0 %2564  ;;  %3053 = vmatmul.msk.f32.gmra.mxu2 %vm533_vm0, %v2803_v24 }
 0x53f   : > { %v2675_v41 = vsel %vm2671_vm4, %v2666_v59, %v2565_v12 }
 0x541   : > { %v2589_v3 = vpop.permute.xlu1 %2588  ;;  %v2449_v62 = vpop.permute.xlu2 %2448 }
 0x542   : > { %v2684_v39 = vsel %vm2680_vm8, %v2675_v41, %v2589_v3  ;;  %v2635_v31 = vsel %vm1712_vm6, %v5372_v34, %v2449_v62 }
 0x543   : > { %v2693_v28 = vsel %vm2689_vm10, %v2684_v39, %v2613_v52 }
 0x544   : > { %3057 = vmatmul.msk.f32.gmra.mxu3 %vm2874_vm12, %v2693_v28 }
 0x546   : > { %v2447_v42 = vpop.permute.xlu0 %2446 }
 0x547   : > { %v2634_v48 = vsel %vm1712_vm6, %v5350_v23, %v2447_v42 }
 0x549   : > { %v2471_v38 = vpop.permute.xlu1 %2470  ;;  %v2521_v55 = vpop.permute.xlu2 %2520 }
 0x54a   : > { %v2642_v51 = vsel %vm1778_vm9, %v2634_v48, %v2471_v38 }
 0x54b   : > { %v2650_v47 = vsel %vm1844_vm11, %v2642_v51, %v2495_v22 }
 0x54e   : > { %v2519_v25 = vpop.permute.xlu0 %2518 }
 0x54f   : > { %v2658_v16 = vsel %vm1910_vm13, %v2650_v47, %v2519_v25  ;;  %v2853_v47 = vpop.f32.mrf.mxu2 }
 0x551   : > { %v2543_v8 = vpop.permute.xlu1 %2542  ;;  %v2593_v61 = vpop.permute.xlu2 %2592 }
 0x552   : > { %v2667_v35 = vsel %vm2662_vm7, %v2658_v16, %v2543_v8 }
 0x553   : > { %v2676_v45 = vsel %vm2671_vm4, %v2667_v35, %v2567_v4 }
 0x556   : > { %v2591_v60 = vpop.permute.xlu0 %2590 }
 0x557   : > { %v2685_v14 = vsel %vm2680_vm8, %v2676_v45, %v2591_v60  ;;  %v2856_v60 = vpop.f32.mrf.mxu2 }
 0x559   : > { %v2615_v54 = vpop.permute.xlu1 %2614  ;;  %v2475_v32 = vpop.permute.xlu2 %2474 }
 0x55a   : > { %v2694_v53 = vsel %vm2689_vm10, %v2685_v14, %v2615_v54 }
 0x55b   : > { %3058 = vmatmul.msk.f32.gmra.mxu3 %vm2874_vm12, %v2694_v53 }
 0x55e   : > { %v2473_v23 = vpop.permute.xlu0 %2472 }
 0x55f   : > { %v2643_v6 = vsel %vm1778_vm9, %v2635_v31, %v2473_v23 }
 0x561   : > { %v2497_v49 = vpop.permute.xlu1 %2496  ;;  %v2547_v43 = vpop.permute.xlu2 %2546 }
 0x562   : > { %v2651_v0 = vsel %vm1844_vm11, %v2643_v6, %v2497_v49 }
 0x563   : > { %v2659_v11 = vsel %vm1910_vm13, %v2651_v0, %v2521_v55 }
 0x566   : > { %v2545_v15 = vpop.permute.xlu0 %2544 }
 0x567   : > { %v2668_v1 = vsel %vm2662_vm7, %v2659_v11, %v2545_v15 }
 0x569   : > { %v2569_v2 = vpop.permute.xlu1 %2568  ;;  %v2619_v22 = vpop.permute.xlu2 %2618 }
 0x56a   : > { %v2677_v17 = vsel %vm2671_vm4, %v2668_v1, %v2569_v2 }
 0x56b   : > { %v2686_v5 = vsel %vm2680_vm8, %v2677_v17, %v2593_v61 }
 0x56e   : > { %v2617_v10 = vpop.permute.xlu0 %2616 }
 0x56f   : > { %v2695_v56 = vsel %vm2689_vm10, %v2686_v5, %v2617_v10 }
 0x570   : > { %3059 = vmatmul.msk.f32.gmra.mxu3 %vm2874_vm12, %v2695_v56 }
 0x571   : > { %v2451_v34 = vpop.permute.xlu1 %2450  ;;  %v2501_v39 = vpop.permute.xlu2 %2500 }
 0x572   : > { %v2636_v20 = vsel %vm1712_vm6, %v5409_v21, %v2451_v34 }
 0x573   : > { %v2644_v13 = vsel %vm1778_vm9, %v2636_v20, %v2475_v32 }
 0x576   : > { %v2499_v18 = vpop.permute.xlu0 %2498 }
 0x577   : > { %v2652_v63 = vsel %vm1844_vm11, %v2644_v13, %v2499_v18 }
 0x579   : > { %v2523_v52 = vpop.permute.xlu1 %2522  ;;  %v2573_v25 = vpop.permute.xlu2 %2572 }
 0x57a   : > { %v2660_v19 = vsel %vm1910_vm13, %v2652_v63, %v2523_v52 }
 0x57b   : > { %v2669_v50 = vsel %vm2662_vm7, %v2660_v19, %v2547_v43 }
 0x57e   : > { %v2571_v29 = vpop.permute.xlu0 %2570 }
 0x57f   : > { %v2678_v26 = vsel %vm2671_vm4, %v2669_v50, %v2571_v29 }
 0x581   : > { %v2595_v58 = vpop.permute.xlu1 %2594 }
 0x582   : > { %v2687_v37 = vsel %vm2680_vm8, %v2678_v26, %v2595_v58 }
 0x583   : > { %v2696_v21 = vsel %vm2689_vm10, %v2687_v37, %v2619_v22 }
 0x584   : > { %3060 = vmatmul.msk.f32.gmra.mxu3 %vm2874_vm12, %v2696_v21 }
 0x586   : > { %v2453_v12 = vpop.permute.xlu0 %2452 }
 0x587   : > { %v2916_v59 = vpop.f32.mrf.mxu3  ;;  %v2637_v4 = vsel %vm1712_vm6, %v5441_v27, %v2453_v12 }
 0x588   : > { %v2917_v41 = vadd.f32 %v2916_v59, %v2850_v33 }
 0x589   : > { %v2477_v3 = vpop.permute.xlu1 %2476 }
 0x58a   : > { %2940 = vst.msk [vmem:[%s5558_s26] sm:$0xff] %vm1712_vm6, %v2917_v41  ;;  %v2645_v42 = vsel %vm1778_vm9, %v2637_v4, %v2477_v3 }
 0x58b   : > { %v2653_v40 = vsel %vm1844_vm11, %v2645_v42, %v2501_v39 }
 0x58e   : > { %v2525_v28 = vpop.permute.xlu0 %2524 }
 0x58f   : > { %v2661_v9 = vsel %vm1910_vm13, %v2653_v40, %v2525_v28 }
 0x591   : > { %v2549_v38 = vpop.permute.xlu1 %2548 }
 0x592   : > { %v2670_v7 = vsel %vm2662_vm7, %v2661_v9, %v2549_v38 }
 0x593   : > { %v2679_v62 = vsel %vm2671_vm4, %v2670_v7, %v2573_v25 }
 0x596   : > { %v2597_v48 = vpop.permute.xlu0 %2596 }
 0x597   : > { %v2688_v51 = vsel %vm2680_vm8, %v2679_v62, %v2597_v48 }
 0x599   : > { %v2621_v8 = vpop.permute.xlu1 %2620  ;;  %v2859_v54 = vpop.f32.mrf.mxu2 }
 0x59a   : > { %v2697_v27 = vsel %vm2689_vm10, %v2688_v51, %v2621_v8 }
 0x59b   : > { %3061 = vmatmul.msk.f32.gmra.mxu3 %vm2874_vm12, %v2697_v27 }
 0x59e   : > { %v2919_v16 = vpop.f32.mrf.mxu3 }
 0x59f   : > { %v2920_v35 = vadd.f32 %v2919_v16, %v2853_v47 }
 0x5a1   : > { %2941 = vst.msk [vmem:[%s5558_s26 + $0x8] sm:$0xff] %vm1712_vm6, %v2920_v35  ;;  %v2862_v23 = vpop.f32.mrf.mxu2 }
 0x5a9   : > { %v2865_v36 = vpop.f32.mrf.mxu2 }
 0x5b3   : > { %v2922_v45 = vpop.f32.mrf.mxu3 }
 0x5b4   : > { %v2923_v14 = vadd.f32 %v2922_v45, %v2856_v60 }
 0x5b6   : > { %2942 = vst.msk [vmem:[%s5558_s26 + $0x10] sm:$0xff] %vm1712_vm6, %v2923_v14 }
 0x5b9   : > { %v2868_v61 = vpop.f32.mrf.mxu2 }
 0x5c1   : > { %v2871_v15 = vpop.f32.mrf.mxu2 }
 0x5c7   : > { %v2925_v55 = vpop.f32.mrf.mxu3 }
 0x5c8   : > { %v2926_v53 = vadd.f32 %v2925_v55, %v2859_v54 }
 0x5ca   : > { %2943 = vst.msk [vmem:[%s5558_s26 + $0x18] sm:$0xff] %vm1712_vm6, %v2926_v53 }
 0x5de   : > { %v2928_v44 = vpop.f32.mrf.mxu3 }
 0x5df   : > { %v2929_v46 = vadd.f32 %v2928_v44, %v2862_v23 }
 0x5e1   : > { %2944 = vst.msk [vmem:[%s5558_s26 + $0x20] sm:$0xff] %vm1712_vm6, %v2929_v46 }
 0x5f3   : > { %v2931_v49 = vpop.f32.mrf.mxu3 }
 0x5f4   : > { %v2932_v31 = vadd.f32 %v2931_v49, %v2865_v36 }
 0x5f6   : > { %2945 = vst.msk [vmem:[%s5558_s26 + $0x28] sm:$0xff] %vm1712_vm6, %v2932_v31 }
 0x607   : > { %v2934_v6 = vpop.f32.mrf.mxu3 }
 0x608   : > { %v2935_v0 = vadd.f32 %v2934_v6, %v2868_v61 }
 0x60a   : > { %2946 = vst.msk [vmem:[%s5558_s26 + $0x30] sm:$0xff] %vm1712_vm6, %v2935_v0 }
 0x61e   : > { %v2937_v11 = vpop.f32.mrf.mxu3 }
 0x61f   : > { %v2938_v2 = vadd.f32 %v2937_v11, %v2871_v15 }
 0x621   : > { %2947 = vst.msk [vmem:[%s5558_s26 + $0x38] sm:$0xff] %vm1712_vm6, %v2938_v2 }
 0x622 PF: > { %s19_s30 = sadd.s32 1, %s3141_s30  }
 0x623   : > { %p16_p4 = scmp.ge.s32.totalorder %s19_s30, 4  }
 0x625   :  { %18 = sbr.rel (!%p16_p4) target bundleno = 1 (0x1), region = 88 }

</bundles_post_ra>
